<compile_context>
chip_gen: v7x
topology: tpu7x:2x2x1
jax: 0.10.0
libtpu: 0.0.40
codegen_flags: <defaults>
</compile_context>

<pallas_src>
import jax
import jax.numpy as jnp
from jax import lax
from jax.experimental import pallas as pl
from jax.experimental.pallas import tpu as pltpu


def _layernorm(x, gamma, beta, eps):
    mean = jnp.mean(x, axis=-1, keepdims=True)
    xc = x - mean
    var = jnp.mean(xc * xc, axis=-1, keepdims=True)
    inv = lax.rsqrt(var + eps)
    return xc * inv * gamma + beta


def _gelu_exact(x):
    return 0.5 * x * (1.0 + lax.erf(x * (1.0 / jnp.sqrt(2.0).astype(x.dtype))))


def ffn_block_kernel(
    x271_ref, x239_ref,
    w34_ref, w35_ref, w36_ref,          # bf16 weights (pre-converted)
    b35_ref, vecs_ref,                  # f32: (1, Hi) and packed (6, H)
    out_ref,
):
    eps = jnp.float32(1e-12)

    # Packed per-feature vectors: [b34, g11, be11, b36, g12, be12]
    vecs = vecs_ref[...]
    b34, g11, be11 = vecs[0:1], vecs[1:2], vecs[2:3]
    b36, g12, be12 = vecs[3:4], vecs[4:5], vecs[5:6]

    x271 = x271_ref[...]                # (tm, H) f32
    x239 = x239_ref[...]                # (tm, H) f32

    # linear34: bf16 MXU matmul, f32 accumulation
    x272 = jnp.dot(x271.astype(jnp.bfloat16), w34_ref[...],
                   preferred_element_type=jnp.float32) + b34
    # dropout17 (eval) = identity; residual add; layernorm11 (all f32)
    x275 = _layernorm(x272 + x239, g11, be11, eps)
    x275_bf16 = x275.astype(jnp.bfloat16)

    # linear35 -> gelu -> linear36 as two full-width matmuls; the (tm, 1024)
    # f32 intermediate fits VMEM easily on all generations.
    h = jnp.dot(x275_bf16, w35_ref[...],
                preferred_element_type=jnp.float32) + b35_ref[...]
    h = _gelu_exact(h)
    x278 = jnp.dot(h.astype(jnp.bfloat16), w36_ref[...],
                   preferred_element_type=jnp.float32)

    # bias of linear36, dropout18 (eval) = identity, residual add, layernorm12
    x281 = _layernorm(x278 + b36 + x275, g12, be12, eps)
    out_ref[...] = x281.astype(out_ref.dtype)


def _pick_tm(n_tokens):
    """Prefer a 4-step grid: 2 steps per TensorCore on v7x (no idle core) and
    enough steps on v5e/v6e for row DMA / writeback to pipeline behind compute.
    Falls back to 2 steps, then a single step, keeping 8-alignment."""
    for steps in (4, 2):
        tm = n_tokens // steps
        if n_tokens % steps == 0 and tm % 8 == 0:
            return tm
    return n_tokens


def prepare_params(params):
    """One-time (off the hot path) conversion: bf16 weights + packed f32 vectors."""
    w34, b34, g11, be11, w35, b35, w36, b36, g12, be12 = params
    w34_b = w34.astype(jnp.bfloat16)
    w35_b = w35.astype(jnp.bfloat16)
    w36_b = w36.astype(jnp.bfloat16)
    vecs = jnp.concatenate([b34, g11, be11, b36, g12, be12], axis=0)  # (6, H) f32
    return (w34_b, w35_b, w36_b, b35, vecs)


def ffn_block(x271, x239, prepared, *, tm=None):
    """x271, x239: (B, S, H) float32. `prepared` from prepare_params().
    Returns (B, S, H) float32."""
    B, S, H = x271.shape
    N = B * S
    if tm is None:
        tm = _pick_tm(N)
    assert N % tm == 0 and tm % 8 == 0, "token tile must divide N and be 8-aligned"

    x271_2d = x271.reshape(N, H)
    x239_2d = x239.reshape(N, H)

    w34_b, w35_b, w36_b, b35, vecs = prepared
    Hi = w35_b.shape[1]

    row_spec = pl.BlockSpec((tm, H), lambda i: (i, 0))
    full = lambda shape: pl.BlockSpec(shape, lambda i: (0, 0))

    flops = 2 * N * (H * H + H * Hi + Hi * H)
    transcendentals = N * Hi
    bytes_accessed = (3 * N * H * 4                       # x271, x239 in; out
                      + (H * H + H * Hi + Hi * H) * 2     # bf16 weights
                      + (6 * H + Hi) * 4)                 # packed vectors + b35

    out_2d = pl.pallas_call(
        ffn_block_kernel,
        out_shape=jax.ShapeDtypeStruct((N, H), jnp.float32),
        grid_spec=pltpu.PrefetchScalarGridSpec(
            num_scalar_prefetch=0,
            grid=(N // tm,),
            in_specs=[
                row_spec,           # x271
                row_spec,           # x239
                full((H, H)),       # w34 (bf16)
                full((H, Hi)),      # w35 (bf16)
                full((Hi, H)),      # w36 (bf16)
                full((1, Hi)),      # b35 (f32)
                full((6, H)),       # packed b34/g11/be11/b36/g12/be12 (f32)
            ],
            out_specs=row_spec,
        ),
        compiler_params=pltpu.CompilerParams(
            dimension_semantics=("parallel",),
        ),
        cost_estimate=pl.CostEstimate(
            flops=flops,
            transcendentals=transcendentals,
            bytes_accessed=bytes_accessed,
        ),
    )(x271_2d, x239_2d, w34_b, w35_b, w36_b, b35, vecs)

    return out_2d.reshape(B, S, H)


def init_params(key, hidden=256, intermediate=1024):
    ks = jax.random.split(key, 6)
    scale_h = 1.0 / jnp.sqrt(hidden)
    scale_i = 1.0 / jnp.sqrt(intermediate)
    # Linear weights stored as (in_features, out_features)
    w34 = jax.random.uniform(ks[0], (hidden, hidden), jnp.float32, -scale_h, scale_h)
    b34 = jax.random.uniform(ks[1], (1, hidden), jnp.float32, -scale_h, scale_h)
    w35 = jax.random.uniform(ks[2], (hidden, intermediate), jnp.float32, -scale_h, scale_h)
    b35 = jax.random.uniform(ks[3], (1, intermediate), jnp.float32, -scale_h, scale_h)
    w36 = jax.random.uniform(ks[4], (intermediate, hidden), jnp.float32, -scale_i, scale_i)
    b36 = jax.random.uniform(ks[5], (1, hidden), jnp.float32, -scale_i, scale_i)
    # LayerNorm affine params (PyTorch default init: ones / zeros)
    g11 = jnp.ones((1, hidden), jnp.float32)
    be11 = jnp.zeros((1, hidden), jnp.float32)
    g12 = jnp.ones((1, hidden), jnp.float32)
    be12 = jnp.zeros((1, hidden), jnp.float32)
    return (w34, b34, g11, be11, w35, b35, w36, b36, g12, be12)


def reference_f32(x271, x239, params):
    """Pure-f32 JAX reference of the PyTorch forward pass."""
    w34, b34, g11, be11, w35, b35, w36, b36, g12, be12 = params
    x272 = x271 @ w34 + b34
    x275 = _layernorm(x272 + x239, g11, be11, 1e-12)
    x276 = x275 @ w35 + b35
    x277 = _gelu_exact(x276)
    x278 = x277 @ w36 + b36
    return _layernorm(x278 + x275, g12, be12, 1e-12)


def reference_bf16(x271, x239, params):
    """Reference with the same bf16 matmul casts as the kernel (f32 accumulation)."""
    w34, b34, g11, be11, w35, b35, w36, b36, g12, be12 = params
    bf = lambda a: a.astype(jnp.bfloat16)
    x272 = jnp.dot(bf(x271), bf(w34), preferred_element_type=jnp.float32) + b34
    x275 = _layernorm(x272 + x239, g11, be11, 1e-12)
    x276 = jnp.dot(bf(x275), bf(w35), preferred_element_type=jnp.float32) + b35
    x277 = _gelu_exact(x276)
    x278 = jnp.dot(bf(x277), bf(w36), preferred_element_type=jnp.float32) + b36
    return _layernorm(x278 + x275, g12, be12, 1e-12)


if __name__ == "__main__":
    key = jax.random.PRNGKey(0)
    k_in1, k_in2, k_p = jax.random.split(key, 3)

    B, S, H = 1, 384, 256
    x271 = jax.random.normal(k_in1, (B, S, H), jnp.float32)
    x239 = jax.random.normal(k_in2, (B, S, H), jnp.float32)
    params = init_params(k_p, hidden=H, intermediate=1024)

    # One-time prep (off the hot path): bf16 weights + packed vectors.
    prepared = jax.tree_util.tree_map(jax.block_until_ready, prepare_params(params))

    run = jax.jit(ffn_block, static_argnames=("tm",))
    out = run(x271, x239, prepared)
    out = jax.block_until_ready(out)
    assert out.shape == (B, S, H)

    x271_2d = x271.reshape(-1, H)
    x239_2d = x239.reshape(-1, H)

    # Tight check against a reference using the same bf16-operand matmuls.
    ref_bf = reference_bf16(x271_2d, x239_2d, params).reshape(B, S, H)
    assert jnp.allclose(out, ref_bf, atol=1e-2, rtol=1e-2), "mismatch vs bf16-matched reference"

    # Loose sanity check against the full-f32 reference (catches gross errors).
    ref_f32 = reference_f32(x271_2d, x239_2d, params).reshape(B, S, H)
    assert jnp.max(jnp.abs(out - ref_f32)) < 0.15, "gross mismatch vs f32 reference"

    print("KERNEL_OK")
</pallas_src>

<mosaic_0001>
module attributes {stable_mosaic.version = 11 : i64} {
  func.func @ffn_block_kernel(%arg0: i32, %arg1: memref<96x256xf32, #tpu.memory_space<vmem>>, %arg2: memref<96x256xf32, #tpu.memory_space<vmem>>, %arg3: memref<256x256xbf16, #tpu.memory_space<vmem>>, %arg4: memref<256x1024xbf16, #tpu.memory_space<vmem>>, %arg5: memref<1024x256xbf16, #tpu.memory_space<vmem>>, %arg6: memref<1x1024xf32, #tpu.memory_space<vmem>>, %arg7: memref<6x256xf32, #tpu.memory_space<vmem>>, %arg8: memref<96x256xf32, #tpu.memory_space<vmem>>) attributes {dimension_semantics = [#tpu.dimension_semantics<parallel>], iteration_bounds = array<i64: 4>, scalar_prefetch = 0 : i64, scratch_operands = 0 : i64, tpu.core_type = #tpu.core_type<tc>, window_params = [{transform_indices = @transform_0, window_bounds = array<i64: 96, 256>}, {transform_indices = @transform_1, window_bounds = array<i64: 96, 256>}, {pipeline_mode = #tpu.pipeline_mode<synchronous>, transform_indices = @transform_2, window_bounds = array<i64: 256, 256>}, {pipeline_mode = #tpu.pipeline_mode<synchronous>, transform_indices = @transform_3, window_bounds = array<i64: 256, 1024>}, {pipeline_mode = #tpu.pipeline_mode<synchronous>, transform_indices = @transform_4, window_bounds = array<i64: 1024, 256>}, {pipeline_mode = #tpu.pipeline_mode<synchronous>, transform_indices = @transform_5, window_bounds = array<i64: 1, 1024>}, {pipeline_mode = #tpu.pipeline_mode<synchronous>, transform_indices = @transform_6, window_bounds = array<i64: 6, 256>}, {transform_indices = @transform_7, window_bounds = array<i64: 96, 256>}]} {
    %c0 = arith.constant 0 : index
    %c0_0 = arith.constant 0 : index
    %0 = vector.load %arg7[%c0, %c0_0] : memref<6x256xf32, #tpu.memory_space<vmem>>, vector<6x256xf32>
    %1 = vector.extract_strided_slice %0 {offsets = [0, 0], sizes = [1, 256], strides = [1, 1]} : vector<6x256xf32> to vector<1x256xf32>
    %2 = vector.extract_strided_slice %0 {offsets = [1, 0], sizes = [1, 256], strides = [1, 1]} : vector<6x256xf32> to vector<1x256xf32>
    %3 = vector.extract_strided_slice %0 {offsets = [2, 0], sizes = [1, 256], strides = [1, 1]} : vector<6x256xf32> to vector<1x256xf32>
    %4 = vector.extract_strided_slice %0 {offsets = [3, 0], sizes = [1, 256], strides = [1, 1]} : vector<6x256xf32> to vector<1x256xf32>
    %5 = vector.extract_strided_slice %0 {offsets = [4, 0], sizes = [1, 256], strides = [1, 1]} : vector<6x256xf32> to vector<1x256xf32>
    %6 = vector.extract_strided_slice %0 {offsets = [5, 0], sizes = [1, 256], strides = [1, 1]} : vector<6x256xf32> to vector<1x256xf32>
    %c0_1 = arith.constant 0 : index
    %c0_2 = arith.constant 0 : index
    %7 = vector.load %arg1[%c0_1, %c0_2] : memref<96x256xf32, #tpu.memory_space<vmem>>, vector<96x256xf32>
    %c0_3 = arith.constant 0 : index
    %c0_4 = arith.constant 0 : index
    %8 = vector.load %arg2[%c0_3, %c0_4] : memref<96x256xf32, #tpu.memory_space<vmem>>, vector<96x256xf32>
    %9 = arith.truncf %7 : vector<96x256xf32> to vector<96x256xbf16>
    %c0_5 = arith.constant 0 : index
    %c0_6 = arith.constant 0 : index
    %10 = vector.load %arg3[%c0_5, %c0_6] : memref<256x256xbf16, #tpu.memory_space<vmem>>, vector<256x256xbf16>
    %cst = arith.constant dense<0.000000e+00> : vector<96x256xf32>
    %11 = tpu.matmul %9, %10, %cst {dimension_numbers = #tpu.dot_dimension_numbers<[1], [0], [0], [1], [0, 0, 1, 1], [], []>} : vector<96x256xbf16>, vector<256x256xbf16>, vector<96x256xf32> -> vector<96x256xf32>
    %12 = vector.broadcast %1 : vector<1x256xf32> to vector<96x256xf32>
    %13 = arith.addf %11, %12 : vector<96x256xf32>
    %14 = arith.addf %13, %8 : vector<96x256xf32>
    %cst_7 = arith.constant dense<0.000000e+00> : vector<96xf32>
    %15 = vector.multi_reduction <add>, %14, %cst_7 [1] : vector<96x256xf32> to vector<96xf32>
    %16 = vector.shape_cast %15 : vector<96xf32> to vector<96x1xf32>
    %cst_8 = arith.constant 2.560000e+02 : f32
    %17 = vector.broadcast %cst_8 : f32 to vector<96x1xf32>
    %18 = arith.divf %16, %17 : vector<96x1xf32>
    %19 = vector.broadcast %18 : vector<96x1xf32> to vector<96x256xf32>
    %20 = arith.subf %14, %19 : vector<96x256xf32>
    %21 = arith.mulf %20, %20 : vector<96x256xf32>
    %cst_9 = arith.constant dense<0.000000e+00> : vector<96xf32>
    %22 = vector.multi_reduction <add>, %21, %cst_9 [1] : vector<96x256xf32> to vector<96xf32>
    %23 = vector.shape_cast %22 : vector<96xf32> to vector<96x1xf32>
    %cst_10 = arith.constant 2.560000e+02 : f32
    %24 = vector.broadcast %cst_10 : f32 to vector<96x1xf32>
    %25 = arith.divf %23, %24 : vector<96x1xf32>
    %cst_11 = arith.constant 9.99999996E-13 : f32
    %26 = vector.broadcast %cst_11 : f32 to vector<96x1xf32>
    %27 = arith.addf %25, %26 : vector<96x1xf32>
    %28 = math.rsqrt %27 : vector<96x1xf32>
    %29 = vector.broadcast %28 : vector<96x1xf32> to vector<96x256xf32>
    %30 = arith.mulf %20, %29 : vector<96x256xf32>
    %31 = vector.broadcast %2 : vector<1x256xf32> to vector<96x256xf32>
    %32 = arith.mulf %30, %31 : vector<96x256xf32>
    %33 = vector.broadcast %3 : vector<1x256xf32> to vector<96x256xf32>
    %34 = arith.addf %32, %33 : vector<96x256xf32>
    %35 = arith.truncf %34 : vector<96x256xf32> to vector<96x256xbf16>
    %c0_12 = arith.constant 0 : index
    %c0_13 = arith.constant 0 : index
    %36 = vector.load %arg4[%c0_12, %c0_13] : memref<256x1024xbf16, #tpu.memory_space<vmem>>, vector<256x1024xbf16>
    %cst_14 = arith.constant dense<0.000000e+00> : vector<96x1024xf32>
    %37 = tpu.matmul %35, %36, %cst_14 {dimension_numbers = #tpu.dot_dimension_numbers<[1], [0], [0], [1], [0, 0, 1, 1], [], []>} : vector<96x256xbf16>, vector<256x1024xbf16>, vector<96x1024xf32> -> vector<96x1024xf32>
    %c0_15 = arith.constant 0 : index
    %c0_16 = arith.constant 0 : index
    %38 = vector.load %arg6[%c0_15, %c0_16] : memref<1x1024xf32, #tpu.memory_space<vmem>>, vector<1x1024xf32>
    %39 = vector.broadcast %38 : vector<1x1024xf32> to vector<96x1024xf32>
    %40 = arith.addf %37, %39 : vector<96x1024xf32>
    %cst_17 = arith.constant 5.000000e-01 : f32
    %41 = vector.broadcast %cst_17 : f32 to vector<96x1024xf32>
    %42 = arith.mulf %41, %40 : vector<96x1024xf32>
    %cst_18 = arith.constant 2.000000e+00 : f32
    %43 = math.sqrt %cst_18 : f32
    %cst_19 = arith.constant 1.000000e+00 : f32
    %44 = arith.divf %cst_19, %43 : f32
    %45 = vector.broadcast %44 : f32 to vector<96x1024xf32>
    %46 = arith.mulf %40, %45 : vector<96x1024xf32>
    %47 = math.erf %46 : vector<96x1024xf32>
    %cst_20 = arith.constant 1.000000e+00 : f32
    %48 = vector.broadcast %cst_20 : f32 to vector<96x1024xf32>
    %49 = arith.addf %48, %47 : vector<96x1024xf32>
    %50 = arith.mulf %42, %49 : vector<96x1024xf32>
    %51 = arith.truncf %50 : vector<96x1024xf32> to vector<96x1024xbf16>
    %c0_21 = arith.constant 0 : index
    %c0_22 = arith.constant 0 : index
    %52 = vector.load %arg5[%c0_21, %c0_22] : memref<1024x256xbf16, #tpu.memory_space<vmem>>, vector<1024x256xbf16>
    %cst_23 = arith.constant dense<0.000000e+00> : vector<96x256xf32>
    %53 = tpu.matmul %51, %52, %cst_23 {dimension_numbers = #tpu.dot_dimension_numbers<[1], [0], [0], [1], [0, 0, 1, 1], [], []>} : vector<96x1024xbf16>, vector<1024x256xbf16>, vector<96x256xf32> -> vector<96x256xf32>
    %54 = vector.broadcast %4 : vector<1x256xf32> to vector<96x256xf32>
    %55 = arith.addf %53, %54 : vector<96x256xf32>
    %56 = arith.addf %55, %34 : vector<96x256xf32>
    %cst_24 = arith.constant dense<0.000000e+00> : vector<96xf32>
    %57 = vector.multi_reduction <add>, %56, %cst_24 [1] : vector<96x256xf32> to vector<96xf32>
    %58 = vector.shape_cast %57 : vector<96xf32> to vector<96x1xf32>
    %cst_25 = arith.constant 2.560000e+02 : f32
    %59 = vector.broadcast %cst_25 : f32 to vector<96x1xf32>
    %60 = arith.divf %58, %59 : vector<96x1xf32>
    %61 = vector.broadcast %60 : vector<96x1xf32> to vector<96x256xf32>
    %62 = arith.subf %56, %61 : vector<96x256xf32>
    %63 = arith.mulf %62, %62 : vector<96x256xf32>
    %cst_26 = arith.constant dense<0.000000e+00> : vector<96xf32>
    %64 = vector.multi_reduction <add>, %63, %cst_26 [1] : vector<96x256xf32> to vector<96xf32>
    %65 = vector.shape_cast %64 : vector<96xf32> to vector<96x1xf32>
    %cst_27 = arith.constant 2.560000e+02 : f32
    %66 = vector.broadcast %cst_27 : f32 to vector<96x1xf32>
    %67 = arith.divf %65, %66 : vector<96x1xf32>
    %cst_28 = arith.constant 9.99999996E-13 : f32
    %68 = vector.broadcast %cst_28 : f32 to vector<96x1xf32>
    %69 = arith.addf %67, %68 : vector<96x1xf32>
    %70 = math.rsqrt %69 : vector<96x1xf32>
    %71 = vector.broadcast %70 : vector<96x1xf32> to vector<96x256xf32>
    %72 = arith.mulf %62, %71 : vector<96x256xf32>
    %73 = vector.broadcast %5 : vector<1x256xf32> to vector<96x256xf32>
    %74 = arith.mulf %72, %73 : vector<96x256xf32>
    %75 = vector.broadcast %6 : vector<1x256xf32> to vector<96x256xf32>
    %76 = arith.addf %74, %75 : vector<96x256xf32>
    %c0_29 = arith.constant 0 : index
    %c0_30 = arith.constant 0 : index
    %77 = vector.load %arg8[%c0_29, %c0_30] : memref<96x256xf32, #tpu.memory_space<vmem>>, vector<96x256xf32>
    tpu.vector_store %arg8[%c0_29, %c0_30], %76 {strides = array<i32>} : memref<96x256xf32, #tpu.memory_space<vmem>>, vector<96x256xf32>,
    return
  }
  func.func @transform_0(%arg0: i32) -> (i32, i32) {
    %c0_i32 = arith.constant 0 : i32
    %c0_i32_0 = arith.constant 0 : i32
    return %arg0, %c0_i32 : i32, i32
  }
  func.func @transform_1(%arg0: i32) -> (i32, i32) {
    %c0_i32 = arith.constant 0 : i32
    %c0_i32_0 = arith.constant 0 : i32
    return %arg0, %c0_i32 : i32, i32
  }
  func.func @transform_2(%arg0: i32) -> (i32, i32) {
    %c0_i32 = arith.constant 0 : i32
    %c0_i32_0 = arith.constant 0 : i32
    %c0_i32_1 = arith.constant 0 : i32
    return %c0_i32, %c0_i32_0 : i32, i32
  }
  func.func @transform_3(%arg0: i32) -> (i32, i32) {
    %c0_i32 = arith.constant 0 : i32
    %c0_i32_0 = arith.constant 0 : i32
    %c0_i32_1 = arith.constant 0 : i32
    return %c0_i32, %c0_i32_0 : i32, i32
  }
  func.func @transform_4(%arg0: i32) -> (i32, i32) {
    %c0_i32 = arith.constant 0 : i32
    %c0_i32_0 = arith.constant 0 : i32
    %c0_i32_1 = arith.constant 0 : i32
    return %c0_i32, %c0_i32_0 : i32, i32
  }
  func.func @transform_5(%arg0: i32) -> (i32, i32) {
    %c0_i32 = arith.constant 0 : i32
    %c0_i32_0 = arith.constant 0 : i32
    %c0_i32_1 = arith.constant 0 : i32
    return %c0_i32, %c0_i32_0 : i32, i32
  }
  func.func @transform_6(%arg0: i32) -> (i32, i32) {
    %c0_i32 = arith.constant 0 : i32
    %c0_i32_0 = arith.constant 0 : i32
    %c0_i32_1 = arith.constant 0 : i32
    return %c0_i32, %c0_i32_0 : i32, i32
  }
  func.func @transform_7(%arg0: i32) -> (i32, i32) {
    %c0_i32 = arith.constant 0 : i32
    %c0_i32_0 = arith.constant 0 : i32
    return %arg0, %c0_i32 : i32, i32
  }
}

</mosaic_0001>

<bundles_post_ra>
// kernel: ffn_block.1
= control target key start
LH: loop header
LB: loop body
LE: loop exit
PB: predicated region body
PF: predicated region fallthrough
CT: control target
= control target key end

     0   :  { %s7696_s0 = inlined_call_operand.hbm [shape: f32[384,256], index: 0, kind: input, shape index: {}]   ;;  %s7697_s1 = inlined_call_operand.hbm [shape: f32[384,256], index: 1, kind: input, shape index: {}]   ;;  %s7698_s2 = inlined_call_operand.hbm [shape: bf16[256,256], index: 2, kind: input, shape index: {}]   ;;  %s7699_s3 = inlined_call_operand.hbm [shape: bf16[256,1024], index: 3, kind: input, shape index: {}]   ;;  %s7700_s4 = inlined_call_operand.hbm [shape: bf16[1024,256], index: 4, kind: input, shape index: {}]   ;;  %s7701_s5 = inlined_call_operand.vmem [shape: f32[1,1024], index: 5, kind: input, shape index: {}]   ;;  %s7702_s6 = inlined_call_operand.vmem [shape: f32[6,256], index: 6, kind: input, shape index: {}]   ;;  %s7703_s7 = inlined_call_operand.hbm [shape: f32[384,256], index: 7, kind: output, shape index: {}]  }
   0x1   :  { %7750 = sst [smem:[#allocation54_spill]] %s7696_s0 }
   0x2   :  { %7751 = sst [smem:[#allocation55_spill]] %s7698_s2 }
   0x3   :  { %7752 = sst [smem:[#allocation56_spill]] %s7699_s3 }
   0x4   :  { %12 = vsyncpa [#allocation3], 0 }
   0x5   :  { %14 = vsyncpa [#allocation3 + $0x1], 0 }
   0x6   :  { %15 = vsyncpa [#allocation6], 0 }
   0x7   :  { %17 = vsyncpa [#allocation6 + $0x1], 0 }
   0x8   :  { %18 = vsyncpa [#allocation9], 0 }
   0x9   :  { %19 = vsyncpa [#allocation4], 0 }
   0xa   :  { %21 = vsyncpa [#allocation4 + $0x1], 0  ;;  %s5663_s24 = smov 0   ;;  %s5665_s25 = smov 0  }
   0xb   :  { %s5667_s26 = smov 0   ;;  %s5669_s27 = smov 0  }
   0xc LB: > { %s5684_s28 = sadd.s32 4294967295, %s5607_s27   ;;  %s4334_s29 = sadd.s32 4294967294, %s5607_s27   ;;  %s5607_s27 = sphi %s5669_s27, %s7853_s27   ;;  %s5603_s26 = sphi %s5667_s26, %s7852_s26   ;;  %s5599_s25 = sphi %s5665_s25, %s7851_s25   ;;  %s5595_s24 = sphi %s5663_s24, %s7850_s24  }
   0xd   : > { %p47_p0 = scmp.ne.s32.totalorder %s5599_s25, %s5595_s24  ;;  %p7704_p1 = scmp.eq.s32.totalorder %s5684_s28, 0 }
   0xe   : > { %p208_p3 = scmp.eq.s32.totalorder %s4334_s29, 3  ;;  %p4335_p5 = scmp.ge.s32.totalorder %s5607_s27, 1 }
   0xf   : > { %p5693_p4 = por %p7704_p1, %p47_p0  ;;  %p215_p7 = scmp.lt.s32.totalorder %s5607_s27, 5 }
  0x10   : > { %p5698_p6 = por %p208_p3, %p47_p0  ;;  %s5609_s10 = smov [#allocation7]  }
  0x11   : > { %s7753_s30 = scalar_select %p5693_p4, 1, 0 }
  0x12   : > { %s7754_s8 = scalar_select %p5698_p6, 1, 0 }
  0x13   : > { %p5703_p8 = pnand %p4335_p5, %p215_p7  ;;  %s227_s11 = sshll.u32 %s5609_s10, 4  ;;  %s228_s11 = int_to_ptr.vmem [resolvable:$true] %s227_s11 }
  0x14   : > { %7755 = sst [smem:[#allocation17_spill]] %s7754_s8  ;;  %s5610_s13 = smov [#allocation8]  }
  0x15   : > { %s7756_s9 = scalar_select %p5703_p8, 1, 0 }
  0x16   : > { %p4798_p9 = pneg %p5703_p8  ;;  %s240_s14 = sshll.u32 %s5610_s13, 4  ;;  %s5715_s14 = int_to_ptr.vmem [resolvable:$true] %s240_s14 }
  0x17   : > { %s7758_s2 = sld [smem:[#allocation55_spill]] }
  0x18   : > { %p5711_p10 = pnand %p4798_p9, %p7704_p1 }
  0x1a   : > { %p5725_p12 = pneg %p5711_p10 }
  0x1d   : > { %s5385_s17 = scalar_lea.hbm %s7758_s2, 4096 }
  0x1e   : > { %p5386_p11 = scmp.ne.s32.totalorder %s7758_s2, %s5385_s17  ;;  %p5392_p3 = scmp.lt.u32.totalorder %s5385_s17, %s7758_s2 }
  0x20   : > { %p5388_p13 = pnand %p5725_p12, %p5386_p11 }
  0x22   : > { %p5389_p0 = pneg %p5388_p13 }
  0x24   : > { %p5394_p5 = pnand %p5392_p3, %p5389_p0 }
  0x26   : > { %5397 = shalt.err (!%p5394_p5)
}
  0x27   : > { %s5398_s23 = scalar_lea.vmem %s228_s11, 4096  ;;  %p5406_p2 = scmp.lt.s32.totalorder %s228_s11, %s228_s11 }
  0x28   : > { %p5399_p7 = scmp.ne.s32.totalorder %s228_s11, %s5398_s23  ;;  %p5407_p6 = scmp.lt.s32.totalorder %s5398_s23, %s5398_s23 }
  0x2a   : > { %p5401_p9 = pnand %p5399_p7, %p5725_p12  ;;  %p5408_p4 = por %p5407_p6, %p5406_p2 }
  0x2c   : > { %p5402_p1 = pneg %p5401_p9 }
  0x2e   : > { %p5409_p8 = pnand %p5408_p4, %p5402_p1 }
  0x30   : > { %5412 = shalt.err (!%p5409_p8)
}
  0x31   : > { %s7707_s29 = smov 128   ;;  %s7708_s10 = smov 8  }
  0x32   : > { %4801 = dma.hbm_to_vmem [thread:$0]  (!%p5711_p10), %s7758_s2, 4096, %s228_s11, [#allocation6], %s7707_s29, %s7707_s29, %s7708_s10  }
  0x33   : > { %s7760_s3 = sld [smem:[#allocation56_spill]] }
  0x39   : > { %s5413_s18 = scalar_lea.hbm %s7760_s3, 16384 }
  0x3a   : > { %p5414_p1 = scmp.ne.s32.totalorder %s7760_s3, %s5413_s18  ;;  %p5420_p6 = scmp.lt.u32.totalorder %s5413_s18, %s7760_s3 }
  0x3c   : > { %p5416_p2 = pnand %p5414_p1, %p5725_p12 }
  0x3e   : > { %p5417_p4 = pneg %p5416_p2 }
  0x40   : > { %p5422_p8 = pnand %p5420_p6, %p5417_p4 }
  0x42   : > { %5425 = shalt.err (!%p5422_p8)
}
  0x43   : > { %s5426_s11 = scalar_lea.vmem %s5715_s14, 16384  ;;  %p5434_p3 = scmp.lt.s32.totalorder %s5715_s14, %s5715_s14 }
  0x44   : > { %p5427_p11 = scmp.ne.s32.totalorder %s5715_s14, %s5426_s11  ;;  %p5435_p5 = scmp.lt.s32.totalorder %s5426_s11, %s5426_s11 }
  0x46   : > { %p5429_p13 = pnand %p5427_p11, %p5725_p12  ;;  %p5436_p7 = por %p5435_p5, %p5434_p3 }
  0x48   : > { %p5430_p0 = pneg %p5429_p13 }
  0x4a   : > { %p5437_p9 = pnand %p5436_p7, %p5430_p0 }
  0x4c   : > { %5440 = shalt.err (!%p5437_p9)
}
  0x4d   : > { %s5613_s13 = smov 512   ;;  %s5614_s15 = smov 32  }
  0x4e   : > { %4804 = dma.hbm_to_vmem [thread:$0]  (!%p5711_p10), %s7760_s3, 16384, %s5715_s14, [#allocation9], %s5613_s13, %s5613_s13, %s5614_s15  }
  0x4f   : > { %s5615_s18 = smov [#allocation10]   ;;  %s5768_s21 = sadd.s32 1, %s5607_s27  }
  0x50   : > { %s253_s19 = sshll.u32 %s5615_s18, 4  ;;  %s5441_s11 = scalar_lea.hbm %s7700_s4, 16384  ;;  %s254_s19 = int_to_ptr.vmem [resolvable:$true] %s253_s19 }
  0x51   : > { %p5442_p1 = scmp.ne.s32.totalorder %s7700_s4, %s5441_s11  ;;  %p5448_p6 = scmp.lt.u32.totalorder %s5441_s11, %s7700_s4 }
  0x53   : > { %p5444_p2 = pnand %p5442_p1, %p5725_p12 }
  0x55   : > { %p5445_p4 = pneg %p5444_p2 }
  0x57   : > { %p5450_p8 = pnand %p5448_p6, %p5445_p4 }
  0x59   : > { %5453 = shalt.err (!%p5450_p8)
}
  0x5a   : > { %s5454_s14 = scalar_lea.vmem %s254_s19, 16384  ;;  %p5462_p3 = scmp.lt.s32.totalorder %s254_s19, %s254_s19 }
  0x5b   : > { %p5455_p11 = scmp.ne.s32.totalorder %s254_s19, %s5454_s14  ;;  %p5463_p5 = scmp.lt.s32.totalorder %s5454_s14, %s5454_s14 }
  0x5d   : > { %p5457_p13 = pnand %p5455_p11, %p5725_p12  ;;  %p5464_p7 = por %p5463_p5, %p5462_p3 }
  0x5f   : > { %p5458_p0 = pneg %p5457_p13 }
  0x61   : > { %p5465_p9 = pnand %p5464_p7, %p5458_p0 }
  0x63   : > { %5468 = shalt.err (!%p5465_p9)
}
  0x64   : > { %s7761_s29 = smov 8   ;;  %s7762_s10 = smov 128  }
  0x65   : > { %4807 = dma.hbm_to_vmem [thread:$0]  (!%p5711_p10), %s7700_s4, 16384, %s254_s19, [#allocation9], %s7762_s10, %s7762_s10, %s7761_s29  }
  0x66   : > { %s31_s12 = ssub.s32 %s5607_s27, %s5768_s21  ;;  %s34_s20 = sadd.s32 1, %s5603_s26 }
  0x67   : > { %p32_p12 = scmp.eq.s32.totalorder %s31_s12, 0  ;;  %p41_p1 = scmp.ne.s32.totalorder %s5603_s26, %s5599_s25 }
  0x68   : > { %p42_p2 = scmp.eq.s32.totalorder %s5607_s27, 0  ;;  %p4822_p4 = scmp.lt.s32.totalorder %s5607_s27, 4 }
  0x69   : > { %s5799_s13 = scalar_select %p32_p12, %s5603_s26, %s34_s20  }
  0x6a   : > { %p43_p6 = por %p42_p2, %p41_p1  ;;  %p7763_p8 = scmp.eq.s32.totalorder %s5684_s28, 3 }
  0x6b   : > { %s273_s16 = sand.u32 1, %s5603_s26   ;;  %s4646_s17 = smul.u32 3072, %s5607_s27 }
  0x6c   : > { %p5803_p11 = por %p7763_p8, %p41_p1  ;;  %s5809_s18 = smul.u32 192, %s273_s16 }
  0x6d   : > { %s7765_s0 = sld [smem:[#allocation54_spill]]  ;;  %p5818_p10 = pnand %p4822_p4, %p43_p6 }
  0x6e   : > { %s277_s14 = scalar_lea.vmem [#allocation2], %s5809_s18  ;;  %s5825_s10 = scalar_lea.sflag [#allocation3], %s273_s16 }
  0x6f   : > { %s285_s29 = sshll.u32 %s277_s14, 4  ;;  %p5471_p0 = pneg %p5818_p10  ;;  %s5823_s29 = int_to_ptr.vmem [resolvable:$true] %s285_s29 }
  0x73   : > { %s5816_s23 = scalar_lea.hbm %s7765_s0, %s4646_s17  ;;  %s5474_s20 = scalar_lea.hbm %s7765_s0, 12288 }
  0x74   : > { %s5469_s2 = scalar_lea.hbm %s5816_s23, 3072  ;;  %p5475_p7 = scmp.lt.u32.totalorder %s5816_s23, %s7765_s0 }
  0x75   : > { %p5470_p13 = scmp.ne.s32.totalorder %s5816_s23, %s5469_s2  ;;  %p5476_p9 = scmp.lt.u32.totalorder %s5474_s20, %s5469_s2 }
  0x76   : > { %p5478_p1 = scmp.lt.u32.totalorder %s5469_s2, %s5816_s23 }
  0x77   : > { %p5472_p3 = pnand %p5471_p0, %p5470_p13  ;;  %p5477_p12 = por %p5476_p9, %p5475_p7 }
  0x79   : > { %p5473_p5 = pneg %p5472_p3  ;;  %p5479_p2 = por %p5478_p1, %p5477_p12 }
  0x7b   : > { %p5480_p4 = pnand %p5479_p2, %p5473_p5 }
  0x7d   : > { %5483 = shalt.err (!%p5480_p4)
}
  0x7e   : > { %s5484_s16 = scalar_lea.vmem %s5823_s29, 3072  ;;  %s5616_s14 = smov [#allocation2]  }
  0x7f   : > { %p5485_p6 = scmp.ne.s32.totalorder %s5823_s29, %s5484_s16  ;;  %s5489_s8 = sshll.u32 %s5616_s14, 4  ;;  %s5490_s8 = int_to_ptr.vmem [resolvable:$false] %s5489_s8 }
  0x80   : > { %s5491_s12 = scalar_lea.vmem %s5490_s8, 6144  ;;  %p5492_p3 = scmp.lt.s32.totalorder %s5823_s29, %s5490_s8 }
  0x81   : > { %p5487_p8 = pnand %p5485_p6, %p5471_p0  ;;  %p5493_p7 = scmp.lt.s32.totalorder %s5491_s12, %s5484_s16 }
  0x83   : > { %p5488_p13 = pneg %p5487_p8  ;;  %p5494_p9 = por %p5493_p7, %p5492_p3 }
  0x85   : > { %p5495_p12 = pnand %p5494_p9, %p5488_p13 }
  0x87   : > { %5498 = shalt.err (!%p5495_p12)
}
  0x88   : > { %s5617_s2 = smov 256   ;;  %s5618_s20 = smov 16  }
  0x89   : > { %4811 = dma.hbm_to_vmem [thread:$0]  (!%p5818_p10), %s5816_s23, 3072, %s5823_s29, %s5825_s10, %s5617_s2, %s5617_s2, %s5618_s20  }
  0x8a   : > { %s295_s19 = sand.u32 1, %s5607_s27   ;;  %s5862_s14 = scalar_lea.hbm %s7697_s1, %s4646_s17 }
  0x8b   : > { %s299_s8 = scalar_lea.vmem [#allocation5], %s5809_s18  ;;  %s5867_s0 = scalar_lea.sflag [#allocation6], %s295_s19 }
  0x8c   : > { %s307_s12 = sshll.u32 %s299_s8, 4  ;;  %s5499_s3 = scalar_lea.hbm %s5862_s14, 3072  ;;  %s5865_s12 = int_to_ptr.vmem [resolvable:$true] %s307_s12 }
  0x8d   : > { %p5500_p5 = scmp.ne.s32.totalorder %s5862_s14, %s5499_s3  ;;  %s5504_s17 = scalar_lea.hbm %s7697_s1, 12288 }
  0x8e   : > { %p5505_p4 = scmp.lt.u32.totalorder %s5862_s14, %s7697_s1  ;;  %p5506_p6 = scmp.lt.u32.totalorder %s5504_s17, %s5499_s3 }
  0x8f   : > { %p5502_p1 = pnand %p5500_p5, %p5471_p0  ;;  %p5508_p13 = scmp.lt.u32.totalorder %s5499_s3, %s5862_s14 }
  0x90   : > { %p5507_p8 = por %p5506_p6, %p5505_p4 }
  0x91   : > { %p5503_p2 = pneg %p5502_p1 }
  0x92   : > { %p5509_p3 = por %p5508_p13, %p5507_p8 }
  0x94   : > { %p5510_p7 = pnand %p5509_p3, %p5503_p2 }
  0x96   : > { %5513 = shalt.err (!%p5510_p7)
}
  0x97   : > { %s5514_s18 = scalar_lea.vmem %s5865_s12, 3072  ;;  %s5619_s19 = smov [#allocation5]  }
  0x98   : > { %p5515_p9 = scmp.ne.s32.totalorder %s5865_s12, %s5514_s18  ;;  %s5519_s16 = sshll.u32 %s5619_s19, 4  ;;  %s5520_s16 = int_to_ptr.vmem [resolvable:$false] %s5519_s16 }
  0x99   : > { %s5521_s8 = scalar_lea.vmem %s5520_s16, 6144  ;;  %p5522_p1 = scmp.lt.s32.totalorder %s5865_s12, %s5520_s16 }
  0x9a   : > { %p5517_p12 = pnand %p5515_p9, %p5471_p0  ;;  %p5523_p4 = scmp.lt.s32.totalorder %s5521_s8, %s5514_s18 }
  0x9c   : > { %p5518_p5 = pneg %p5517_p12  ;;  %p5524_p6 = por %p5523_p4, %p5522_p1 }
  0x9e   : > { %p5525_p8 = pnand %p5524_p6, %p5518_p5 }
  0xa0   : > { %5528 = shalt.err (!%p5525_p8)
}
  0xa1   : > { %4814 = dma.hbm_to_vmem [thread:$0]  (!%p5818_p10), %s5862_s14, 3072, %s5865_s12, %s5867_s0, %s5617_s2, %s5617_s2, %s5618_s20  }
  0xa2   : > { %p7767_p0 = scmp.ne.s32.totalorder %s7756_s9, 0 }
  0xa4   : > { %319 = sbr.rel (%p7767_p0) target bundleno = 1796 (0x704), region = 48 }
  0xab   : > { %s5899_s3 = sand.u32 1, %s5599_s25   ;;  %p7768_p2 = scmp.ne.s32.totalorder %s7753_s30, 0 }
  0xac   : > { %s5902_s23 = smul.u32 192, %s5899_s3  ;;  %s322_s11 = scalar_lea.sflag [#allocation3], %s5899_s3 }
  0xae   : > { %s5906_s29 = scalar_lea.vmem [#allocation2], %s5902_s23 }
  0xaf   : > { %5574 = dma.done.wait (%p7768_p2), %s322_s11, 3072  }
  0xb0   : > { %5576 = vsyncadd (%p7768_p2), %s322_s11, 4294964224  ;;  %s330_s0 = sand.u32 1, %s5684_s28   ;;  %s5914_s2 = scalar_lea.vmem [#allocation5], %s5902_s23 }
  0xb1   : > { %s331_s9 = scalar_lea.sflag [#allocation6], %s330_s0 }
  0xb2   : > { %5578 = dma.done.wait (%p7768_p2), %s331_s9, 3072  }
  0xb3   : > { %5580 = vsyncadd (%p7768_p2), %s331_s9, 4294964224  ;;  %p7769_p10 = scmp.eq.s32.totalorder %s5684_s28, 0 }
  0xb5   : > { %5582 = dma.done.wait (%p7769_p10), [#allocation6], 4096   ;;  %p7770_p13 = pmov %p7769_p10 }
  0xb6   : > { %p7771_p3 = pmov %p7769_p10 }
  0xb7   : > { %5584 = vsyncadd (%p7770_p13), [#allocation6], 4294963200 }
  0xb8   : > { %5586 = dma.done.wait (%p7771_p3), [#allocation9], 32768   ;;  %p7772_p7 = pmov %p7771_p3 }
  0xb9   : > { %v4870_v0 = vld [vmem:[#allocation7 + $0x4] ss:$8 sps:$4 sm:$0xff]   ;;  %v4872_v1 = vld [vmem:[#allocation7] ss:$8 sps:$4 sm:$0xff]   ;;  %v4873_v2 = vld [vmem:[#allocation7 + $0x14] ss:$8 sps:$4 sm:$0xff]  }
  0xba   : > { %5588 = vsyncadd (%p7772_p7), [#allocation9], 4294934528  ;;  %647 = vmatprep.subr.bf16.mxu0 %v4870_v0  ;;  %v4875_v3 = vld [vmem:[#allocation7 + $0x10] ss:$8 sps:$4 sm:$0xff]   ;;  %v4876_v4 = vld [vmem:[#allocation7 + $0x24] ss:$8 sps:$4 sm:$0xff]  }
  0xbb   : > { %648 = vmatpush1.bf16.msra.mxu0 %v4872_v1  ;;  %v4878_v5 = vld [vmem:[#allocation7 + $0x20] ss:$8 sps:$4 sm:$0xff]   ;;  %v4879_v6 = vld [vmem:[#allocation7 + $0x34] ss:$8 sps:$4 sm:$0xff]   ;;  %v4881_v7 = vld [vmem:[#allocation7 + $0x30] ss:$8 sps:$4 sm:$0xff]  }
  0xbc   : > { %649 = vmatprep.subr.bf16.mxu0 %v4873_v2  ;;  %v4882_v8 = vld [vmem:[#allocation7 + $0x44] ss:$8 sps:$4 sm:$0xff]   ;;  %v4884_v9 = vld [vmem:[#allocation7 + $0x40] ss:$8 sps:$4 sm:$0xff]   ;;  %v4885_v10 = vld [vmem:[#allocation7 + $0x54] ss:$8 sps:$4 sm:$0xff]  }
  0xbd   : > { %v4887_v11 = vld [vmem:[#allocation7 + $0x50] ss:$8 sps:$4 sm:$0xff]   ;;  %v4888_v12 = vld [vmem:[#allocation7 + $0x64] ss:$8 sps:$4 sm:$0xff]   ;;  %v4890_v16 = vld [vmem:[#allocation7 + $0x60] ss:$8 sps:$4 sm:$0xff]  }
  0xbe   : > { %v388_v13 = vld [vmem:[%s5906_s29 + $0x8] sm:$0xff]  ;;  %v390_v14 = vld [vmem:[%s5906_s29 + $0x18] sm:$0xff]  ;;  %v387_v35 = vld [vmem:[%s5906_s29] sm:$0xff]  ;;  %s4196_s30 = scalar_lea.sflag [#allocation4], %s5899_s3  ;;  %s5620_s14 = smov [#allocation11]  }
  0xbf   : > { %650 = vmatpush1.bf16.msra.mxu0 %v4875_v3  ;;  %v436_v15 = vpack.c.bf16 %v390_v14, %v388_v13  ;;  %v4891_v17 = vld [vmem:[#allocation7 + $0x74] ss:$8 sps:$4 sm:$0xff]   ;;  %v4893_v18 = vld [vmem:[#allocation7 + $0x70] ss:$8 sps:$4 sm:$0xff]   ;;  %v4894_v19 = vld [vmem:[#allocation7 + $0x84] ss:$8 sps:$4 sm:$0xff]  }
  0xc0   : > { %651 = vmatprep.subr.bf16.mxu0 %v4876_v4  ;;  %v4896_v20 = vld [vmem:[#allocation7 + $0x80] ss:$8 sps:$4 sm:$0xff]   ;;  %v4897_v21 = vld [vmem:[#allocation7 + $0x94] ss:$8 sps:$4 sm:$0xff]   ;;  %v4899_v22 = vld [vmem:[#allocation7 + $0x90] ss:$8 sps:$4 sm:$0xff]   ;;  %v479_v4 = vlaneseq }
  0xc1   : > { %679 = vmatprep.mubr.bf16.mxu0 %v436_v15  ;;  %v4900_v23 = vld [vmem:[#allocation7 + $0xa4] ss:$8 sps:$4 sm:$0xff]   ;;  %v4902_v24 = vld [vmem:[#allocation7 + $0xa0] ss:$8 sps:$4 sm:$0xff]   ;;  %v4903_v25 = vld [vmem:[#allocation7 + $0xb4] ss:$8 sps:$4 sm:$0xff]  }
  0xc2   : > { %v4905_v26 = vld [vmem:[#allocation7 + $0xb0] ss:$8 sps:$4 sm:$0xff]   ;;  %v4906_v27 = vld [vmem:[#allocation7 + $0xc4] ss:$8 sps:$4 sm:$0xff]   ;;  %v4908_v28 = vld [vmem:[#allocation7 + $0xc0] ss:$8 sps:$4 sm:$0xff]  }
  0xc3   : > { %652 = vmatpush1.bf16.msra.mxu0 %v4878_v5  ;;  %v4909_v29 = vld [vmem:[#allocation7 + $0xd4] ss:$8 sps:$4 sm:$0xff]   ;;  %v4911_v30 = vld [vmem:[#allocation7 + $0xd0] ss:$8 sps:$4 sm:$0xff]   ;;  %v4912_v31 = vld [vmem:[#allocation7 + $0xe4] ss:$8 sps:$4 sm:$0xff]  }
  0xc4   : > { %653 = vmatprep.subr.bf16.mxu0 %v4879_v6  ;;  %v4914_v32 = vld [vmem:[#allocation7 + $0xe0] ss:$8 sps:$4 sm:$0xff]   ;;  %v4915_v33 = vld [vmem:[#allocation7 + $0xf4] ss:$8 sps:$4 sm:$0xff]   ;;  %v4917_v34 = vld [vmem:[#allocation7 + $0xf0] ss:$8 sps:$4 sm:$0xff]  }
  0xc5   : > { %v389_v36 = vld [vmem:[%s5906_s29 + $0x10] sm:$0xff]  ;;  %v392_v37 = vld [vmem:[%s5906_s29 + $0x28] sm:$0xff]  ;;  %v394_v38 = vld [vmem:[%s5906_s29 + $0x38] sm:$0xff]  ;;  %v5952_v5 = vshrl.u32 %v479_v4, 7  ;;  %s5533_s12 = sshll.u32 %s5620_s14, 4  ;;  %s5534_s12 = int_to_ptr.vmem [resolvable:$false] %s5533_s12 }
  0xc6   : > { %v435_v39 = vpack.c.bf16 %v389_v36, %v387_v35  ;;  %v438_v40 = vpack.c.bf16 %v394_v38, %v392_v37  ;;  %v391_v41 = vld [vmem:[%s5906_s29 + $0x20] sm:$0xff]  ;;  %v393_v42 = vld [vmem:[%s5906_s29 + $0x30] sm:$0xff]  ;;  %v396_v43 = vld [vmem:[%s5906_s29 + $0x48] sm:$0xff]  ;;  %s5535_s17 = scalar_lea.vmem %s5534_s12, 6144 }
  0xc7   : > { %654 = vmatpush1.bf16.msra.mxu0 %v4881_v7  ;;  %v398_v44 = vld [vmem:[%s5906_s29 + $0x58] sm:$0xff]  ;;  %v437_v45 = vpack.c.bf16 %v393_v42, %v391_v41  ;;  %v395_v47 = vld [vmem:[%s5906_s29 + $0x40] sm:$0xff]  ;;  %v397_v48 = vld [vmem:[%s5906_s29 + $0x50] sm:$0xff]  ;;  %7773 = vst [vmem:[#allocation18_spill] sm:$0xff] %v5952_v5  ;;  %v5955_v6 = vsub.s32 0, %v5952_v5 }
  0xc8   : > { %655 = vmatprep.subr.bf16.mxu0 %v4882_v8  ;;  %v440_v46 = vpack.c.bf16 %v398_v44, %v396_v43  ;;  %v400_v49 = vld [vmem:[%s5906_s29 + $0x68] sm:$0xff]  ;;  %v402_v50 = vld [vmem:[%s5906_s29 + $0x78] sm:$0xff]  ;;  %v439_v51 = vpack.c.bf16 %v397_v48, %v395_v47  ;;  %v399_v53 = vld [vmem:[%s5906_s29 + $0x60] sm:$0xff] }
  0xc9   : > { %v442_v52 = vpack.c.bf16 %v402_v50, %v400_v49  ;;  %v401_v54 = vld [vmem:[%s5906_s29 + $0x70] sm:$0xff]  ;;  %v404_v55 = vld [vmem:[%s5906_s29 + $0x88] sm:$0xff]  ;;  %v406_v56 = vld [vmem:[%s5906_s29 + $0x98] sm:$0xff] }
  0xca   : > { %v441_v57 = vpack.c.bf16 %v401_v54, %v399_v53  ;;  %v444_v58 = vpack.c.bf16 %v406_v56, %v404_v55  ;;  %v403_v59 = vld [vmem:[%s5906_s29 + $0x80] sm:$0xff]  ;;  %v405_v60 = vld [vmem:[%s5906_s29 + $0x90] sm:$0xff]  ;;  %v408_v61 = vld [vmem:[%s5906_s29 + $0xa8] sm:$0xff] }
  0xcb   : > { %656 = vmatpush1.bf16.msra.mxu0 %v4884_v9  ;;  %v410_v62 = vld [vmem:[%s5906_s29 + $0xb8] sm:$0xff]  ;;  %v443_v63 = vpack.c.bf16 %v405_v60, %v403_v59  ;;  %v407_v1 = vld [vmem:[%s5906_s29 + $0xa0] sm:$0xff]  ;;  %v409_v2 = vld [vmem:[%s5906_s29 + $0xb0] sm:$0xff]  ;;  %s7558_s29 = scalar_lea.vmem [#allocation11], %s5902_s23  ;;  %s4648_s23 = smul.u32 3072, %s5684_s28 }
  0xcc   : > { %657 = vmatprep.subr.bf16.mxu0 %v4885_v10  ;;  %v446_v0 = vpack.c.bf16 %v410_v62, %v408_v61  ;;  %v445_v3 = vpack.c.bf16 %v409_v2, %v407_v1  ;;  %v5960_v7 = vld [vmem:[%s7702_s6] sm:$0x3f]  ;;  %v5965_v8 = vld [vmem:[%s7702_s6 + $0x8] sm:$0x3f]  ;;  %v418_v38 = vld [vmem:[%s5914_s2 + $0x38] sm:$0xff]  ;;  %s4210_s0 = sshll.u32 %s7558_s29, 4  ;;  %s7651_s0 = int_to_ptr.vmem [resolvable:$true] %s4210_s0 }
  0xcd   : > { %v5969_v9 = vrot.slane %v5960_v7, %v5955_v6  ;;  %v5973_v10 = vrot.slane %v5965_v8, %v5955_v6  ;;  %v412_v15 = vld [vmem:[%s5914_s2 + $0x8] sm:$0xff]  ;;  %v421_v53 = vld [vmem:[%s5914_s2 + $0x50] sm:$0xff]  ;;  %s5529_s20 = scalar_lea.vmem %s7651_s0, 3072  ;;  %p5536_p1 = scmp.lt.s32.totalorder %s7651_s0, %s5534_s12 }
  0xce   : > { %v420_v50 = vld [vmem:[%s5914_s2 + $0x48] sm:$0xff]  ;;  %p5530_p9 = scmp.ne.s32.totalorder %s7651_s0, %s5529_s20  ;;  %p5537_p4 = scmp.lt.s32.totalorder %s5535_s17, %s5529_s20 }
  0xcf   : > { %658 = vmatpush1.bf16.msra.mxu0 %v4887_v11  ;;  %v424_v4 = vld [vmem:[%s5914_s2 + $0x68] sm:$0xff] }
  0xd0   : > { %659 = vmatprep.subr.bf16.mxu0 %v4888_v12  ;;  %v411_v12 = vld [vmem:[%s5914_s2] sm:$0xff]  ;;  %p5531_p12 = pnand %p5530_p9, %p5803_p11  ;;  %p5538_p6 = por %p5537_p4, %p5536_p1 }
  0xd2   : > { %p5532_p5 = pneg %p5531_p12 }
  0xd3   : > { %660 = vmatpush1.bf16.msra.mxu0 %v4890_v16 }
  0xd4   : > { %661 = vmatprep.subr.bf16.mxu0 %v4891_v17  ;;  %p5539_p8 = pnand %p5538_p6, %p5532_p5 }
  0xd7   : > { %662 = vmatpush1.bf16.msra.mxu0 %v4893_v18  ;;  %v413_v18 = vld [vmem:[%s5914_s2 + $0x10] sm:$0xff] }
  0xd8   : > { %663 = vmatprep.subr.bf16.mxu0 %v4894_v19 }
  0xdb   : > { %664 = vmatpush1.bf16.msra.mxu0 %v4896_v20  ;;  %v414_v20 = vld [vmem:[%s5914_s2 + $0x18] sm:$0xff] }
  0xdc   : > { %665 = vmatprep.subr.bf16.mxu0 %v4897_v21 }
  0xdf   : > { %666 = vmatpush1.bf16.msra.mxu0 %v4899_v22 }
  0xe0   : > { %667 = vmatprep.subr.bf16.mxu0 %v4900_v23 }
  0xe3   : > { %668 = vmatpush1.bf16.msra.mxu0 %v4902_v24 }
  0xe4   : > { %669 = vmatprep.subr.bf16.mxu0 %v4903_v25 }
  0xe7   : > { %670 = vmatpush1.bf16.msra.mxu0 %v4905_v26 }
  0xe8   : > { %671 = vmatprep.subr.bf16.mxu0 %v4906_v27 }
  0xeb   : > { %672 = vmatpush1.bf16.msra.mxu0 %v4908_v28 }
  0xec   : > { %673 = vmatprep.subr.bf16.mxu0 %v4909_v29  ;;  %v415_v29 = vld [vmem:[%s5914_s2 + $0x20] sm:$0xff] }
  0xef   : > { %674 = vmatpush1.bf16.msra.mxu0 %v4911_v30 }
  0xf0   : > { %675 = vmatprep.subr.bf16.mxu0 %v4912_v31 }
  0xf3   : > { %676 = vmatpush1.bf16.msra.mxu0 %v4914_v32  ;;  %v416_v32 = vld [vmem:[%s5914_s2 + $0x28] sm:$0xff] }
  0xf4   : > { %677 = vmatprep.subr.bf16.mxu0 %v4915_v33 }
  0xf7   : > { %678 = vmatpush1.bf16.msra.mxu0 %v4917_v34  ;;  %v417_v34 = vld [vmem:[%s5914_s2 + $0x30] sm:$0xff] }
  0xfa   : > { %680 = vmatmul.mubr.bf16.vlgmr.msra.gmra.mrb[0].mxu0 %v435_v39 }
  0xfb   : > { %689 = vmatprep.mubr.bf16.mxu0 %v438_v40 }
 0x102   : > { %690 = vmatmul.mubr.bf16.gmra.mrb[4].mxu0 %v437_v45 }
 0x103   : > { %699 = vmatprep.mubr.bf16.mxu0 %v440_v46  ;;  %v419_v46 = vld [vmem:[%s5914_s2 + $0x40] sm:$0xff] }
 0x10a   : > { %700 = vmatmul.mubr.bf16.gmra.mrb[8].mxu0 %v439_v51 }
 0x10b   : > { %709 = vmatprep.mubr.bf16.mxu0 %v442_v52 }
 0x112   : > { %710 = vmatmul.mubr.bf16.gmra.mrb[12].mxu0 %v441_v57  ;;  %v422_v57 = vld [vmem:[%s5914_s2 + $0x58] sm:$0xff] }
 0x113   : > { %719 = vmatprep.mubr.bf16.mxu0 %v444_v58 }
 0x11a   : > { %720 = vmatmul.mubr.bf16.gmra.mrb[16].mxu0 %v443_v63 }
 0x11b   : > { %729 = vmatprep.mubr.bf16.mxu0 %v446_v0  ;;  %v423_v0 = vld [vmem:[%s5914_s2 + $0x60] sm:$0xff] }
 0x122   : > { %730 = vmatmul.mubr.bf16.gmra.mrb[20].mxu0 %v445_v3 }
 0x1cd   : > { %v681_v11 = vpop.f32.mrb[0].mxu0 }
 0x1ce   : > { %v682_v13 = vadd.f32 %v681_v11, %v5969_v9  ;;  %v683_v14 = vpop.f32.mrb[1].mxu0 }
 0x1cf   : > { %v684_v16 = vadd.f32 %v683_v14, %v5973_v10  ;;  %v685_v17 = vpop.f32.mrb[2].mxu0 }
 0x1d0   : > { %v686_v19 = vadd.f32 %v685_v17, %v5969_v9  ;;  %v687_v21 = vpop.f32.mrb[3].mxu0  ;;  %v5982_v22 = vadd.f32 %v682_v13, %v411_v12  ;;  %v425_v13 = vld [vmem:[%s5914_s2 + $0x70] sm:$0xff]  ;;  %v426_v17 = vld [vmem:[%s5914_s2 + $0x78] sm:$0xff] }
 0x1d1   : > { %v688_v23 = vadd.f32 %v687_v21, %v5973_v10  ;;  %v5985_v24 = vadd.f32 %v684_v16, %v412_v15 }
 0x1d2   : > { %v5987_v25 = vadd.f32 %v686_v19, %v413_v18 }
 0x1d3   : > { %v5989_v26 = vadd.f32 %v688_v23, %v414_v20  ;;  %v764_v27 = vadd.f32 %v5985_v24, %v5982_v22 }
 0x1d5   : > { %v691_v28 = vpop.f32.mrb[4].mxu0  ;;  %765 = vadd.xlane.f32.xlu0 %v764_v27  ;;  %v767_v36 = vadd.f32 %v5989_v26, %v5987_v25 }
 0x1d6   : > { %v692_v30 = vadd.f32 %v691_v28, %v5969_v9  ;;  %v693_v31 = vpop.f32.mrb[5].mxu0  ;;  %v427_v28 = vld [vmem:[%s5914_s2 + $0x80] sm:$0xff] }
 0x1d7   : > { %v694_v33 = vadd.f32 %v693_v31, %v5973_v10  ;;  %v695_v35 = vpop.f32.mrb[6].mxu0 }
 0x1d8   : > { %v696_v37 = vadd.f32 %v695_v35, %v5969_v9  ;;  %v697_v39 = vpop.f32.mrb[7].mxu0  ;;  %v6002_v40 = vadd.f32 %v692_v30, %v415_v29  ;;  %v429_v35 = vld [vmem:[%s5914_s2 + $0x90] sm:$0xff] }
 0x1d9   : > { %768 = vadd.xlane.f32.xlu0 %v767_v36  ;;  %v698_v41 = vadd.f32 %v697_v39, %v5973_v10  ;;  %v6005_v42 = vadd.f32 %v694_v33, %v416_v32  ;;  %v428_v32 = vld [vmem:[%s5914_s2 + $0x88] sm:$0xff]  ;;  %v430_v39 = vld [vmem:[%s5914_s2 + $0x98] sm:$0xff] }
 0x1da   : > { %v6007_v43 = vadd.f32 %v696_v37, %v417_v34 }
 0x1db   : > { %v6009_v44 = vadd.f32 %v698_v41, %v418_v38  ;;  %v770_v45 = vadd.f32 %v6005_v42, %v6002_v40 }
 0x1dd   : > { %v701_v47 = vpop.f32.mrb[8].mxu0  ;;  %771 = vadd.xlane.f32.xlu1 %v770_v45  ;;  %v773_v48 = vadd.f32 %v6009_v44, %v6007_v43 }
 0x1de   : > { %v702_v49 = vadd.f32 %v701_v47, %v5969_v9  ;;  %v703_v51 = vpop.f32.mrb[9].mxu0 }
 0x1df   : > { %v704_v52 = vadd.f32 %v703_v51, %v5973_v10  ;;  %v705_v54 = vpop.f32.mrb[10].mxu0 }
 0x1e0   : > { %v6020_v55 = vadd.f32 %v702_v49, %v419_v46  ;;  %v706_v56 = vadd.f32 %v705_v54, %v5969_v9  ;;  %v707_v58 = vpop.f32.mrb[11].mxu0  ;;  %v432_v54 = vld [vmem:[%s5914_s2 + $0xa8] sm:$0xff] }
 0x1e1   : > { %v6024_v59 = vadd.f32 %v704_v52, %v420_v50  ;;  %v708_v60 = vadd.f32 %v707_v58, %v5973_v10  ;;  %774 = vadd.xlane.f32.xlu1 %v773_v48  ;;  %v431_v50 = vld [vmem:[%s5914_s2 + $0xa0] sm:$0xff]  ;;  %v433_v58 = vld [vmem:[%s5914_s2 + $0xb0] sm:$0xff] }
 0x1e2   : > { %v6027_v61 = vadd.f32 %v706_v56, %v421_v53 }
 0x1e3   : > { %v6029_v62 = vadd.f32 %v708_v60, %v422_v57  ;;  %v776_v63 = vadd.f32 %v6024_v59, %v6020_v55 }
 0x1e5   : > { %v711_v1 = vpop.f32.mrb[12].mxu0  ;;  %777 = vadd.xlane.f32.xlu0 %v776_v63  ;;  %v779_v2 = vadd.f32 %v6029_v62, %v6027_v61 }
 0x1e6   : > { %v712_v3 = vadd.f32 %v711_v1, %v5969_v9  ;;  %v713_v11 = vpop.f32.mrb[13].mxu0  ;;  %v434_v1 = vld [vmem:[%s5914_s2 + $0xb8] sm:$0xff]  ;;  %s7645_s2 = scalar_lea.hbm %s7703_s7, %s4648_s23 }
 0x1e7   : > { %v714_v12 = vadd.f32 %v713_v11, %v5973_v10  ;;  %v715_v14 = vpop.f32.mrb[14].mxu0  ;;  %780 = vadd.xlane.f32.xlu1 %v779_v2 }
 0x1e8   : > { %v6040_v15 = vadd.f32 %v712_v3, %v423_v0  ;;  %v716_v16 = vadd.f32 %v715_v14, %v5969_v9  ;;  %v717_v18 = vpop.f32.mrb[15].mxu0 }
 0x1e9   : > { %v6044_v19 = vadd.f32 %v714_v12, %v424_v4  ;;  %v718_v20 = vadd.f32 %v717_v18, %v5973_v10 }
 0x1ea   : > { %v6047_v21 = vadd.f32 %v716_v16, %v425_v13  ;;  %v1033_v16 = vld [vmem:[#allocation8] sm:$0xff] }
 0x1eb   : > { %v6049_v23 = vadd.f32 %v718_v20, %v426_v17  ;;  %v782_v27 = vadd.f32 %v6044_v19, %v6040_v15  ;;  %v1035_v17 = vld [vmem:[#allocation8 + $0x10] sm:$0xff] }
 0x1ed   : > { %v721_v29 = vpop.f32.mrb[16].mxu0  ;;  %783 = vadd.xlane.f32.xlu0 %v782_v27  ;;  %v785_v30 = vadd.f32 %v6049_v23, %v6047_v21  ;;  %v1039_v27 = vld [vmem:[#allocation8 + $0x30] sm:$0xff] }
 0x1ee   : > { %v722_v31 = vadd.f32 %v721_v29, %v5969_v9  ;;  %v723_v33 = vpop.f32.mrb[17].mxu0  ;;  %v4385_v29 = vcombine.high %v1035_v17, %v1039_v27 }
 0x1ef   : > { %v724_v34 = vadd.f32 %v723_v33, %v5973_v10  ;;  %v725_v36 = vpop.f32.mrb[18].mxu0  ;;  %786 = vadd.xlane.f32.xlu1 %v785_v30  ;;  %v4384_v30 = vcombine.low %v1035_v17, %v1039_v27  ;;  %v1047_v33 = vld [vmem:[#allocation8 + $0x70] sm:$0xff]  ;;  %v1073_v17 = vld [vmem:[#allocation8 + $0x140] sm:$0xff] }
 0x1f0   : > { %v6060_v37 = vadd.f32 %v722_v31, %v427_v28  ;;  %v726_v38 = vadd.f32 %v725_v36, %v5969_v9  ;;  %v727_v41 = vpop.f32.mrb[19].mxu0  ;;  %v1041_v28 = vld [vmem:[#allocation8 + $0x40] sm:$0xff]  ;;  %2029 = vmatprep.subr.bf16.mxu1 %v4385_v29  ;;  %v1079_v27 = vld [vmem:[#allocation8 + $0x170] sm:$0xff] }
 0x1f1   : > { %v6064_v45 = vadd.f32 %v724_v34, %v428_v32  ;;  %v728_v46 = vadd.f32 %v727_v41, %v5973_v10  ;;  %v1043_v32 = vld [vmem:[#allocation8 + $0x50] sm:$0xff]  ;;  %v1049_v34 = vld [vmem:[#allocation8 + $0x80] sm:$0xff]  ;;  %2030 = vmatpush1.bf16.msra.mxu1 %v4384_v30 }
 0x1f2   : > { %v6067_v47 = vadd.f32 %v726_v38, %v429_v35  ;;  %v4393_v35 = vcombine.high %v1043_v32, %v1047_v33  ;;  %v1053_v36 = vld [vmem:[#allocation8 + $0xa0] sm:$0xff]  ;;  %v1051_v38 = vld [vmem:[#allocation8 + $0x90] sm:$0xff] }
 0x1f3   : > { %v6069_v48 = vadd.f32 %v728_v46, %v430_v39  ;;  %v788_v49 = vadd.f32 %v6064_v45, %v6060_v37  ;;  %v1055_v39 = vld [vmem:[#allocation8 + $0xb0] sm:$0xff]  ;;  %v4392_v46 = vcombine.low %v1043_v32, %v1047_v33  ;;  %v1085_v32 = vld [vmem:[#allocation8 + $0x1a0] sm:$0xff] }
 0x1f4   : > { %2031 = vmatprep.subr.bf16.mxu1 %v4393_v35  ;;  %v1083_v33 = vld [vmem:[#allocation8 + $0x190] sm:$0xff] }
 0x1f5   : > { %v731_v51 = vpop.f32.mrb[20].mxu0  ;;  %789 = vadd.xlane.f32.xlu0 %v788_v49  ;;  %v791_v52 = vadd.f32 %v6069_v48, %v6067_v47  ;;  %v4397_v49 = vcombine.high %v1049_v34, %v1053_v36  ;;  %2032 = vmatpush1.bf16.msra.mxu1 %v4392_v46  ;;  %v1093_v46 = vld [vmem:[#allocation8 + $0x1e0] sm:$0xff] }
 0x1f6   : > { %v732_v53 = vadd.f32 %v731_v51, %v5969_v9  ;;  %v733_v56 = vpop.f32.mrb[21].mxu0  ;;  %v1057_v51 = vld [vmem:[#allocation8 + $0xc0] sm:$0xff] }
 0x1f7   : > { %v734_v57 = vadd.f32 %v733_v56, %v5973_v10  ;;  %v735_v60 = vpop.f32.mrb[22].mxu0  ;;  %792 = vadd.xlane.f32.xlu1 %v791_v52  ;;  %v1061_v52 = vld [vmem:[#allocation8 + $0xe0] sm:$0xff]  ;;  %v4396_v56 = vcombine.low %v1049_v34, %v1053_v36  ;;  %v1087_v34 = vld [vmem:[#allocation8 + $0x1b0] sm:$0xff] }
 0x1f8   : > { %v6080_v63 = vadd.f32 %v732_v53, %v431_v50  ;;  %v736_v0 = vadd.f32 %v735_v60, %v5969_v9  ;;  %v737_v2 = vpop.f32.mrb[23].mxu0  ;;  %v1037_v9 = vld [vmem:[#allocation8 + $0x20] sm:$0xff]  ;;  %v4401_v50 = vcombine.high %v1051_v38, %v1055_v39  ;;  %v1059_v53 = vld [vmem:[#allocation8 + $0xd0] sm:$0xff] }
 0x1f9   : > { %v6084_v3 = vadd.f32 %v734_v57, %v432_v54  ;;  %v738_v4 = vadd.f32 %v737_v2, %v5973_v10  ;;  %v4380_v18 = vcombine.low %v1033_v16, %v1037_v9  ;;  %v4381_v20 = vcombine.high %v1033_v16, %v1037_v9  ;;  %v1045_v10 = vld [vmem:[#allocation8 + $0x60] sm:$0xff]  ;;  %v1063_v54 = vld [vmem:[#allocation8 + $0xf0] sm:$0xff] }
 0x1fa   : > { %v6087_v11 = vadd.f32 %v736_v0, %v433_v58  ;;  %v4389_v31 = vcombine.high %v1041_v28, %v1045_v10  ;;  %v4388_v41 = vcombine.low %v1041_v28, %v1045_v10  ;;  %v4400_v57 = vcombine.low %v1051_v38, %v1055_v39  ;;  %2033 = vmatprep.subr.bf16.mxu1 %v4401_v50  ;;  %v1065_v0 = vld [vmem:[#allocation8 + $0x100] sm:$0xff]  ;;  %v1067_v2 = vld [vmem:[#allocation8 + $0x110] sm:$0xff] }
 0x1fb   : > { %v6089_v12 = vadd.f32 %v738_v4, %v434_v1  ;;  %v794_v13 = vadd.f32 %v6084_v3, %v6080_v63  ;;  %1843 = vmatprep.subr.bf16.mxu0 %v4381_v20  ;;  %v4405_v58 = vcombine.high %v1057_v51, %v1061_v52  ;;  %v4409_v60 = vcombine.high %v1059_v53, %v1063_v54  ;;  %v1069_v1 = vld [vmem:[#allocation8 + $0x120] sm:$0xff]  ;;  %v1071_v4 = vld [vmem:[#allocation8 + $0x130] sm:$0xff] }
 0x1fc   : > { %1844 = vmatpush1.bf16.msra.mxu0 %v4380_v18  ;;  %2034 = vmatpush1.bf16.msra.mxu1 %v4400_v57  ;;  %v4413_v16 = vcombine.high %v1065_v0, %v1069_v1  ;;  %v4417_v9 = vcombine.high %v1067_v2, %v1071_v4  ;;  %v1077_v18 = vld [vmem:[#allocation8 + $0x160] sm:$0xff]  ;;  %v1075_v20 = vld [vmem:[#allocation8 + $0x150] sm:$0xff]  ;;  %v4412_v28 = vcombine.low %v1065_v0, %v1069_v1 }
 0x1fd   : > { %795 = vadd.xlane.f32.xlu0 %v794_v13  ;;  %v797_v14 = vadd.f32 %v6089_v12, %v6087_v11  ;;  %1845 = vmatprep.subr.bf16.mxu0 %v4389_v31  ;;  %v4404_v13 = vcombine.low %v1057_v51, %v1061_v52  ;;  %v4416_v10 = vcombine.low %v1067_v2, %v1071_v4  ;;  %v1081_v31 = vld [vmem:[#allocation8 + $0x180] sm:$0xff]  ;;  %v1095_v50 = vld [vmem:[#allocation8 + $0x1f0] sm:$0xff] }
 0x1fe   : > { %2035 = vmatprep.subr.bf16.mxu1 %v4409_v60  ;;  %v4421_v29 = vcombine.high %v1073_v17, %v1077_v18  ;;  %v4425_v30 = vcombine.high %v1075_v20, %v1079_v27  ;;  %v4420_v35 = vcombine.low %v1073_v17, %v1077_v18  ;;  %v4424_v36 = vcombine.low %v1075_v20, %v1079_v27  ;;  %v1101_v57 = vld [vmem:[#allocation8 + $0x220] sm:$0xff]  ;;  %v1103_v60 = vld [vmem:[#allocation8 + $0x230] sm:$0xff] }
 0x1ff   : > { %798 = vadd.xlane.f32.xlu1 %v797_v14  ;;  %v4408_v14 = vcombine.low %v1059_v53, %v1063_v54  ;;  %v4429_v38 = vcombine.high %v1081_v31, %v1085_v32  ;;  %v4433_v39 = vcombine.high %v1083_v33, %v1087_v34  ;;  %v4428_v51 = vcombine.low %v1081_v31, %v1085_v32 }
 0x200   : > { %1846 = vmatpush1.bf16.msra.mxu0 %v4388_v41  ;;  %v1089_v41 = vld [vmem:[#allocation8 + $0x1c0] sm:$0xff]  ;;  %v4432_v52 = vcombine.low %v1083_v33, %v1087_v34 }
 0x201   : > { %1847 = vmatprep.subr.bf16.mxu0 %v4397_v49  ;;  %2036 = vmatpush1.bf16.msra.mxu1 %v4408_v14  ;;  %v1091_v49 = vld [vmem:[#allocation8 + $0x1d0] sm:$0xff]  ;;  %v4437_v53 = vcombine.high %v1089_v41, %v1093_v46  ;;  %v4436_v0 = vcombine.low %v1089_v41, %v1093_v46  ;;  %v1109_v14 = vld [vmem:[#allocation8 + $0x260] sm:$0xff] }
 0x202   : > { %2037 = vmatprep.subr.bf16.mxu1 %v4417_v9  ;;  %v4441_v54 = vcombine.high %v1091_v49, %v1095_v50  ;;  %v4440_v1 = vcombine.low %v1091_v49, %v1095_v50 }
 0x204   : > { %1848 = vmatpush1.bf16.msra.mxu0 %v4396_v56  ;;  %v1097_v56 = vld [vmem:[#allocation8 + $0x200] sm:$0xff] }
 0x205   : > { %1849 = vmatprep.subr.bf16.mxu0 %v4405_v58  ;;  %2038 = vmatpush1.bf16.msra.mxu1 %v4416_v10  ;;  %v1099_v58 = vld [vmem:[#allocation8 + $0x210] sm:$0xff]  ;;  %v4445_v2 = vcombine.high %v1097_v56, %v1101_v57 }
 0x206   : > { %2039 = vmatprep.subr.bf16.mxu1 %v4425_v30  ;;  %v4449_v4 = vcombine.high %v1099_v58, %v1103_v60  ;;  %v4448_v9 = vcombine.low %v1099_v58, %v1103_v60 }
 0x208   : > { %1850 = vmatpush1.bf16.msra.mxu0 %v4404_v13  ;;  %v1105_v13 = vld [vmem:[#allocation8 + $0x240] sm:$0xff] }
 0x209   : > { %1851 = vmatprep.subr.bf16.mxu0 %v4413_v16  ;;  %2040 = vmatpush1.bf16.msra.mxu1 %v4424_v36  ;;  %v4444_v16 = vcombine.low %v1097_v56, %v1101_v57  ;;  %v4453_v17 = vcombine.high %v1105_v13, %v1109_v14  ;;  %v4452_v18 = vcombine.low %v1105_v13, %v1109_v14 }
 0x20a   : > { %2041 = vmatprep.subr.bf16.mxu1 %v4433_v39 }
 0x20c   : > { %1852 = vmatpush1.bf16.msra.mxu0 %v4412_v28 }
 0x20d   : > { %1853 = vmatprep.subr.bf16.mxu0 %v4421_v29  ;;  %2042 = vmatpush1.bf16.msra.mxu1 %v4432_v52 }
 0x20e   : > { %2043 = vmatprep.subr.bf16.mxu1 %v4441_v54 }
 0x210   : > { %1854 = vmatpush1.bf16.msra.mxu0 %v4420_v35 }
 0x211   : > { %1855 = vmatprep.subr.bf16.mxu0 %v4429_v38  ;;  %2044 = vmatpush1.bf16.msra.mxu1 %v4440_v1  ;;  %v1111_v1 = vld [vmem:[#allocation8 + $0x270] sm:$0xff] }
 0x212   : > { %2045 = vmatprep.subr.bf16.mxu1 %v4449_v4 }
 0x214   : > { %1856 = vmatpush1.bf16.msra.mxu0 %v4428_v51 }
 0x215   : > { %1857 = vmatprep.subr.bf16.mxu0 %v4437_v53  ;;  %2046 = vmatpush1.bf16.msra.mxu1 %v4448_v9 }
 0x218   : > { %1858 = vmatpush1.bf16.msra.mxu0 %v4436_v0  ;;  %v1107_v0 = vld [vmem:[#allocation8 + $0x250] sm:$0xff] }
 0x219   : > { %1859 = vmatprep.subr.bf16.mxu0 %v4445_v2  ;;  %v4457_v14 = vcombine.high %v1107_v0, %v1111_v1 }
 0x21b   : > { %2047 = vmatprep.subr.bf16.mxu1 %v4457_v14  ;;  %v1135_v14 = vld [vmem:[#allocation8 + $0x330] sm:$0xff] }
 0x21c   : > { %1860 = vmatpush1.bf16.msra.mxu0 %v4444_v16 }
 0x21d   : > { %1861 = vmatprep.subr.bf16.mxu0 %v4453_v17  ;;  %v1113_v17 = vld [vmem:[#allocation8 + $0x280] sm:$0xff] }
 0x220   : > { %1862 = vmatpush1.bf16.msra.mxu0 %v4452_v18  ;;  %v1117_v18 = vld [vmem:[#allocation8 + $0x2a0] sm:$0xff] }
 0x262   : > { %v766_v20 = vpop.xlane.xlu0 %765 }
 0x263   : > { %v801_v27 = vmul.f32 0.00390625, %v766_v20  ;;  %v4461_v20 = vcombine.high %v1113_v17, %v1117_v18 }
 0x265   : > { %v6096_v28 = vsub.f32 %v5982_v22, %v801_v27  ;;  %v6099_v10 = vsub.f32 %v5985_v24, %v801_v27  ;;  %v1115_v27 = vld [vmem:[#allocation8 + $0x290] sm:$0xff]  ;;  %1863 = vmatprep.subr.bf16.mxu0 %v4461_v20 }
 0x266   : > { %v769_v29 = vpop.xlane.xlu0 %768 }
 0x267   : > { %v802_v30 = vmul.f32 0.00390625, %v769_v29  ;;  %v837_v31 = vmul.f32 %v6096_v28, %v6096_v28  ;;  %v838_v32 = vmul.f32 %v6099_v10, %v6099_v10  ;;  %v1119_v29 = vld [vmem:[#allocation8 + $0x2b0] sm:$0xff] }
 0x269   : > { %v6106_v33 = vsub.f32 %v5987_v25, %v802_v30  ;;  %v6109_v34 = vsub.f32 %v5989_v26, %v802_v30  ;;  %v861_v35 = vadd.f32 %v838_v32, %v837_v31  ;;  %v4460_v32 = vcombine.low %v1113_v17, %v1117_v18 }
 0x26a   : > { %v772_v22 = vpop.xlane.xlu1 %771 }
 0x26b   : > { %v803_v36 = vmul.f32 0.00390625, %v772_v22  ;;  %862 = vadd.xlane.f32.xlu0 %v861_v35  ;;  %v839_v24 = vmul.f32 %v6106_v33, %v6106_v33  ;;  %v840_v38 = vmul.f32 %v6109_v34, %v6109_v34  ;;  %v4465_v35 = vcombine.high %v1115_v27, %v1119_v29  ;;  %1864 = vmatpush1.bf16.msra.mxu0 %v4460_v32  ;;  %v1139_v32 = vld [vmem:[#allocation8 + $0x350] sm:$0xff] }
 0x26d   : > { %v6116_v39 = vsub.f32 %v6002_v40, %v803_v36  ;;  %v6119_v41 = vsub.f32 %v6005_v42, %v803_v36  ;;  %v864_v25 = vadd.f32 %v840_v38, %v839_v24  ;;  %v4464_v36 = vcombine.low %v1115_v27, %v1119_v29  ;;  %v1137_v29 = vld [vmem:[#allocation8 + $0x340] sm:$0xff] }
 0x26e   : > { %v775_v46 = vpop.xlane.xlu1 %774 }
 0x26f   : > { %v804_v26 = vmul.f32 0.00390625, %v775_v46  ;;  %865 = vadd.xlane.f32.xlu1 %v864_v25  ;;  %v841_v49 = vmul.f32 %v6116_v39, %v6116_v39  ;;  %v842_v50 = vmul.f32 %v6119_v41, %v6119_v41  ;;  %v1121_v46 = vld [vmem:[#allocation8 + $0x2c0] sm:$0xff] }
 0x271   : > { %v6126_v51 = vsub.f32 %v6007_v43, %v804_v26  ;;  %v6129_v52 = vsub.f32 %v6009_v44, %v804_v26  ;;  %v867_v40 = vadd.f32 %v842_v50, %v841_v49  ;;  %v1125_v26 = vld [vmem:[#allocation8 + $0x2e0] sm:$0xff]  ;;  %v1123_v50 = vld [vmem:[#allocation8 + $0x2d0] sm:$0xff] }
 0x272   : > { %v778_v53 = vpop.xlane.xlu0 %777  ;;  %v4469_v49 = vcombine.high %v1121_v46, %v1125_v26 }
 0x273   : > { %v805_v42 = vmul.f32 0.00390625, %v778_v53  ;;  %868 = vadd.xlane.f32.xlu0 %v867_v40  ;;  %v843_v54 = vmul.f32 %v6126_v51, %v6126_v51  ;;  %v844_v56 = vmul.f32 %v6129_v52, %v6129_v52  ;;  %v1127_v40 = vld [vmem:[#allocation8 + $0x2f0] sm:$0xff] }
 0x274   : > { %v781_v57 = vpop.xlane.xlu1 %780  ;;  %1865 = vmatprep.subr.bf16.mxu0 %v4469_v49 }
 0x275   : > { %v6136_v58 = vsub.f32 %v6020_v55, %v805_v42  ;;  %v6139_v43 = vsub.f32 %v6024_v59, %v805_v42  ;;  %v806_v60 = vmul.f32 0.00390625, %v781_v57  ;;  %v870_v44 = vadd.f32 %v844_v56, %v843_v54 }
 0x276   : > { %v4456_v59 = vcombine.low %v1107_v0, %v1111_v1  ;;  %v4468_v54 = vcombine.low %v1121_v46, %v1125_v26  ;;  %v4473_v56 = vcombine.high %v1123_v50, %v1127_v40  ;;  %v4472_v57 = vcombine.low %v1123_v50, %v1127_v40  ;;  %v1133_v0 = vld [vmem:[#allocation8 + $0x320] sm:$0xff] }
 0x277   : > { %v6142_v2 = vsub.f32 %v6027_v61, %v806_v60  ;;  %v6145_v4 = vsub.f32 %v6029_v62, %v806_v60  ;;  %871 = vadd.xlane.f32.xlu1 %v870_v44  ;;  %v845_v13 = vmul.f32 %v6136_v58, %v6136_v58  ;;  %v846_v55 = vmul.f32 %v6139_v43, %v6139_v43  ;;  %v1149_v40 = vld [vmem:[#allocation8 + $0x3a0] sm:$0xff] }
 0x278   : > { %2048 = vmatpush1.bf16.msra.mxu1 %v4456_v59  ;;  %1866 = vmatpush1.bf16.msra.mxu0 %v4468_v54  ;;  %v1147_v54 = vld [vmem:[#allocation8 + $0x390] sm:$0xff] }
 0x279   : > { %v873_v16 = vadd.f32 %v846_v55, %v845_v13  ;;  %v847_v9 = vmul.f32 %v6142_v2, %v6142_v2  ;;  %v848_v61 = vmul.f32 %v6145_v4, %v6145_v4  ;;  %2049 = vmatprep.subr.bf16.mxu1 %v4465_v35  ;;  %v1131_v55 = vld [vmem:[#allocation8 + $0x310] sm:$0xff] }
 0x27a   : > { %v784_v62 = vpop.xlane.xlu0 %783  ;;  %v4480_v18 = vcombine.low %v1131_v55, %v1135_v14  ;;  %v1143_v35 = vld [vmem:[#allocation8 + $0x370] sm:$0xff] }
 0x27b   : > { %v807_v30 = vmul.f32 0.00390625, %v784_v62  ;;  %874 = vadd.xlane.f32.xlu0 %v873_v16  ;;  %v876_v31 = vadd.f32 %v848_v61, %v847_v9  ;;  %v4481_v61 = vcombine.high %v1131_v55, %v1135_v14  ;;  %v4489_v46 = vcombine.high %v1139_v32, %v1143_v35  ;;  %v1153_v14 = vld [vmem:[#allocation8 + $0x3c0] sm:$0xff] }
 0x27c   : > { %v787_v22 = vpop.xlane.xlu1 %786  ;;  %2050 = vmatpush1.bf16.msra.mxu1 %v4464_v36  ;;  %v4488_v26 = vcombine.low %v1139_v32, %v1143_v35  ;;  %v6217_v35 = vld [vmem:[#allocation8 + $0x28] sm:$0xff] }
 0x27d   : > { %v6156_v24 = vsub.f32 %v6040_v15, %v807_v30  ;;  %v6159_v38 = vsub.f32 %v6044_v19, %v807_v30  ;;  %v808_v25 = vmul.f32 0.00390625, %v787_v22  ;;  %877 = vadd.xlane.f32.xlu1 %v876_v31  ;;  %2051 = vmatprep.subr.bf16.mxu1 %v4473_v56  ;;  %v1141_v30 = vld [vmem:[#allocation8 + $0x360] sm:$0xff]  ;;  %v1151_v56 = vld [vmem:[#allocation8 + $0x3b0] sm:$0xff] }
 0x27e   : > { %v4485_v31 = vcombine.high %v1137_v29, %v1141_v30 }
 0x27f   : > { %v6162_v53 = vsub.f32 %v6047_v21, %v808_v25  ;;  %v6165_v42 = vsub.f32 %v6049_v23, %v808_v25  ;;  %v849_v15 = vmul.f32 %v6156_v24, %v6156_v24  ;;  %v850_v19 = vmul.f32 %v6159_v38, %v6159_v38  ;;  %v1129_v23 = vld [vmem:[#allocation8 + $0x300] sm:$0xff] }
 0x280   : > { %v4477_v13 = vcombine.high %v1129_v23, %v1133_v0  ;;  %2052 = vmatpush1.bf16.msra.mxu1 %v4472_v57  ;;  %v4476_v9 = vcombine.low %v1129_v23, %v1133_v0  ;;  %v4484_v25 = vcombine.low %v1137_v29, %v1141_v30  ;;  %v4496_v0 = vcombine.low %v1147_v54, %v1151_v56 }
 0x281   : > { %v879_v60 = vadd.f32 %v850_v19, %v849_v15  ;;  %v851_v44 = vmul.f32 %v6162_v53, %v6162_v53  ;;  %v852_v21 = vmul.f32 %v6165_v42, %v6165_v42  ;;  %2053 = vmatprep.subr.bf16.mxu1 %v4481_v61  ;;  %v1159_v61 = vld [vmem:[#allocation8 + $0x3f0] sm:$0xff] }
 0x282   : > { %v790_v1 = vpop.xlane.xlu0 %789  ;;  %1867 = vmatprep.subr.bf16.mxu0 %v4477_v13 }
 0x283   : > { %v809_v59 = vmul.f32 0.00390625, %v790_v1  ;;  %880 = vadd.xlane.f32.xlu0 %v879_v60  ;;  %v882_v16 = vadd.f32 %v852_v21, %v851_v44  ;;  %1868 = vmatpush1.bf16.msra.mxu0 %v4476_v9  ;;  %v4497_v21 = vcombine.high %v1147_v54, %v1151_v56  ;;  %v1155_v9 = vld [vmem:[#allocation8 + $0x3d0] sm:$0xff] }
 0x284   : > { %v793_v17 = vpop.xlane.xlu1 %792  ;;  %2054 = vmatpush1.bf16.msra.mxu1 %v4480_v18  ;;  %1869 = vmatprep.subr.bf16.mxu0 %v4485_v31  ;;  %v4505_v29 = vcombine.high %v1155_v9, %v1159_v61  ;;  %v4504_v30 = vcombine.low %v1155_v9, %v1159_v61 }
 0x285   : > { %v6176_v62 = vsub.f32 %v6060_v37, %v809_v59  ;;  %v6179_v20 = vsub.f32 %v6064_v45, %v809_v59  ;;  %v810_v27 = vmul.f32 0.00390625, %v793_v17  ;;  %883 = vadd.xlane.f32.xlu1 %v882_v16  ;;  %2055 = vmatprep.subr.bf16.mxu1 %v4489_v46  ;;  %v1157_v59 = vld [vmem:[#allocation8 + $0x3e0] sm:$0xff] }
 0x286   : > { %v4501_v16 = vcombine.high %v1153_v14, %v1157_v59 }
 0x287   : > { %v6182_v22 = vsub.f32 %v6067_v47, %v810_v27  ;;  %v6185_v36 = vsub.f32 %v6069_v48, %v810_v27  ;;  %v853_v37 = vmul.f32 %v6176_v62, %v6176_v62  ;;  %v854_v45 = vmul.f32 %v6179_v20, %v6179_v20  ;;  %v1145_v48 = vld [vmem:[#allocation8 + $0x380] sm:$0xff]  ;;  %1870 = vmatpush1.bf16.msra.mxu0 %v4484_v25 }
 0x288   : > { %v4493_v19 = vcombine.high %v1145_v48, %v1149_v40  ;;  %2056 = vmatpush1.bf16.msra.mxu1 %v4488_v26  ;;  %v4492_v44 = vcombine.low %v1145_v48, %v1149_v40  ;;  %v4500_v27 = vcombine.low %v1153_v14, %v1157_v59 }
 0x289   : > { %v885_v49 = vadd.f32 %v854_v45, %v853_v37  ;;  %v855_v50 = vmul.f32 %v6182_v22, %v6182_v22  ;;  %v856_v47 = vmul.f32 %v6185_v36, %v6185_v36  ;;  %2057 = vmatprep.subr.bf16.mxu1 %v4497_v21 }
 0x28a   : > { %v796_v15 = vpop.xlane.xlu0 %795  ;;  %1871 = vmatprep.subr.bf16.mxu0 %v4493_v19  ;;  %v6224_v19 = vsub.s32 1, %v5952_v5 }
 0x28b   : > { %v811_v57 = vmul.f32 0.00390625, %v796_v15  ;;  %886 = vadd.xlane.f32.xlu0 %v885_v49  ;;  %v888_v60 = vadd.f32 %v856_v47, %v855_v50  ;;  %1872 = vmatpush1.bf16.msra.mxu0 %v4492_v44 }
 0x28c   : > { %v799_v23 = vpop.xlane.xlu1 %798  ;;  %2058 = vmatpush1.bf16.msra.mxu1 %v4496_v0  ;;  %1873 = vmatprep.subr.bf16.mxu0 %v4501_v16  ;;  %v6231_v21 = vrot.slane %v5960_v7, %v6224_v19  ;;  %v6235_v0 = vrot.slane %v5965_v8, %v6224_v19 }
 0x28d   : > { %v6196_v1 = vsub.f32 %v6080_v63, %v811_v57  ;;  %v6199_v13 = vsub.f32 %v6084_v3, %v811_v57  ;;  %v812_v55 = vmul.f32 0.00390625, %v799_v23  ;;  %889 = vadd.xlane.f32.xlu1 %v888_v60  ;;  %2059 = vmatprep.subr.bf16.mxu1 %v4505_v29  ;;  %v6227_v60 = vsub.s32 2, %v5952_v5 }
 0x28f   : > { %v6202_v17 = vsub.f32 %v6087_v11, %v812_v55  ;;  %v6205_v18 = vsub.f32 %v6089_v12, %v812_v55  ;;  %v857_v63 = vmul.f32 %v6196_v1, %v6196_v1  ;;  %v858_v3 = vmul.f32 %v6199_v13, %v6199_v13  ;;  %v6215_v12 = vld [vmem:[#allocation8 + $0x8] sm:$0xff]  ;;  %1874 = vmatpush1.bf16.msra.mxu0 %v4500_v27 }
 0x290   : > { %v4383_v37 = vcombine.high %v6215_v12, %v6217_v35  ;;  %2060 = vmatpush1.bf16.msra.mxu1 %v4504_v30  ;;  %v4382_v25 = vcombine.low %v6215_v12, %v6217_v35  ;;  %v6241_v61 = vrot.slane %v5965_v8, %v6227_v60 }
 0x291   : > { %v891_v31 = vadd.f32 %v858_v3, %v857_v63  ;;  %v859_v32 = vmul.f32 %v6202_v17, %v6202_v17  ;;  %v860_v11 = vmul.f32 %v6205_v18, %v6205_v18  ;;  %v6245_v63 = vrot.slane %v5960_v7, %v6227_v60 }
 0x292   : > { %1936 = vmatprep.subr.bf16.mxu0 %v4383_v37 }
 0x293   : > { %892 = vadd.xlane.f32.xlu0 %v891_v31  ;;  %v894_v45 = vadd.f32 %v860_v11, %v859_v32 }
 0x295   : > { %895 = vadd.xlane.f32.xlu1 %v894_v45 }
 0x2f8   : > { %v863_v46 = vpop.xlane.xlu0 %862 }
 0x2f9   : > { %v897_v26 = vmul.f32 0.00390625, %v863_v46 }
 0x2fb   : > { %v909_v49 = vadd.f32 1e-12, %v897_v26 }
 0x2fc   : > { %v866_v50 = vpop.xlane.xlu1 %865 }
 0x2fd   : > { %5110 = vrsqrt.f32 %v909_v49  ;;  %v898_v47 = vmul.f32 0.00390625, %v866_v50  ;;  %v1042_v50 = vld [vmem:[#allocation8 + $0x48] sm:$0xff] }
 0x2ff   : > { %v910_v48 = vadd.f32 1e-12, %v898_v47  ;;  %v1046_v47 = vld [vmem:[#allocation8 + $0x68] sm:$0xff] }
 0x300   : > { %v869_v40 = vpop.xlane.xlu0 %868 }
 0x301   : > { %5112 = vrsqrt.f32 %v910_v48  ;;  %v899_v15 = vmul.f32 0.00390625, %v869_v40 }
 0x303   : > { %v911_v54 = vadd.f32 1e-12, %v899_v15 }
 0x304   : > { %v872_v56 = vpop.xlane.xlu1 %871 }
 0x305   : > { %5114 = vrsqrt.f32 %v911_v54  ;;  %v900_v57 = vmul.f32 0.00390625, %v872_v56 }
 0x307   : > { %v5111_v44 = vpop.eup %5110  ;;  %v912_v23 = vadd.f32 1e-12, %v900_v57  ;;  %v4391_v57 = vcombine.high %v1042_v50, %v1046_v47 }
 0x308   : > { %v933_v55 = vmul.f32 %v5111_v44, %v6096_v28  ;;  %v934_v14 = vmul.f32 %v5111_v44, %v6099_v10  ;;  %v875_v59 = vpop.xlane.xlu0 %874 }
 0x309   : > { %5116 = vrsqrt.f32 %v912_v23  ;;  %v901_v16 = vmul.f32 0.00390625, %v875_v59  ;;  %v1054_v59 = vld [vmem:[#allocation8 + $0xa8] sm:$0xff] }
 0x30a   : > { %v878_v9 = vpop.xlane.xlu1 %877  ;;  %v965_v27 = vmul.f32 %v6231_v21, %v933_v55  ;;  %v966_v28 = vmul.f32 %v6235_v0, %v934_v14  ;;  %v1050_v14 = vld [vmem:[#allocation8 + $0x88] sm:$0xff] }
 0x30b   : > { %v5113_v3 = vpop.eup %5112  ;;  %v913_v29 = vadd.f32 1e-12, %v901_v16  ;;  %v902_v30 = vmul.f32 0.00390625, %v878_v9 }
 0x30c   : > { %v935_v10 = vmul.f32 %v5113_v3, %v6106_v33  ;;  %v936_v31 = vmul.f32 %v5113_v3, %v6109_v34  ;;  %v6254_v7 = vadd.f32 %v6241_v61, %v966_v28  ;;  %v6257_v45 = vadd.f32 %v6245_v63, %v965_v27 }
 0x30d   : > { %5118 = vrsqrt.f32 %v913_v29  ;;  %v914_v32 = vadd.f32 1e-12, %v902_v30  ;;  %v4399_v30 = vcombine.high %v1050_v14, %v1054_v59 }
 0x30e   : > { %v967_v8 = vmul.f32 %v6231_v21, %v935_v10  ;;  %v968_v11 = vmul.f32 %v6235_v0, %v936_v31  ;;  %7774 = vst [vmem:[#allocation19_spill] sm:$0xff] %v6254_v7  ;;  %7775 = vst [vmem:[#allocation20_spill] sm:$0xff] %v6257_v45 }
 0x30f   : > { %v5115_v37 = vpop.eup %5114  ;;  %5120 = vrsqrt.f32 %v914_v32  ;;  %v1062_v32 = vld [vmem:[#allocation8 + $0xe8] sm:$0xff] }
 0x310   : > { %v937_v46 = vmul.f32 %v5115_v37, %v6116_v39  ;;  %v938_v33 = vmul.f32 %v5115_v37, %v6119_v41  ;;  %v881_v26 = vpop.xlane.xlu0 %880  ;;  %v6262_v34 = vadd.f32 %v6241_v61, %v968_v11  ;;  %v6265_v49 = vadd.f32 %v6245_v63, %v967_v8 }
 0x311   : > { %v903_v48 = vmul.f32 0.00390625, %v881_v26 }
 0x312   : > { %7776 = vst [vmem:[#allocation21_spill] sm:$0xff] %v6262_v34  ;;  %7777 = vst [vmem:[#allocation22_spill] sm:$0xff] %v6265_v49  ;;  %v884_v40 = vpop.xlane.xlu1 %883  ;;  %v6269_v15 = vpack.c.bf16 %v6262_v34, %v6254_v7  ;;  %v6273_v39 = vpack.c.bf16 %v6265_v49, %v6257_v45  ;;  %v970_v44 = vmul.f32 %v6235_v0, %v938_v33  ;;  %v5097_v7 = vld [vmem:[#allocation10 + $0x3d4] ss:$8 sps:$4 sm:$0xff]  }
 0x313   : > { %v5117_v41 = vpop.eup %5116  ;;  %v915_v54 = vadd.f32 1e-12, %v903_v48  ;;  %v904_v56 = vmul.f32 0.00390625, %v884_v40  ;;  %v969_v16 = vmul.f32 %v6231_v21, %v937_v46  ;;  %v4398_v46 = vcombine.low %v1050_v14, %v1054_v59 }
 0x314   : > { %v939_v23 = vmul.f32 %v5117_v41, %v6126_v51  ;;  %v940_v55 = vmul.f32 %v5117_v41, %v6129_v52  ;;  %1875 = vmatprep.mubr.bf16.mxu0 %v6269_v15  ;;  %2061 = vmatprep.mubr.bf16.mxu1 %v6269_v15  ;;  %v4390_v51 = vcombine.low %v1042_v50, %v1046_v47 }
 0x315   : > { %5122 = vrsqrt.f32 %v915_v54  ;;  %v916_v9 = vadd.f32 1e-12, %v904_v56  ;;  %1876 = vmatmul.mubr.bf16.vlgmr.msra.gmra.mrb[24].mxu0 %v6273_v39  ;;  %2062 = vmatmul.mubr.bf16.vlgmr.msra.gmra.mrb[0].mxu1 %v6273_v39  ;;  %v6289_v29 = vadd.f32 %v6241_v61, %v970_v44  ;;  %v6296_v12 = vadd.f32 %v6245_v63, %v969_v16  ;;  %v1070_v54 = vld [vmem:[#allocation8 + $0x128] sm:$0xff] }
 0x316   : > { %1937 = vmatpush1.bf16.msra.mxu0 %v4382_v25  ;;  %v972_v52 = vmul.f32 %v6235_v0, %v940_v55  ;;  %v971_v3 = vmul.f32 %v6231_v21, %v939_v23  ;;  %v1058_v25 = vld [vmem:[#allocation8 + $0xc8] sm:$0xff] }
 0x317   : > { %v5119_v27 = vpop.eup %5118  ;;  %5124 = vrsqrt.f32 %v916_v9  ;;  %1938 = vmatprep.subr.bf16.mxu0 %v4391_v57  ;;  %7778 = vst [vmem:[#allocation23_spill] sm:$0xff] %v6289_v29  ;;  %7780 = vst [vmem:[#allocation25_spill] sm:$0xff] %v6296_v12  ;;  %v4406_v23 = vcombine.low %v1058_v25, %v1062_v32 }
 0x318   : > { %v942_v28 = vmul.f32 %v5119_v27, %v6139_v43  ;;  %v887_v10 = vpop.xlane.xlu0 %886  ;;  %v6293_v31 = vadd.f32 %v6241_v61, %v972_v52  ;;  %v6299_v35 = vadd.f32 %v6245_v63, %v971_v3  ;;  %v941_v11 = vmul.f32 %v5119_v27, %v6136_v58  ;;  %v1074_v27 = vld [vmem:[#allocation8 + $0x148] sm:$0xff] }
 0x319   : > { %v5121_v8 = vpop.eup %5120  ;;  %v905_v37 = vmul.f32 0.00390625, %v887_v10  ;;  %v4407_v58 = vcombine.high %v1058_v25, %v1062_v32 }
 0x31a   : > { %7779 = vst [vmem:[#allocation24_spill] sm:$0xff] %v6293_v31  ;;  %7781 = vst [vmem:[#allocation26_spill] sm:$0xff] %v6299_v35  ;;  %v943_v33 = vmul.f32 %v5121_v8, %v6142_v2  ;;  %v944_v43 = vmul.f32 %v5121_v8, %v6145_v4  ;;  %1939 = vmatpush1.bf16.msra.mxu0 %v4390_v51  ;;  %v890_v26 = vpop.xlane.xlu1 %889  ;;  %v6306_v50 = vpack.c.bf16 %v6293_v31, %v6289_v29  ;;  %v1066_v4 = vld [vmem:[#allocation8 + $0x108] sm:$0xff] }
 0x31b   : > { %v6310_v47 = vpack.c.bf16 %v6299_v35, %v6296_v12  ;;  %v917_v48 = vadd.f32 1e-12, %v905_v37  ;;  %v906_v40 = vmul.f32 0.00390625, %v890_v26  ;;  %1940 = vmatprep.subr.bf16.mxu0 %v4399_v30  ;;  %v974_v41 = vmul.f32 %v6235_v0, %v942_v28  ;;  %v1078_v30 = vld [vmem:[#allocation8 + $0x168] sm:$0xff] }
 0x31c   : > { %1885 = vmatprep.mubr.bf16.mxu0 %v6306_v50  ;;  %2071 = vmatprep.mubr.bf16.mxu1 %v6306_v50  ;;  %v976_v2 = vmul.f32 %v6235_v0, %v944_v43  ;;  %v975_v56 = vmul.f32 %v6231_v21, %v943_v33  ;;  %v973_v44 = vmul.f32 %v6231_v21, %v941_v11 }
 0x31d   : > { %5126 = vrsqrt.f32 %v917_v48  ;;  %v918_v57 = vadd.f32 1e-12, %v906_v40  ;;  %1886 = vmatmul.mubr.bf16.gmra.mrb[28].mxu0 %v6310_v47  ;;  %2072 = vmatmul.mubr.bf16.gmra.mrb[4].mxu1 %v6310_v47  ;;  %v6321_v55 = vadd.f32 %v6241_v61, %v974_v41  ;;  %v4415_v16 = vcombine.high %v1066_v4, %v1070_v54  ;;  %v1082_v48 = vld [vmem:[#allocation8 + $0x188] sm:$0xff] }
 0x31e   : > { %1941 = vmatpush1.bf16.msra.mxu0 %v4398_v46  ;;  %v6324_v14 = vadd.f32 %v6241_v61, %v976_v2  ;;  %v6327_v9 = vadd.f32 %v6245_v63, %v975_v56  ;;  %v4414_v32 = vcombine.low %v1066_v4, %v1070_v54  ;;  %v6336_v8 = vadd.f32 %v6245_v63, %v973_v44 }
 0x31f   : > { %7782 = vst [vmem:[#allocation27_spill] sm:$0xff] %v6321_v55  ;;  %v5123_v59 = vpop.eup %5122  ;;  %5128 = vrsqrt.f32 %v918_v57  ;;  %1942 = vmatprep.subr.bf16.mxu0 %v4407_v58  ;;  %v4423_v26 = vcombine.high %v1074_v27, %v1078_v30  ;;  %v4422_v2 = vcombine.low %v1074_v27, %v1078_v30 }
 0x320   : > { %7783 = vst [vmem:[#allocation28_spill] sm:$0xff] %v6324_v14  ;;  %7784 = vst [vmem:[#allocation29_spill] sm:$0xff] %v6327_v9  ;;  %v946_v51 = vmul.f32 %v5123_v59, %v6159_v38  ;;  %v893_v52 = vpop.xlane.xlu0 %892  ;;  %v6332_v3 = vpack.c.bf16 %v6324_v14, %v6321_v55  ;;  %v945_v10 = vmul.f32 %v5123_v59, %v6156_v24 }
 0x321   : > { %v5125_v28 = vpop.eup %5124  ;;  %v907_v25 = vmul.f32 0.00390625, %v893_v52  ;;  %7785 = vst [vmem:[#allocation30_spill] sm:$0xff] %v6336_v8  ;;  %v6345_v24 = vpack.c.bf16 %v6327_v9, %v6336_v8 }
 0x322   : > { %v947_v11 = vmul.f32 %v5125_v28, %v6162_v53  ;;  %v948_v37 = vmul.f32 %v5125_v28, %v6165_v42  ;;  %1943 = vmatpush1.bf16.msra.mxu0 %v4406_v23  ;;  %v896_v38 = vpop.xlane.xlu1 %895  ;;  %1895 = vmatprep.mubr.bf16.mxu0 %v6332_v3  ;;  %v978_v46 = vmul.f32 %v6235_v0, %v946_v51  ;;  %v1086_v42 = vld [vmem:[#allocation8 + $0x1a8] sm:$0xff] }
 0x323   : > { %v919_v33 = vadd.f32 1e-12, %v907_v25  ;;  %v908_v43 = vmul.f32 0.00390625, %v896_v38  ;;  %2081 = vmatprep.mubr.bf16.mxu1 %v6332_v3  ;;  %1944 = vmatprep.subr.bf16.mxu0 %v4415_v16  ;;  %v977_v41 = vmul.f32 %v6231_v21, %v945_v10  ;;  %v4431_v57 = vcombine.high %v1082_v48, %v1086_v42  ;;  %v1090_v16 = vld [vmem:[#allocation8 + $0x1c8] sm:$0xff] }
 0x324   : > { %v980_v53 = vmul.f32 %v6235_v0, %v948_v37  ;;  %v979_v40 = vmul.f32 %v6231_v21, %v947_v11  ;;  %v6353_v4 = vadd.f32 %v6241_v61, %v978_v46  ;;  %v1094_v51 = vld [vmem:[#allocation8 + $0x1e8] sm:$0xff]  ;;  %v4430_v30 = vcombine.low %v1082_v48, %v1086_v42 }
 0x325   : > { %5130 = vrsqrt.f32 %v919_v33  ;;  %v920_v58 = vadd.f32 1e-12, %v908_v43  ;;  %1896 = vmatmul.mubr.bf16.gmra.mrb[32].mxu0 %v6345_v24  ;;  %2082 = vmatmul.mubr.bf16.gmra.mrb[8].mxu1 %v6345_v24  ;;  %v6368_v28 = vadd.f32 %v6245_v63, %v977_v41  ;;  %v1098_v37 = vld [vmem:[#allocation8 + $0x208] sm:$0xff]  ;;  %v4438_v46 = vcombine.low %v1090_v16, %v1094_v51 }
 0x326   : > { %1945 = vmatpush1.bf16.msra.mxu0 %v4414_v32  ;;  %7786 = vst [vmem:[#allocation31_spill] sm:$0xff] %v6353_v4  ;;  %v6356_v54 = vadd.f32 %v6241_v61, %v980_v53  ;;  %v6359_v44 = vadd.f32 %v6245_v63, %v979_v40  ;;  %v1102_v38 = vld [vmem:[#allocation8 + $0x228] sm:$0xff] }
 0x327   : > { %v5127_v56 = vpop.eup %5126  ;;  %5132 = vrsqrt.f32 %v920_v58  ;;  %1946 = vmatprep.subr.bf16.mxu0 %v4423_v26  ;;  %7789 = vst [vmem:[#allocation34_spill] sm:$0xff] %v6368_v28  ;;  %v4447_v53 = vcombine.high %v1098_v37, %v1102_v38  ;;  %v1106_v58 = vld [vmem:[#allocation8 + $0x248] sm:$0xff] }
 0x328   : > { %7787 = vst [vmem:[#allocation32_spill] sm:$0xff] %v6356_v54  ;;  %7788 = vst [vmem:[#allocation33_spill] sm:$0xff] %v6359_v44  ;;  %v950_v23 = vmul.f32 %v5127_v56, %v6179_v20  ;;  %v6364_v59 = vpack.c.bf16 %v6356_v54, %v6353_v4  ;;  %v949_v27 = vmul.f32 %v5127_v56, %v6176_v62  ;;  %v1110_v41 = vld [vmem:[#allocation8 + $0x268] sm:$0xff] }
 0x329   : > { %v5129_v52 = vpop.eup %5128  ;;  %v6377_v32 = vpack.c.bf16 %v6359_v44, %v6368_v28  ;;  %v4439_v62 = vcombine.high %v1090_v16, %v1094_v51 }
 0x32a   : > { %v951_v10 = vmul.f32 %v5129_v52, %v6182_v22  ;;  %v952_v25 = vmul.f32 %v5129_v52, %v6185_v36  ;;  %1947 = vmatpush1.bf16.msra.mxu0 %v4422_v2  ;;  %1905 = vmatprep.mubr.bf16.mxu0 %v6364_v59  ;;  %v982_v20 = vmul.f32 %v6235_v0, %v950_v23 }
 0x32b   : > { %2091 = vmatprep.mubr.bf16.mxu1 %v6364_v59  ;;  %1948 = vmatprep.subr.bf16.mxu0 %v4431_v57  ;;  %v981_v36 = vmul.f32 %v6231_v21, %v949_v27  ;;  %v4446_v57 = vcombine.low %v1098_v37, %v1102_v38  ;;  %v1122_v38 = vld [vmem:[#allocation8 + $0x2c8] sm:$0xff] }
 0x32c   : > { %v984_v11 = vmul.f32 %v6235_v0, %v952_v25  ;;  %v983_v22 = vmul.f32 %v6231_v21, %v951_v10  ;;  %v6385_v33 = vadd.f32 %v6241_v61, %v982_v20  ;;  %v1118_v10 = vld [vmem:[#allocation8 + $0x2a8] sm:$0xff]  ;;  %v4454_v25 = vcombine.low %v1106_v58, %v1110_v41 }
 0x32d   : > { %1906 = vmatmul.mubr.bf16.gmra.mrb[36].mxu0 %v6377_v32  ;;  %2092 = vmatmul.mubr.bf16.gmra.mrb[12].mxu1 %v6377_v32  ;;  %v6400_v23 = vadd.f32 %v6245_v63, %v981_v36 }
 0x32e   : > { %1949 = vmatpush1.bf16.msra.mxu0 %v4430_v30  ;;  %7790 = vst [vmem:[#allocation35_spill] sm:$0xff] %v6385_v33  ;;  %v6388_v43 = vadd.f32 %v6241_v61, %v984_v11  ;;  %v6391_v48 = vadd.f32 %v6245_v63, %v983_v22  ;;  %v1114_v30 = vld [vmem:[#allocation8 + $0x288] sm:$0xff] }
 0x32f   : > { %v5131_v26 = vpop.eup %5130  ;;  %1950 = vmatprep.subr.bf16.mxu0 %v4439_v62  ;;  %7793 = vst [vmem:[#allocation38_spill] sm:$0xff] %v6400_v23  ;;  %v1126_v22 = vld [vmem:[#allocation8 + $0x2e8] sm:$0xff]  ;;  %v4462_v36 = vcombine.low %v1114_v30, %v1118_v10 }
 0x330   : > { %7791 = vst [vmem:[#allocation36_spill] sm:$0xff] %v6388_v43  ;;  %7792 = vst [vmem:[#allocation37_spill] sm:$0xff] %v6391_v48  ;;  %v954_v42 = vmul.f32 %v5131_v26, %v6199_v13  ;;  %v6396_v40 = vpack.c.bf16 %v6388_v43, %v6385_v33  ;;  %v953_v56 = vmul.f32 %v5131_v26, %v6196_v1  ;;  %v1130_v26 = vld [vmem:[#allocation8 + $0x308] sm:$0xff] }
 0x331   : > { %v5133_v2 = vpop.eup %5132  ;;  %v6409_v52 = vpack.c.bf16 %v6391_v48, %v6400_v23  ;;  %v4455_v1 = vcombine.high %v1106_v58, %v1110_v41  ;;  %v4470_v58 = vcombine.low %v1122_v38, %v1126_v22  ;;  %v4923_v41 = vld [vmem:[#allocation10 + $0x14] ss:$8 sps:$4 sm:$0xff]  }
 0x332   : > { %v955_v16 = vmul.f32 %v5133_v2, %v6202_v17  ;;  %v956_v51 = vmul.f32 %v5133_v2, %v6205_v18  ;;  %1951 = vmatpush1.bf16.msra.mxu0 %v4438_v46  ;;  %1915 = vmatprep.mubr.bf16.mxu0 %v6396_v40  ;;  %v986_v13 = vmul.f32 %v6235_v0, %v954_v42  ;;  %v4920_v42 = vld [vmem:[#allocation10 + $0x4] ss:$8 sps:$4 sm:$0xff]  }
 0x333   : > { %2101 = vmatprep.mubr.bf16.mxu1 %v6396_v40  ;;  %1952 = vmatprep.subr.bf16.mxu0 %v4447_v53  ;;  %v985_v18 = vmul.f32 %v6231_v21, %v953_v56  ;;  %v4471_v46 = vcombine.high %v1122_v38, %v1126_v22  ;;  %v1134_v53 = vld [vmem:[#allocation8 + $0x328] sm:$0xff]  ;;  %v4927_v22 = vld [vmem:[#allocation10 + $0x30] ss:$8 sps:$4 sm:$0xff]  }
 0x334   : > { %v988_v27 = vmul.f32 %v6235_v0, %v956_v51  ;;  %v987_v17 = vmul.f32 %v6231_v21, %v955_v16  ;;  %v6417_v20 = vadd.f32 %v6241_v61, %v986_v13  ;;  %v4463_v0 = vcombine.high %v1114_v30, %v1118_v10  ;;  %3519 = vmatprep.subr.bf16.mxu1 %v4920_v42  ;;  %v1138_v56 = vld [vmem:[#allocation8 + $0x348] sm:$0xff]  ;;  %v4921_v16 = vld [vmem:[#allocation10 + $0x10] ss:$8 sps:$4 sm:$0xff]  }
 0x335   : > { %1916 = vmatmul.mubr.bf16.gmra.mrb[40].mxu0 %v6409_v52  ;;  %2102 = vmatmul.mubr.bf16.gmra.mrb[16].mxu1 %v6409_v52  ;;  %v6430_v21 = vadd.f32 %v6245_v63, %v985_v18  ;;  %v4479_v2 = vcombine.high %v1130_v26, %v1134_v53  ;;  %v4926_v51 = vld [vmem:[#allocation10 + $0x24] ss:$8 sps:$4 sm:$0xff]   ;;  %v4478_v13 = vcombine.low %v1130_v26, %v1134_v53  ;;  %v4924_v10 = vld [vmem:[#allocation10 + $0x20] ss:$8 sps:$4 sm:$0xff]   ;;  %v1036_v53 = vld [vmem:[#allocation8 + $0x18] sm:$0xff] }
 0x336   : > { %1953 = vmatpush1.bf16.msra.mxu0 %v4446_v57  ;;  %7794 = vst [vmem:[#allocation39_spill] sm:$0xff] %v6417_v20  ;;  %v6420_v62 = vadd.f32 %v6241_v61, %v988_v27  ;;  %v6423_v11 = vadd.f32 %v6245_v63, %v987_v17  ;;  %v4918_v63 = vld [vmem:[#allocation10] ss:$8 sps:$4 sm:$0xff]   ;;  %v4929_v17 = vld [vmem:[#allocation10 + $0x34] ss:$8 sps:$4 sm:$0xff]  }
 0x337   : > { %1954 = vmatprep.subr.bf16.mxu0 %v4455_v1  ;;  %7797 = vst [vmem:[#allocation42_spill] sm:$0xff] %v6430_v21  ;;  %v1142_v57 = vld [vmem:[#allocation8 + $0x368] sm:$0xff]  ;;  %3520 = vmatpush1.bf16.msra.mxu1 %v4918_v63  ;;  %v1040_v63 = vld [vmem:[#allocation8 + $0x38] sm:$0xff] }
 0x338   : > { %7795 = vst [vmem:[#allocation40_spill] sm:$0xff] %v6420_v62  ;;  %7796 = vst [vmem:[#allocation41_spill] sm:$0xff] %v6423_v11  ;;  %v6427_v37 = vpack.c.bf16 %v6420_v62, %v6417_v20  ;;  %v6436_v61 = vpack.c.bf16 %v6423_v11, %v6430_v21  ;;  %3521 = vmatprep.subr.bf16.mxu1 %v4923_v41  ;;  %v4487_v1 = vcombine.high %v1138_v56, %v1142_v57  ;;  %v1146_v27 = vld [vmem:[#allocation8 + $0x388] sm:$0xff] }
 0x339   : > { %v1150_v30 = vld [vmem:[#allocation8 + $0x3a8] sm:$0xff]  ;;  %v4486_v18 = vcombine.low %v1138_v56, %v1142_v57  ;;  %v1044_v56 = vld [vmem:[#allocation8 + $0x58] sm:$0xff] }
 0x33a   : > { %1955 = vmatpush1.bf16.msra.mxu0 %v4454_v25  ;;  %1925 = vmatprep.mubr.bf16.mxu0 %v6427_v37  ;;  %v4495_v25 = vcombine.high %v1146_v27, %v1150_v30  ;;  %v1158_v38 = vld [vmem:[#allocation8 + $0x3e8] sm:$0xff]  ;;  %v1048_v57 = vld [vmem:[#allocation8 + $0x78] sm:$0xff] }
 0x33b   : > { %2111 = vmatprep.mubr.bf16.mxu1 %v6427_v37  ;;  %1956 = vmatprep.subr.bf16.mxu0 %v4463_v0  ;;  %v1154_v0 = vld [vmem:[#allocation8 + $0x3c8] sm:$0xff] }
 0x33c   : > { %3522 = vmatpush1.bf16.msra.mxu1 %v4921_v16  ;;  %v4503_v26 = vcombine.high %v1154_v0, %v1158_v38  ;;  %v4930_v42 = vld [vmem:[#allocation10 + $0x40] ss:$8 sps:$4 sm:$0xff]   ;;  %v4502_v41 = vcombine.low %v1154_v0, %v1158_v38  ;;  %v4933_v16 = vld [vmem:[#allocation10 + $0x50] ss:$8 sps:$4 sm:$0xff]  }
 0x33d   : > { %1926 = vmatmul.mubr.bf16.gmra.mrb[44].mxu0 %v6436_v61  ;;  %2112 = vmatmul.mubr.bf16.gmra.mrb[20].mxu1 %v6436_v61  ;;  %v1060_v0 = vld [vmem:[#allocation8 + $0xd8] sm:$0xff] }
 0x33e   : > { %1957 = vmatpush1.bf16.msra.mxu0 %v4462_v36  ;;  %1968 = vmatprep.mubr.bf16.mxu0 %v6269_v15  ;;  %v4932_v36 = vld [vmem:[#allocation10 + $0x44] ss:$8 sps:$4 sm:$0xff]   ;;  %v1064_v38 = vld [vmem:[#allocation8 + $0xf8] sm:$0xff] }
 0x33f   : > { %1958 = vmatprep.subr.bf16.mxu0 %v4471_v46  ;;  %3523 = vmatprep.subr.bf16.mxu1 %v4926_v51  ;;  %v4494_v46 = vcombine.low %v1146_v27, %v1150_v30  ;;  %v4938_v51 = vld [vmem:[#allocation10 + $0x64] ss:$8 sps:$4 sm:$0xff]   ;;  %v1052_v27 = vld [vmem:[#allocation8 + $0x98] sm:$0xff] }
 0x340   : > { %3524 = vmatpush1.bf16.msra.mxu1 %v4924_v10  ;;  %v1056_v30 = vld [vmem:[#allocation8 + $0xb8] sm:$0xff]  ;;  %v4936_v10 = vld [vmem:[#allocation10 + $0x60] ss:$8 sps:$4 sm:$0xff]  }
 0x341   : > { %3525 = vmatprep.subr.bf16.mxu1 %v4929_v17  ;;  %v4941_v17 = vld [vmem:[#allocation10 + $0x74] ss:$8 sps:$4 sm:$0xff]  }
 0x342   : > { %1959 = vmatpush1.bf16.msra.mxu0 %v4470_v58  ;;  %v4935_v58 = vld [vmem:[#allocation10 + $0x54] ss:$8 sps:$4 sm:$0xff]  }
 0x343   : > { %1960 = vmatprep.subr.bf16.mxu0 %v4479_v2  ;;  %v4387_v2 = vcombine.high %v1036_v53, %v1040_v63 }
 0x344   : > { %3526 = vmatpush1.bf16.msra.mxu1 %v4927_v22  ;;  %v4939_v22 = vld [vmem:[#allocation10 + $0x70] ss:$8 sps:$4 sm:$0xff]  }
 0x345   : > { %3527 = vmatprep.subr.bf16.mxu1 %v4932_v36  ;;  %v4944_v36 = vld [vmem:[#allocation10 + $0x84] ss:$8 sps:$4 sm:$0xff]  }
 0x346   : > { %1961 = vmatpush1.bf16.msra.mxu0 %v4478_v13  ;;  %v4386_v13 = vcombine.low %v1036_v53, %v1040_v63  ;;  %v1068_v53 = vld [vmem:[#allocation8 + $0x118] sm:$0xff] }
 0x347   : > { %1962 = vmatprep.subr.bf16.mxu0 %v4487_v1  ;;  %v4395_v1 = vcombine.high %v1044_v56, %v1048_v57  ;;  %v1072_v63 = vld [vmem:[#allocation8 + $0x138] sm:$0xff] }
 0x348   : > { %3528 = vmatpush1.bf16.msra.mxu1 %v4930_v42  ;;  %v4942_v42 = vld [vmem:[#allocation10 + $0x80] ss:$8 sps:$4 sm:$0xff]  }
 0x349   : > { %3529 = vmatprep.subr.bf16.mxu1 %v4935_v58  ;;  %v4947_v58 = vld [vmem:[#allocation10 + $0x94] ss:$8 sps:$4 sm:$0xff]  }
 0x34a   : > { %1963 = vmatpush1.bf16.msra.mxu0 %v4486_v18  ;;  %v4394_v18 = vcombine.low %v1044_v56, %v1048_v57  ;;  %v1076_v56 = vld [vmem:[#allocation8 + $0x158] sm:$0xff] }
 0x34b   : > { %1964 = vmatprep.subr.bf16.mxu0 %v4495_v25  ;;  %v4403_v25 = vcombine.high %v1052_v27, %v1056_v30  ;;  %v1080_v57 = vld [vmem:[#allocation8 + $0x178] sm:$0xff] }
 0x34c   : > { %3530 = vmatpush1.bf16.msra.mxu1 %v4933_v16  ;;  %v4945_v16 = vld [vmem:[#allocation10 + $0x90] ss:$8 sps:$4 sm:$0xff]  }
 0x34d   : > { %3531 = vmatprep.subr.bf16.mxu1 %v4938_v51  ;;  %v4418_v51 = vcombine.low %v1068_v53, %v1072_v63 }
 0x34e   : > { %1965 = vmatpush1.bf16.msra.mxu0 %v4494_v46  ;;  %v4402_v46 = vcombine.low %v1052_v27, %v1056_v30  ;;  %v1088_v27 = vld [vmem:[#allocation8 + $0x1b8] sm:$0xff]  ;;  %v4426_v30 = vcombine.low %v1076_v56, %v1080_v57 }
 0x34f   : > { %1966 = vmatprep.subr.bf16.mxu0 %v4503_v26  ;;  %v4411_v26 = vcombine.high %v1060_v0, %v1064_v38 }
 0x350   : > { %3532 = vmatpush1.bf16.msra.mxu1 %v4936_v10 }
 0x351   : > { %3533 = vmatprep.subr.bf16.mxu1 %v4941_v17  ;;  %v1092_v17 = vld [vmem:[#allocation8 + $0x1d8] sm:$0xff] }
 0x352   : > { %1967 = vmatpush1.bf16.msra.mxu0 %v4502_v41  ;;  %v4410_v41 = vcombine.low %v1060_v0, %v1064_v38  ;;  %v4948_v38 = vld [vmem:[#allocation10 + $0xa0] ss:$8 sps:$4 sm:$0xff]  }
 0x353   : > { %2122 = vmatprep.subr.bf16.mxu0 %v4387_v2  ;;  %v4419_v2 = vcombine.high %v1068_v53, %v1072_v63  ;;  %v4953_v63 = vld [vmem:[#allocation10 + $0xb4] ss:$8 sps:$4 sm:$0xff]  }
 0x354   : > { %3534 = vmatpush1.bf16.msra.mxu1 %v4939_v22 }
 0x355   : > { %1969 = vmatmul.mubr.bf16.vlgmr.msra.gmra.mrb[48].mxu0 %v6273_v39  ;;  %3535 = vmatprep.subr.bf16.mxu1 %v4944_v36  ;;  %v1100_v36 = vld [vmem:[#allocation8 + $0x218] sm:$0xff] }
 0x356   : > { %1978 = vmatprep.mubr.bf16.mxu0 %v6306_v50  ;;  %2123 = vmatpush1.bf16.msra.mxu0 %v4386_v13  ;;  %v4427_v13 = vcombine.high %v1076_v56, %v1080_v57  ;;  %v4956_v57 = vld [vmem:[#allocation10 + $0xc4] ss:$8 sps:$4 sm:$0xff]  }
 0x357   : > { %2124 = vmatprep.subr.bf16.mxu0 %v4395_v1  ;;  %v1084_v1 = vld [vmem:[#allocation8 + $0x198] sm:$0xff] }
 0x358   : > { %3536 = vmatpush1.bf16.msra.mxu1 %v4942_v42  ;;  %v4435_v10 = vcombine.high %v1084_v1, %v1088_v27  ;;  %v4434_v0 = vcombine.low %v1084_v1, %v1088_v27  ;;  %v1108_v42 = vld [vmem:[#allocation8 + $0x258] sm:$0xff] }
 0x359   : > { %3537 = vmatprep.subr.bf16.mxu1 %v4947_v58  ;;  %v1112_v58 = vld [vmem:[#allocation8 + $0x278] sm:$0xff] }
 0x35a   : > { %2125 = vmatpush1.bf16.msra.mxu0 %v4394_v18  ;;  %v1096_v18 = vld [vmem:[#allocation8 + $0x1f8] sm:$0xff]  ;;  %v4459_v56 = vcombine.high %v1108_v42, %v1112_v58  ;;  %v4458_v1 = vcombine.low %v1108_v42, %v1112_v58  ;;  %v4960_v58 = vld [vmem:[#allocation10 + $0xe0] ss:$8 sps:$4 sm:$0xff]  }
 0x35b   : > { %2126 = vmatprep.subr.bf16.mxu0 %v4403_v25  ;;  %v4950_v25 = vld [vmem:[#allocation10 + $0xa4] ss:$8 sps:$4 sm:$0xff]   ;;  %v4443_v22 = vcombine.high %v1092_v17, %v1096_v18 }
 0x35c   : > { %3538 = vmatpush1.bf16.msra.mxu1 %v4945_v16  ;;  %v1116_v16 = vld [vmem:[#allocation8 + $0x298] sm:$0xff] }
 0x35d   : > { %1979 = vmatmul.mubr.bf16.gmra.mrb[52].mxu0 %v6310_v47  ;;  %3539 = vmatprep.subr.bf16.mxu1 %v4950_v25  ;;  %v4957_v25 = vld [vmem:[#allocation10 + $0xd0] ss:$8 sps:$4 sm:$0xff]  }
 0x35e   : > { %1988 = vmatprep.mubr.bf16.mxu0 %v6332_v3  ;;  %2127 = vmatpush1.bf16.msra.mxu0 %v4402_v46  ;;  %v1104_v46 = vld [vmem:[#allocation8 + $0x238] sm:$0xff] }
 0x35f   : > { %2128 = vmatprep.subr.bf16.mxu0 %v4411_v26  ;;  %v4442_v26 = vcombine.low %v1092_v17, %v1096_v18  ;;  %v4451_v53 = vcombine.high %v1100_v36, %v1104_v46  ;;  %v4959_v17 = vld [vmem:[#allocation10 + $0xd4] ss:$8 sps:$4 sm:$0xff]  }
 0x360   : > { %3540 = vmatpush1.bf16.msra.mxu1 %v4948_v38  ;;  %v1132_v38 = vld [vmem:[#allocation8 + $0x318] sm:$0xff] }
 0x361   : > { %3541 = vmatprep.subr.bf16.mxu1 %v4953_v63  ;;  %v4962_v63 = vld [vmem:[#allocation10 + $0xe4] ss:$8 sps:$4 sm:$0xff]  }
 0x362   : > { %2129 = vmatpush1.bf16.msra.mxu0 %v4410_v41  ;;  %v4951_v41 = vld [vmem:[#allocation10 + $0xb0] ss:$8 sps:$4 sm:$0xff]  }
 0x363   : > { %2130 = vmatprep.subr.bf16.mxu0 %v4419_v2  ;;  %v4450_v2 = vcombine.low %v1100_v36, %v1104_v46 }
 0x364   : > { %3542 = vmatpush1.bf16.msra.mxu1 %v4951_v41 }
 0x365   : > { %1989 = vmatmul.mubr.bf16.gmra.mrb[56].mxu0 %v6345_v24  ;;  %3543 = vmatprep.subr.bf16.mxu1 %v4956_v57 }
 0x366   : > { %1998 = vmatprep.mubr.bf16.mxu0 %v6364_v59  ;;  %2131 = vmatpush1.bf16.msra.mxu0 %v4418_v51  ;;  %v1120_v51 = vld [vmem:[#allocation8 + $0x2b8] sm:$0xff] }
 0x367   : > { %2132 = vmatprep.subr.bf16.mxu0 %v4427_v13  ;;  %v4954_v13 = vld [vmem:[#allocation10 + $0xc0] ss:$8 sps:$4 sm:$0xff]   ;;  %v4467_v27 = vcombine.high %v1116_v16, %v1120_v51  ;;  %v4466_v18 = vcombine.low %v1116_v16, %v1120_v51  ;;  %v1160_v51 = vld [vmem:[#allocation8 + $0x3f8] sm:$0xff] }
 0x368   : > { %3544 = vmatpush1.bf16.msra.mxu1 %v4954_v13  ;;  %v4965_v13 = vld [vmem:[#allocation10 + $0xf4] ss:$8 sps:$4 sm:$0xff]  }
 0x369   : > { %3545 = vmatprep.subr.bf16.mxu1 %v4959_v17 }
 0x36a   : > { %2133 = vmatpush1.bf16.msra.mxu0 %v4426_v30  ;;  %v1124_v30 = vld [vmem:[#allocation8 + $0x2d8] sm:$0xff] }
 0x36b   : > { %2134 = vmatprep.subr.bf16.mxu0 %v4435_v10  ;;  %v1128_v10 = vld [vmem:[#allocation8 + $0x2f8] sm:$0xff] }
 0x36c   : > { %3546 = vmatpush1.bf16.msra.mxu1 %v4957_v25  ;;  %v4474_v36 = vcombine.low %v1124_v30, %v1128_v10 }
 0x36d   : > { %1999 = vmatmul.mubr.bf16.gmra.mrb[60].mxu0 %v6377_v32  ;;  %3547 = vmatprep.subr.bf16.mxu1 %v4962_v63 }
 0x36e   : > { %2008 = vmatprep.mubr.bf16.mxu0 %v6396_v40  ;;  %2135 = vmatpush1.bf16.msra.mxu0 %v4434_v0  ;;  %v4475_v0 = vcombine.high %v1124_v30, %v1128_v10  ;;  %v4968_v10 = vld [vmem:[#allocation10 + $0x104] ss:$8 sps:$4 sm:$0xff]  }
 0x36f   : > { %2136 = vmatprep.subr.bf16.mxu0 %v4443_v22  ;;  %v1136_v22 = vld [vmem:[#allocation8 + $0x338] sm:$0xff] }
 0x370   : > { %v4483_v46 = vcombine.high %v1132_v38, %v1136_v22  ;;  %v4482_v42 = vcombine.low %v1132_v38, %v1136_v22  ;;  %3548 = vmatpush1.bf16.msra.mxu1 %v4960_v58  ;;  %v5041_v38 = vld [vmem:[#allocation10 + $0x340] ss:$8 sps:$4 sm:$0xff]  }
 0x371   : > { %3549 = vmatprep.subr.bf16.mxu1 %v4965_v13 }
 0x372   : > { %2137 = vmatpush1.bf16.msra.mxu0 %v4442_v26  ;;  %v1140_v26 = vld [vmem:[#allocation8 + $0x358] sm:$0xff] }
 0x373   : > { %2138 = vmatprep.subr.bf16.mxu0 %v4451_v53  ;;  %v1144_v53 = vld [vmem:[#allocation8 + $0x378] sm:$0xff] }
 0x374   : > { %v4491_v41 = vcombine.high %v1140_v26, %v1144_v53  ;;  %v4490_v57 = vcombine.low %v1140_v26, %v1144_v53  ;;  %v5049_v53 = vld [vmem:[#allocation10 + $0x354] ss:$8 sps:$4 sm:$0xff]  }
 0x375   : > { %2009 = vmatmul.mubr.bf16.gmra.mrb[64].mxu0 %v6409_v52 }
 0x376   : > { %2018 = vmatprep.mubr.bf16.mxu0 %v6427_v37  ;;  %2139 = vmatpush1.bf16.msra.mxu0 %v4450_v2  ;;  %v1148_v2 = vld [vmem:[#allocation8 + $0x398] sm:$0xff] }
 0x377   : > { %2140 = vmatprep.subr.bf16.mxu0 %v4459_v56  ;;  %v1152_v56 = vld [vmem:[#allocation8 + $0x3b8] sm:$0xff] }
 0x378   : > { %v4499_v16 = vcombine.high %v1148_v2, %v1152_v56 }
 0x37a   : > { %2141 = vmatpush1.bf16.msra.mxu0 %v4458_v1  ;;  %v4963_v1 = vld [vmem:[#allocation10 + $0xf0] ss:$8 sps:$4 sm:$0xff]  }
 0x37b   : > { %2142 = vmatprep.subr.bf16.mxu0 %v4467_v27  ;;  %v4498_v27 = vcombine.low %v1148_v2, %v1152_v56  ;;  %3550 = vmatpush1.bf16.msra.mxu1 %v4963_v1  ;;  %v5047_v56 = vld [vmem:[#allocation10 + $0x350] ss:$8 sps:$4 sm:$0xff]  }
 0x37c   : > { %3612 = vmatprep.subr.bf16.mxu1 %v4968_v10 }
 0x37d   : > { %2019 = vmatmul.mubr.bf16.gmra.mrb[68].mxu0 %v6436_v61 }
 0x37e   : > { %2143 = vmatpush1.bf16.msra.mxu0 %v4466_v18  ;;  %2154 = vmatprep.mubr.bf16.mxu0 %v6269_v15  ;;  %v1156_v15 = vld [vmem:[#allocation8 + $0x3d8] sm:$0xff] }
 0x37f   : > { %2144 = vmatprep.subr.bf16.mxu0 %v4475_v0  ;;  %v4507_v30 = vcombine.high %v1156_v15, %v1160_v51  ;;  %v4506_v17 = vcombine.low %v1156_v15, %v1160_v51  ;;  %v5055_v51 = vld [vmem:[#allocation10 + $0x364] ss:$8 sps:$4 sm:$0xff]  }
 0x382   : > { %2145 = vmatpush1.bf16.msra.mxu0 %v4474_v36  ;;  %v5043_v36 = vld [vmem:[#allocation10 + $0x344] ss:$8 sps:$4 sm:$0xff]  }
 0x383   : > { %2146 = vmatprep.subr.bf16.mxu0 %v4483_v46 }
 0x386   : > { %2147 = vmatpush1.bf16.msra.mxu0 %v4482_v42 }
 0x387   : > { %2148 = vmatprep.subr.bf16.mxu0 %v4491_v41 }
 0x38a   : > { %2149 = vmatpush1.bf16.msra.mxu0 %v4490_v57 }
 0x38b   : > { %2150 = vmatprep.subr.bf16.mxu0 %v4499_v16 }
 0x38e   : > { %2151 = vmatpush1.bf16.msra.mxu0 %v4498_v27 }
 0x38f   : > { %2152 = vmatprep.subr.bf16.mxu0 %v4507_v30 }
 0x392   : > { %2153 = vmatpush1.bf16.msra.mxu0 %v4506_v17 }
 0x395   : > { %2155 = vmatmul.mubr.bf16.vlgmr.msra.gmra.mrb[72].mxu0 %v6273_v39  ;;  %v5017_v39 = vld [vmem:[#allocation10 + $0x300] ss:$8 sps:$4 sm:$0xff]  }
 0x396   : > { %2164 = vmatprep.mubr.bf16.mxu0 %v6306_v50  ;;  %v5019_v50 = vld [vmem:[#allocation10 + $0x304] ss:$8 sps:$4 sm:$0xff]  }
 0x397   : > { %3798 = vmatprep.subr.bf16.mxu0 %v5019_v50  ;;  %v5053_v50 = vld [vmem:[#allocation10 + $0x360] ss:$8 sps:$4 sm:$0xff]  }
 0x398   : > { %3799 = vmatpush1.bf16.msra.mxu0 %v5017_v39 }
 0x39d   : > { %2165 = vmatmul.mubr.bf16.gmra.mrb[76].mxu0 %v6310_v47  ;;  %v5023_v47 = vld [vmem:[#allocation10 + $0x310] ss:$8 sps:$4 sm:$0xff]  }
 0x39e   : > { %2174 = vmatprep.mubr.bf16.mxu0 %v6332_v3  ;;  %v5025_v3 = vld [vmem:[#allocation10 + $0x314] ss:$8 sps:$4 sm:$0xff]  }
 0x39f   : > { %3800 = vmatprep.subr.bf16.mxu0 %v5025_v3 }
 0x3a0   : > { %3801 = vmatpush1.bf16.msra.mxu0 %v5023_v47 }
 0x3a5   : > { %2175 = vmatmul.mubr.bf16.gmra.mrb[80].mxu0 %v6345_v24  ;;  %v5029_v24 = vld [vmem:[#allocation10 + $0x320] ss:$8 sps:$4 sm:$0xff]  }
 0x3a6   : > { %2184 = vmatprep.mubr.bf16.mxu0 %v6364_v59  ;;  %v5031_v59 = vld [vmem:[#allocation10 + $0x324] ss:$8 sps:$4 sm:$0xff]  }
 0x3a7   : > { %3802 = vmatprep.subr.bf16.mxu0 %v5031_v59 }
 0x3a8   : > { %3803 = vmatpush1.bf16.msra.mxu0 %v5029_v24  ;;  %v5061_v24 = vld [vmem:[#allocation10 + $0x374] ss:$8 sps:$4 sm:$0xff]  }
 0x3ad   : > { %2185 = vmatmul.mubr.bf16.gmra.mrb[84].mxu0 %v6377_v32  ;;  %v6465_v32 = vsub.s32 4, %v5952_v5 }
 0x3ae   : > { %2194 = vmatprep.mubr.bf16.mxu0 %v6396_v40  ;;  %v6470_v40 = vld [vmem:[%s7701_s5] sm:$0xff] }
 0x3af   : > { %7798 = vst [vmem:[#allocation43_spill] sm:$0xff] %v6465_v32  ;;  %v6477_v18 = vrot.slane %v6470_v40, %v5955_v6  ;;  %v6481_v25 = vrot.slane %v6470_v40, %v6465_v32  ;;  %v6485_v0 = vrot.slane %v6470_v40, %v6224_v19 }
 0x3b5   : > { %2195 = vmatmul.mubr.bf16.gmra.mrb[88].mxu0 %v6409_v52  ;;  %v5035_v52 = vld [vmem:[#allocation10 + $0x330] ss:$8 sps:$4 sm:$0xff]  }
 0x3b6   : > { %2204 = vmatprep.mubr.bf16.mxu0 %v6427_v37  ;;  %v5037_v37 = vld [vmem:[#allocation10 + $0x334] ss:$8 sps:$4 sm:$0xff]  }
 0x3b7   : > { %3804 = vmatprep.subr.bf16.mxu0 %v5037_v37 }
 0x3b8   : > { %3805 = vmatpush1.bf16.msra.mxu0 %v5035_v52 }
 0x3b9   : > { %3806 = vmatprep.subr.bf16.mxu0 %v5043_v36 }
 0x3bc   : > { %3807 = vmatpush1.bf16.msra.mxu0 %v5041_v38 }
 0x3bd   : > { %2205 = vmatmul.mubr.bf16.gmra.mrb[92].mxu0 %v6436_v61  ;;  %v6473_v61 = vsub.s32 5, %v5952_v5  ;;  %3808 = vmatprep.subr.bf16.mxu0 %v5049_v53 }
 0x3bf   : > { %7799 = vst [vmem:[#allocation44_spill] sm:$0xff] %v6473_v61  ;;  %v6489_v22 = vrot.slane %v6470_v40, %v6473_v61  ;;  %v5073_v61 = vld [vmem:[#allocation10 + $0x394] ss:$8 sps:$4 sm:$0xff]  }
 0x3c0   : > { %3809 = vmatpush1.bf16.msra.mxu0 %v5047_v56 }
 0x3c1   : > { %3810 = vmatprep.subr.bf16.mxu0 %v5055_v51 }
 0x3c4   : > { %3811 = vmatpush1.bf16.msra.mxu0 %v5053_v50 }
 0x3c5   : > { %3812 = vmatprep.subr.bf16.mxu0 %v5061_v24  ;;  %v5067_v24 = vld [vmem:[#allocation10 + $0x384] ss:$8 sps:$4 sm:$0xff]  }
 0x3e8   : > { %v1877_v46 = vpop.f32.mrb[24].mxu0  ;;  %v2063_v26 = vpop.f32.mrb[0].mxu1 }
 0x3e9   : > { %v1878_v6 = vadd.f32 %v1877_v46, %v6477_v18  ;;  %v2064_v63 = vadd.f32 %v2063_v26, %v6481_v25  ;;  %v1879_v42 = vpop.f32.mrb[25].mxu0  ;;  %v2065_v58 = vpop.f32.mrb[1].mxu1 }
 0x3ea   : > { %v1880_v19 = vadd.f32 %v1879_v42, %v6485_v0  ;;  %v1881_v41 = vpop.f32.mrb[26].mxu0  ;;  %v2067_v2 = vpop.f32.mrb[2].mxu1  ;;  %v2066_v15 = vadd.f32 %v2065_v58, %v6489_v22 }
 0x3eb   : > { %v2311_v57 = vmul.f32 0.70710677, %v1878_v6  ;;  %v2315_v16 = vmul.f32 0.70710677, %v2064_v63  ;;  %v1882_v1 = vadd.f32 %v1881_v41, %v6477_v18  ;;  %v2068_v27 = vadd.f32 %v2067_v2, %v6481_v25  ;;  %v1883_v30 = vpop.f32.mrb[27].mxu0  ;;  %v2069_v10 = vpop.f32.mrb[3].mxu1 }
 0x3ec   : > { %v2312_v13 = vmul.f32 0.70710677, %v1880_v19  ;;  %v1884_v17 = vadd.f32 %v1883_v30, %v6485_v0  ;;  %v2070_v39 = vadd.f32 %v2069_v10, %v6489_v22  ;;  %v2316_v47 = vmul.f32 0.70710677, %v2066_v15  ;;  %v5059_v2 = vld [vmem:[#allocation10 + $0x370] ss:$8 sps:$4 sm:$0xff]  }
 0x3ed   : > { %5134 = verf.f32 %v2311_v57  ;;  %v2319_v3 = vmul.f32 0.70710677, %v1882_v1  ;;  %v2323_v59 = vmul.f32 0.70710677, %v2068_v27  ;;  %v2215_v50 = vmul.f32 0.5, %v1878_v6  ;;  %3813 = vmatpush1.bf16.msra.mxu0 %v5059_v2 }
 0x3ee   : > { %5136 = verf.f32 %v2315_v16  ;;  %v2320_v52 = vmul.f32 0.70710677, %v1884_v17  ;;  %v2324_v38 = vmul.f32 0.70710677, %v2070_v39  ;;  %v2223_v62 = vmul.f32 0.5, %v1882_v1  ;;  %3814 = vmatprep.subr.bf16.mxu0 %v5067_v24 }
 0x3ef   : > { %5138 = verf.f32 %v2312_v13  ;;  %v2227_v6 = vmul.f32 0.5, %v2068_v27 }
 0x3f0   : > { %v1887_v37 = vpop.f32.mrb[28].mxu0  ;;  %5140 = verf.f32 %v2319_v3  ;;  %v2073_v46 = vpop.f32.mrb[4].mxu1  ;;  %v6505_v3 = vrot.slane %v6470_v40, %v6227_v60 }
 0x3f1   : > { %v1888_v36 = vadd.f32 %v1887_v37, %v6477_v18  ;;  %v1889_v26 = vpop.f32.mrb[29].mxu0  ;;  %5142 = verf.f32 %v2323_v59  ;;  %v2074_v53 = vadd.f32 %v2073_v46, %v6481_v25  ;;  %v2075_v58 = vpop.f32.mrb[5].mxu1  ;;  %v6508_v59 = vsub.s32 3, %v5952_v5  ;;  %v5065_v46 = vld [vmem:[#allocation10 + $0x380] ss:$8 sps:$4 sm:$0xff]  }
 0x3f2   : > { %v1890_v42 = vadd.f32 %v1889_v26, %v6485_v0  ;;  %v1891_v41 = vpop.f32.mrb[30].mxu0  ;;  %5144 = verf.f32 %v2316_v47  ;;  %v2076_v57 = vadd.f32 %v2075_v58, %v6489_v22  ;;  %v2077_v16 = vpop.f32.mrb[6].mxu1  ;;  %v2219_v47 = vmul.f32 0.5, %v2064_v63  ;;  %3815 = vmatpush1.bf16.msra.mxu0 %v5065_v46 }
 0x3f3   : > { %v2327_v56 = vmul.f32 0.70710677, %v1888_v36  ;;  %v1893_v51 = vpop.f32.mrb[31].mxu0  ;;  %5146 = verf.f32 %v2320_v52  ;;  %v2331_v13 = vmul.f32 0.70710677, %v2074_v53  ;;  %v2079_v30 = vpop.f32.mrb[7].mxu1  ;;  %v1892_v37 = vadd.f32 %v1891_v41, %v6477_v18  ;;  %3816 = vmatprep.subr.bf16.mxu0 %v5073_v61 }
 0x3f4   : > { %5148 = verf.f32 %v2324_v38  ;;  %v2328_v10 = vmul.f32 0.70710677, %v1890_v42  ;;  %7800 = vst [vmem:[#allocation45_spill] sm:$0xff] %v6508_v59  ;;  %v6511_v26 = vmul.f32 0.5, %v1880_v19  ;;  %v6513_v38 = vmul.f32 0.5, %v2066_v15 }
 0x3f5   : > { %5150 = verf.f32 %v2327_v56  ;;  %v2332_v58 = vmul.f32 0.70710677, %v2076_v57  ;;  %v6516_v60 = vadd.f32 %v2077_v16, %v6481_v25  ;;  %v6519_v63 = vadd.f32 %v1893_v51, %v6485_v0 }
 0x3f6   : > { %5152 = verf.f32 %v2331_v13  ;;  %v6521_v56 = vmul.f32 0.5, %v1884_v17  ;;  %v6523_v19 = vmul.f32 0.5, %v2070_v39  ;;  %v2335_v15 = vmul.f32 0.70710677, %v1892_v37  ;;  %v5071_v17 = vld [vmem:[#allocation10 + $0x390] ss:$8 sps:$4 sm:$0xff]  }
 0x3f7   : > { %v5135_v52 = vpop.eup %5134  ;;  %5154 = verf.f32 %v2328_v10  ;;  %v2080_v1 = vadd.f32 %v2079_v30, %v6489_v22  ;;  %v6530_v51 = vrot.slane %v6470_v40, %v6508_v59  ;;  %v6532_v39 = vmul.f32 0.5, %v1888_v36  ;;  %3817 = vmatpush1.bf16.msra.mxu0 %v5071_v17 }
 0x3f8   : > { %v5137_v32 = vpop.eup %5136  ;;  %v1897_v41 = vpop.f32.mrb[32].mxu0  ;;  %v2503_v20 = vadd.f32 1.0, %v5135_v52  ;;  %v6534_v10 = vmul.f32 0.5, %v2074_v53  ;;  %5156 = verf.f32 %v2332_v58  ;;  %v2339_v52 = vmul.f32 0.70710677, %v6516_v60 }
 0x3f9   : > { %v2083_v2 = vpop.f32.mrb[8].mxu1  ;;  %v1899_v11 = vpop.f32.mrb[33].mxu0  ;;  %v2507_v21 = vadd.f32 1.0, %v5137_v32  ;;  %v6539_v33 = vmul.f32 0.5, %v1890_v42  ;;  %v6541_v40 = vmul.f32 0.5, %v2076_v57  ;;  %v6546_v54 = vmul.f32 0.5, %v1892_v37 }
 0x3fa   : > { %v5139_v16 = vpop.eup %5138  ;;  %v2085_v27 = vpop.f32.mrb[9].mxu1  ;;  %v2336_v46 = vmul.f32 0.70710677, %v6519_v63  ;;  %5158 = verf.f32 %v2335_v15  ;;  %v1898_v58 = vadd.f32 %v1897_v41, %v6477_v18  ;;  %v6549_v4 = vmul.f32 %v2503_v20, %v2215_v50  ;;  %v5079_v50 = vld [vmem:[#allocation10 + $0x3a4] ss:$8 sps:$4 sm:$0xff]  }
 0x3fb   : > { %v6526_v13 = vpop.f32.mrb[34].mxu0  ;;  %v5141_v24 = vpop.eup %5140  ;;  %v6551_v61 = vmul.f32 %v2507_v21, %v2219_v47  ;;  %v2340_v57 = vmul.f32 0.70710677, %v2080_v1  ;;  %5160 = verf.f32 %v2339_v52  ;;  %v2084_v37 = vadd.f32 %v2083_v2, %v6481_v25  ;;  %3818 = vmatprep.subr.bf16.mxu0 %v5079_v50 }
 0x3fc   : > { %v2087_v32 = vpop.f32.mrb[10].mxu1  ;;  %v6537_v43 = vpop.f32.mrb[35].mxu0  ;;  %v2511_v48 = vadd.f32 1.0, %v5141_v24  ;;  %v2343_v14 = vmul.f32 0.70710677, %v1898_v58  ;;  %v2504_v9 = vadd.f32 1.0, %v5139_v16  ;;  %5162 = verf.f32 %v2336_v46 }
 0x3fd   : > { %v5143_v30 = vpop.eup %5142  ;;  %v6544_v23 = vpop.f32.mrb[11].mxu1  ;;  %7801 = vst [vmem:[#allocation46_spill] sm:$0xff] %v6551_v61  ;;  %v1900_v21 = vadd.f32 %v1899_v11, %v6485_v0  ;;  %v6566_v2 = vmul.f32 0.5, %v6516_v60  ;;  %v6573_v11 = vmul.f32 0.5, %v6519_v63  ;;  %5164 = verf.f32 %v2340_v57 }
 0x3fe   : > { %v5145_v36 = vpop.eup %5144  ;;  %v2515_v53 = vadd.f32 1.0, %v5143_v30  ;;  %v6553_v42 = vmul.f32 %v2511_v48, %v2223_v62  ;;  %v5077_v30 = vld [vmem:[#allocation10 + $0x3a0] ss:$8 sps:$4 sm:$0xff]   ;;  %5166 = verf.f32 %v2343_v14  ;;  %v2086_v55 = vadd.f32 %v2085_v27, %v6489_v22  ;;  %v5083_v14 = vld [vmem:[#allocation10 + $0x3b0] ss:$8 sps:$4 sm:$0xff]  }
 0x3ff   : > { %v5147_v44 = vpop.eup %5146  ;;  %v2508_v47 = vadd.f32 1.0, %v5145_v36  ;;  %3819 = vmatpush1.bf16.msra.mxu0 %v5077_v30  ;;  %v6587_v63 = vmul.f32 %v2504_v9, %v6511_v26  ;;  %v6591_v57 = vadd.f32 %v6526_v13, %v6477_v18  ;;  %v6594_v50 = vadd.f32 %v2087_v32, %v6481_v25 }
 0x400   : > { %v5149_v24 = vpop.eup %5148  ;;  %v6555_v28 = vmul.f32 %v2515_v53, %v2227_v6  ;;  %v1907_v48 = vpop.f32.mrb[36].mxu0  ;;  %v2512_v41 = vadd.f32 1.0, %v5147_v44  ;;  %v6575_v53 = vmul.f32 0.5, %v2080_v1  ;;  %v2347_v6 = vmul.f32 0.70710677, %v2084_v37 }
 0x401   : > { %v5151_v15 = vpop.eup %5150  ;;  %v6561_v62 = vpop.f32.mrb[12].mxu1  ;;  %v2516_v46 = vadd.f32 1.0, %v5149_v24  ;;  %v2344_v1 = vmul.f32 0.70710677, %v1900_v21  ;;  %v6597_v27 = vmul.f32 %v2508_v47, %v6513_v38  ;;  %v6602_v9 = vmul.f32 0.5, %v1898_v58 }
 0x402   : > { %7802 = vst [vmem:[#allocation47_spill] sm:$0xff] %v6555_v28  ;;  %v6568_v17 = vpop.f32.mrb[37].mxu0  ;;  %v6570_v16 = vpop.f32.mrb[13].mxu1  ;;  %v2519_v60 = vadd.f32 1.0, %v5151_v15  ;;  %v5085_v15 = vld [vmem:[#allocation10 + $0x3b4] ss:$8 sps:$4 sm:$0xff]   ;;  %v6600_v35 = vmul.f32 %v2512_v41, %v6521_v56  ;;  %5168 = verf.f32 %v2347_v6  ;;  %v6620_v41 = vadd.f32 %v6544_v23, %v6489_v22 }
 0x403   : > { %v5153_v52 = vpop.eup %5152  ;;  %v6577_v36 = vpop.f32.mrb[38].mxu0  ;;  %v6604_v29 = vmul.f32 0.5, %v2084_v37  ;;  %v2348_v13 = vmul.f32 0.70710677, %v2086_v55  ;;  %v2351_v12 = vmul.f32 0.70710677, %v6591_v57  ;;  %3820 = vmatprep.subr.bf16.mxu0 %v5085_v15  ;;  %v6608_v34 = vmul.f32 %v2516_v46, %v6523_v19 }
 0x404   : > { %v6579_v20 = vpop.f32.mrb[14].mxu1  ;;  %v5155_v44 = vpop.eup %5154  ;;  %v2523_v30 = vadd.f32 1.0, %v5153_v52  ;;  %v6611_v38 = vmul.f32 %v2519_v60, %v6532_v39  ;;  %v2355_v56 = vmul.f32 0.70710677, %v6594_v50  ;;  %3821 = vmatpush1.bf16.msra.mxu0 %v5083_v14  ;;  %v5089_v58 = vld [vmem:[#allocation10 + $0x3c0] ss:$8 sps:$4 sm:$0xff]   ;;  %5170 = verf.f32 %v2344_v1 }
 0x405   : > { %v6582_v8 = vpop.f32.mrb[39].mxu0  ;;  %v6584_v24 = vpop.f32.mrb[15].mxu1  ;;  %v2520_v26 = vadd.f32 1.0, %v5155_v44  ;;  %7803 = vst [vmem:[#allocation48_spill] sm:$0xff] %v6608_v34  ;;  %v6616_v37 = vadd.f32 %v6537_v43, %v6485_v0  ;;  %v5091_v39 = vld [vmem:[#allocation10 + $0x3c4] ss:$8 sps:$4 sm:$0xff]   ;;  %5172 = verf.f32 %v2348_v13 }
 0x406   : > { %v5157_v31 = vpop.eup %5156  ;;  %v6627_v46 = vmul.f32 %v2523_v30, %v6534_v10  ;;  %v6629_v44 = vmul.f32 0.5, %v1900_v21  ;;  %5174 = verf.f32 %v2351_v12  ;;  %3822 = vmatprep.subr.bf16.mxu0 %v5091_v39  ;;  %v6646_v30 = vmul.f32 0.5, %v2086_v55  ;;  %v5095_v39 = vld [vmem:[#allocation10 + $0x3d0] ss:$8 sps:$4 sm:$0xff]  }
 0x407   : > { %v5159_v32 = vpop.eup %5158  ;;  %v2524_v47 = vadd.f32 1.0, %v5157_v31  ;;  %v6632_v31 = vadd.f32 %v1907_v48, %v6477_v18  ;;  %v6639_v1 = vmul.f32 %v2520_v26, %v6539_v33  ;;  %v2352_v15 = vmul.f32 0.70710677, %v6616_v37 }
 0x408   : > { %v6622_v19 = vpop.f32.mrb[40].mxu0  ;;  %v6624_v52 = vpop.f32.mrb[16].mxu1  ;;  %7804 = vst [vmem:[#allocation49_spill] sm:$0xff] %v6627_v46  ;;  %v2527_v14 = vadd.f32 1.0, %v5159_v32  ;;  %5176 = verf.f32 %v2355_v56  ;;  %v2356_v48 = vmul.f32 0.70710677, %v6620_v41  ;;  %3823 = vmatpush1.bf16.msra.mxu0 %v5089_v58  ;;  %v6657_v32 = vadd.f32 %v6561_v62, %v6481_v25 }
 0x409   : > { %v5161_v6 = vpop.eup %5160  ;;  %v6634_v43 = vpop.f32.mrb[41].mxu0  ;;  %v2359_v13 = vmul.f32 0.70710677, %v6632_v31  ;;  %v6653_v12 = vmul.f32 %v2524_v47, %v6541_v40  ;;  %v6661_v55 = vadd.f32 %v6568_v17, %v6485_v0  ;;  %v6667_v58 = vadd.f32 %v6570_v16, %v6489_v22  ;;  %v4966_v47 = vld [vmem:[#allocation10 + $0x100] ss:$8 sps:$4 sm:$0xff]   ;;  %3824 = vmatprep.subr.bf16.mxu0 %v5097_v7 }
 0x40a   : > { %v6636_v60 = vpop.f32.mrb[17].mxu1  ;;  %v5163_v23 = vpop.eup %5162  ;;  %v2531_v26 = vadd.f32 1.0, %v5161_v6  ;;  %v2696_v40 = vpack.c.bf16 %v6600_v35, %v6587_v63  ;;  %v6673_v62 = vadd.f32 %v6577_v36, %v6477_v18  ;;  %v4971_v17 = vld [vmem:[#allocation10 + $0x114] ss:$8 sps:$4 sm:$0xff]   ;;  %v6676_v6 = vmul.f32 %v2527_v14, %v6546_v54  ;;  %v5103_v16 = vld [vmem:[#allocation10 + $0x3e4] ss:$8 sps:$4 sm:$0xff]  }
 0x40b   : > { %v6642_v10 = vpop.f32.mrb[42].mxu0  ;;  %v6644_v21 = vpop.f32.mrb[18].mxu1  ;;  %7805 = vst [vmem:[#allocation50_spill] sm:$0xff] %v6653_v12  ;;  %v2528_v59 = vadd.f32 1.0, %v5163_v23  ;;  %v6679_v61 = vmul.f32 0.5, %v6591_v57  ;;  %5178 = verf.f32 %v2352_v15  ;;  %v6683_v35 = vmul.f32 0.5, %v6594_v50 }
 0x40c   : > { %v6650_v49 = vpop.f32.mrb[43].mxu0  ;;  %v5165_v33 = vpop.eup %5164  ;;  %v2363_v23 = vmul.f32 0.70710677, %v6657_v32  ;;  %5180 = verf.f32 %v2356_v48  ;;  %v2360_v36 = vmul.f32 0.70710677, %v6661_v55  ;;  %3551 = vmatprep.mubr.bf16.mxu1 %v2696_v40  ;;  %3825 = vmatpush1.bf16.msra.mxu0 %v5095_v39  ;;  %v6687_v54 = vmul.f32 %v2531_v26, %v6566_v2 }
 0x40d   : > { %v6663_v56 = vpop.f32.mrb[19].mxu1  ;;  %v5167_v45 = vpop.eup %5166  ;;  %v2532_v28 = vadd.f32 1.0, %v5165_v33  ;;  %v5101_v63 = vld [vmem:[#allocation10 + $0x3e0] ss:$8 sps:$4 sm:$0xff]   ;;  %5182 = verf.f32 %v2359_v13  ;;  %v2364_v14 = vmul.f32 0.70710677, %v6667_v58  ;;  %v7807_v7 = vpack.c.bf16 %v6553_v42, %v6549_v4  ;;  %3826 = vmatprep.subr.bf16.mxu0 %v5103_v16 }
 0x40e   : > { %7806 = vst [vmem:[#allocation51_spill] sm:$0xff] %v6687_v54  ;;  %v2535_v57 = vadd.f32 1.0, %v5167_v45  ;;  %v5169_v48 = vpop.eup %5168  ;;  %v6698_v33 = vmul.f32 %v2528_v59, %v6573_v11  ;;  %5184 = verf.f32 %v2363_v23  ;;  %v2367_v2 = vmul.f32 0.70710677, %v6673_v62  ;;  %v4969_v13 = vld [vmem:[#allocation10 + $0x110] ss:$8 sps:$4 sm:$0xff]  }
 0x40f   : > { %3552 = vmatmul.mubr.bf16.vlgmr.msra.gmra.mrb[24].mxu1 %v7807_v7  ;;  %v2098_v45 = vadd.f32 %v6579_v20, %v6481_v25  ;;  %v5171_v42 = vpop.eup %5170  ;;  %v6708_v39 = vmul.f32 0.5, %v6616_v37  ;;  %5186 = verf.f32 %v2360_v36  ;;  %v1914_v59 = vadd.f32 %v6582_v8, %v6485_v0  ;;  %v4974_v40 = vld [vmem:[#allocation10 + $0x124] ss:$8 sps:$4 sm:$0xff]   ;;  %v4972_v7 = vld [vmem:[#allocation10 + $0x120] ss:$8 sps:$4 sm:$0xff]  }
 0x410   : > { %v6693_v15 = vpop.f32.mrb[44].mxu0  ;;  %v6695_v50 = vpop.f32.mrb[20].mxu1  ;;  %3613 = vmatpush1.bf16.msra.mxu1 %v4966_v47  ;;  %v2100_v11 = vadd.f32 %v6584_v24, %v6489_v22  ;;  %v6719_v16 = vmul.f32 %v2532_v28, %v6575_v53  ;;  %v6722_v37 = vmul.f32 0.5, %v6620_v41  ;;  %5188 = verf.f32 %v2364_v14  ;;  %3827 = vmatpush1.bf16.msra.mxu0 %v5101_v63  ;;  %v5107_v53 = vld [vmem:[#allocation10 + $0x3f0] ss:$8 sps:$4 sm:$0xff]  }
 0x411   : > { %v6703_v26 = vpop.f32.mrb[45].mxu0  ;;  %v6705_v4 = vpop.f32.mrb[21].mxu1  ;;  %3614 = vmatprep.subr.bf16.mxu1 %v4971_v17  ;;  %v2371_v36 = vmul.f32 0.70710677, %v2098_v45  ;;  %v6729_v17 = vmul.f32 %v2535_v57, %v6602_v9  ;;  %v6732_v54 = vmul.f32 0.5, %v6632_v31  ;;  %5190 = verf.f32 %v2367_v2 }
 0x412   : > { %v6714_v20 = vpop.f32.mrb[46].mxu0  ;;  %v6716_v47 = vpop.f32.mrb[22].mxu1  ;;  %7808 = vst [vmem:[#allocation52_spill] sm:$0xff] %v6719_v16  ;;  %v2368_v28 = vmul.f32 0.70710677, %v1914_v59  ;;  %v2539_v46 = vadd.f32 1.0, %v5169_v48  ;;  %v1918_v9 = vadd.f32 %v6622_v19, %v6477_v18  ;;  %v2104_v31 = vadd.f32 %v6624_v52, %v6481_v25 }
 0x413   : > { %v5173_v23 = vpop.eup %5172  ;;  %v6724_v8 = vpop.f32.mrb[47].mxu0  ;;  %v2536_v14 = vadd.f32 1.0, %v5171_v42  ;;  %5192 = verf.f32 %v2371_v36  ;;  %v2372_v16 = vmul.f32 0.70710677, %v2100_v11  ;;  %v5109_v12 = vld [vmem:[#allocation10 + $0x3f4] ss:$8 sps:$4 sm:$0xff]   ;;  %v1920_v19 = vadd.f32 %v6634_v43, %v6485_v0 }
 0x414   : > { %v6726_v5 = vpop.f32.mrb[23].mxu1  ;;  %v5175_v24 = vpop.eup %5174  ;;  %3615 = vmatpush1.bf16.msra.mxu1 %v4969_v13  ;;  %v6735_v34 = vmul.f32 0.5, %v6657_v32  ;;  %5194 = verf.f32 %v2368_v28  ;;  %v4977_v63 = vld [vmem:[#allocation10 + $0x134] ss:$8 sps:$4 sm:$0xff]   ;;  %v2540_v57 = vadd.f32 1.0, %v5173_v23  ;;  %v6742_v48 = vmul.f32 0.5, %v6661_v55  ;;  %3828 = vmatprep.subr.bf16.mxu0 %v5109_v12 }
 0x415   : > { %v5177_v41 = vpop.eup %5176  ;;  %3616 = vmatprep.subr.bf16.mxu1 %v4974_v40  ;;  %v6745_v2 = vmul.f32 0.5, %v6667_v58  ;;  %5196 = verf.f32 %v2372_v16  ;;  %v2543_v13 = vadd.f32 1.0, %v5175_v24  ;;  %v2375_v36 = vmul.f32 0.70710677, %v1918_v9  ;;  %3829 = vmatpush1.bf16.msra.mxu0 %v5107_v53  ;;  %v4975_v12 = vld [vmem:[#allocation10 + $0x130] ss:$8 sps:$4 sm:$0xff]  }
 0x416   : > { %v5179_v32 = vpop.eup %5178  ;;  %v2547_v42 = vadd.f32 1.0, %v5177_v41  ;;  %v6750_v40 = vmul.f32 %v2539_v46, %v6604_v29  ;;  %v6753_v55 = vmul.f32 %v2536_v14, %v6629_v44  ;;  %v6756_v58 = vmul.f32 0.5, %v6673_v62  ;;  %v4980_v46 = vld [vmem:[#allocation10 + $0x144] ss:$8 sps:$4 sm:$0xff]  }
 0x417   : > { %v5181_v52 = vpop.eup %5180  ;;  %v2379_v23 = vmul.f32 0.70710677, %v2104_v31  ;;  %v6758_v24 = vmul.f32 0.5, %v2098_v45  ;;  %v6760_v28 = vmul.f32 0.5, %v1914_v59  ;;  %v6762_v43 = vmul.f32 0.5, %v2100_v11 }
 0x418   : > { %7809 = vst [vmem:[#allocation53_spill] sm:$0xff] %v6750_v40  ;;  %3617 = vmatpush1.bf16.msra.mxu1 %v4972_v7  ;;  %v5183_v16 = vpop.eup %5182  ;;  %v2106_v29 = vadd.f32 %v6636_v60, %v6489_v22  ;;  %v6767_v53 = vmul.f32 %v2540_v57, %v6646_v30  ;;  %v2544_v62 = vadd.f32 1.0, %v5179_v32  ;;  %5198 = verf.f32 %v2375_v36 }
 0x419   : > { %3618 = vmatprep.subr.bf16.mxu1 %v4977_v63  ;;  %v5185_v44 = vpop.eup %5184  ;;  %v2704_v7 = vpack.c.bf16 %v6698_v33, %v6639_v1  ;;  %v6772_v59 = vmul.f32 %v2543_v13, %v6679_v61  ;;  %v6775_v11 = vmul.f32 %v2547_v42, %v6683_v35  ;;  %v2548_v41 = vadd.f32 1.0, %v5181_v52  ;;  %v4978_v1 = vld [vmem:[#allocation10 + $0x140] ss:$8 sps:$4 sm:$0xff]  }
 0x41a   : > { %v5187_v45 = vpop.eup %5186  ;;  %v2376_v60 = vmul.f32 0.70710677, %v1920_v19  ;;  %v2551_v63 = vadd.f32 1.0, %v5183_v16  ;;  %v6777_v40 = vmul.f32 0.5, %v1918_v9  ;;  %5200 = verf.f32 %v2379_v23  ;;  %v4983_v9 = vld [vmem:[#allocation10 + $0x154] ss:$8 sps:$4 sm:$0xff]  }
 0x41b   : > { %v5189_v14 = vpop.eup %5188  ;;  %3561 = vmatprep.mubr.bf16.mxu1 %v2704_v7  ;;  %v1922_v30 = vadd.f32 %v6642_v10, %v6477_v18  ;;  %v6781_v57 = vmul.f32 0.5, %v2104_v31  ;;  %v2380_v61 = vmul.f32 0.70710677, %v2106_v29  ;;  %v2108_v35 = vadd.f32 %v6644_v21, %v6481_v25 }
 0x41c   : > { %3619 = vmatpush1.bf16.msra.mxu1 %v4975_v12  ;;  %v5191_v33 = vpop.eup %5190  ;;  %v2703_v32 = vpack.c.bf16 %v6676_v6, %v6611_v38  ;;  %v6788_v42 = vmul.f32 %v2544_v62, %v6708_v39  ;;  %v2555_v36 = vadd.f32 1.0, %v5185_v44  ;;  %v6790_v10 = vmul.f32 0.5, %v1920_v19  ;;  %v4981_v19 = vld [vmem:[#allocation10 + $0x150] ss:$8 sps:$4 sm:$0xff]   ;;  %v4986_v62 = vld [vmem:[#allocation10 + $0x164] ss:$8 sps:$4 sm:$0xff]  }
 0x41d   : > { %3620 = vmatprep.subr.bf16.mxu1 %v4980_v46  ;;  %v5193_v13 = vpop.eup %5192  ;;  %v2383_v52 = vmul.f32 0.70710677, %v1922_v30  ;;  %v2552_v31 = vadd.f32 1.0, %v5187_v45  ;;  %v2556_v12 = vadd.f32 1.0, %v5189_v14  ;;  %5202 = verf.f32 %v2376_v60 }
 0x41e   : > { %v5195_v23 = vpop.eup %5194  ;;  %3562 = vmatmul.mubr.bf16.gmra.mrb[28].mxu1 %v2703_v32  ;;  %v1924_v21 = vadd.f32 %v6650_v49, %v6485_v0  ;;  %v6795_v38 = vmul.f32 %v2548_v41, %v6722_v37  ;;  %v6798_v6 = vmul.f32 %v2551_v63, %v6732_v54  ;;  %v2110_v39 = vadd.f32 %v6663_v56, %v6489_v22 }
 0x41f   : > { %v5197_v16 = vpop.eup %5196  ;;  %5204 = verf.f32 %v2383_v52  ;;  %v6802_v46 = vmul.f32 0.5, %v2106_v29  ;;  %v2387_v44 = vmul.f32 0.70710677, %v2108_v35  ;;  %v1928_v49 = vadd.f32 %v6693_v15, %v6477_v18 }
 0x420   : > { %3621 = vmatpush1.bf16.msra.mxu1 %v4978_v1  ;;  %5206 = verf.f32 %v2380_v61  ;;  %v6807_v37 = vmul.f32 %v2555_v36, %v6735_v34  ;;  %v2559_v54 = vadd.f32 1.0, %v5191_v33  ;;  %v2563_v7 = vadd.f32 1.0, %v5193_v13  ;;  %v4984_v1 = vld [vmem:[#allocation10 + $0x160] ss:$8 sps:$4 sm:$0xff]  }
 0x421   : > { %3622 = vmatprep.subr.bf16.mxu1 %v4983_v9  ;;  %v2384_v45 = vmul.f32 0.70710677, %v1924_v21  ;;  %v6810_v41 = vmul.f32 %v2552_v31, %v6742_v48  ;;  %v6813_v56 = vmul.f32 %v2556_v12, %v6745_v2  ;;  %v2560_v29 = vadd.f32 1.0, %v5195_v23  ;;  %v4989_v2 = vld [vmem:[#allocation10 + $0x174] ss:$8 sps:$4 sm:$0xff]  }
 0x422   : > { %v2564_v60 = vadd.f32 1.0, %v5197_v16  ;;  %v5199_v14 = vpop.eup %5198  ;;  %v2388_v63 = vmul.f32 0.70710677, %v2110_v39  ;;  %v2114_v15 = vadd.f32 %v6695_v50, %v6481_v25  ;;  %v1930_v34 = vadd.f32 %v6703_v26, %v6485_v0  ;;  %v4987_v12 = vld [vmem:[#allocation10 + $0x170] ss:$8 sps:$4 sm:$0xff]  }
 0x423   : > { %5208 = verf.f32 %v2384_v45  ;;  %v2287_v33 = vmul.f32 0.5, %v1922_v30  ;;  %v6819_v61 = vmul.f32 0.5, %v2108_v35  ;;  %v2391_v48 = vmul.f32 0.70710677, %v1928_v49 }
 0x424   : > { %3623 = vmatpush1.bf16.msra.mxu1 %v4981_v19  ;;  %5210 = verf.f32 %v2387_v44  ;;  %v5201_v32 = vpop.eup %5200  ;;  %v6822_v9 = vmul.f32 %v2559_v54, %v6756_v58  ;;  %v6825_v13 = vmul.f32 %v2563_v7, %v6758_v24  ;;  %v6827_v50 = vmul.f32 0.5, %v1924_v21 }
 0x425   : > { %3624 = vmatprep.subr.bf16.mxu1 %v4986_v62  ;;  %v6831_v26 = vadd.f32 %v6705_v4, %v6489_v22  ;;  %v2656_v30 = vmul.f32 %v2560_v29, %v6760_v28  ;;  %v2567_v35 = vadd.f32 1.0, %v5199_v14  ;;  %v6834_v36 = vmul.f32 0.5, %v2110_v39  ;;  %v4995_v14 = vld [vmem:[#allocation10 + $0x194] ss:$8 sps:$4 sm:$0xff]  }
 0x426   : > { %v2392_v52 = vmul.f32 0.70710677, %v1930_v34  ;;  %v6837_v31 = vmul.f32 %v2564_v60, %v6762_v43  ;;  %5212 = verf.f32 %v2388_v63  ;;  %v2395_v58 = vmul.f32 0.70710677, %v2114_v15  ;;  %v4992_v43 = vld [vmem:[#allocation10 + $0x184] ss:$8 sps:$4 sm:$0xff]  }
 0x427   : > { %v2712_v24 = vpack.c.bf16 %v6788_v42, %v6753_v55  ;;  %v5203_v4 = vpop.eup %5202  ;;  %v2571_v16 = vadd.f32 1.0, %v5201_v32  ;;  %5214 = verf.f32 %v2391_v48  ;;  %v1932_v28 = vadd.f32 %v6714_v20, %v6477_v18  ;;  %v4990_v60 = vld [vmem:[#allocation10 + $0x180] ss:$8 sps:$4 sm:$0xff]  }
 0x428   : > { %v1970_v23 = vpop.f32.mrb[48].mxu0  ;;  %3625 = vmatpush1.bf16.msra.mxu1 %v4984_v1  ;;  %v2711_v39 = vpack.c.bf16 %v6772_v59, %v6729_v17  ;;  %v6845_v62 = vmul.f32 0.5, %v1928_v49  ;;  %5216 = verf.f32 %v2392_v52  ;;  %v2396_v55 = vmul.f32 0.70710677, %v6831_v26 }
 0x429   : > { %v1972_v21 = vpop.f32.mrb[49].mxu0  ;;  %3626 = vmatprep.subr.bf16.mxu1 %v4989_v2  ;;  %v5205_v44 = vpop.eup %5204  ;;  %3571 = vmatprep.mubr.bf16.mxu1 %v2712_v24  ;;  %v1934_v42 = vadd.f32 %v6724_v8, %v6485_v0  ;;  %v6853_v18 = vmul.f32 %v2567_v35, %v6777_v40  ;;  %v6855_v17 = vmul.f32 0.5, %v2114_v15  ;;  %v2399_v59 = vmul.f32 0.70710677, %v1932_v28 }
 0x42a   : > { %v1974_v19 = vpop.f32.mrb[50].mxu0  ;;  %v5207_v7 = vpop.eup %5206  ;;  %v2575_v20 = vadd.f32 1.0, %v5205_v44  ;;  %3572 = vmatmul.mubr.bf16.gmra.mrb[32].mxu1 %v2711_v39  ;;  %v2568_v49 = vadd.f32 1.0, %v5203_v4  ;;  %5218 = verf.f32 %v2395_v58  ;;  %v2118_v45 = vadd.f32 %v6716_v47, %v6481_v25 }
 0x42b   : > { %v6850_v54 = vpop.f32.mrb[51].mxu0  ;;  %v2400_v29 = vmul.f32 0.70710677, %v1934_v42  ;;  %v6860_v0 = vmul.f32 %v2571_v16, %v6781_v57  ;;  %v6864_v40 = vmul.f32 0.5, %v1930_v34  ;;  %5220 = verf.f32 %v2399_v59 }
 0x42c   : > { %3627 = vmatpush1.bf16.msra.mxu1 %v4987_v12  ;;  %v6862_v8 = vmul.f32 %v2575_v20, %v2287_v33  ;;  %v2572_v15 = vadd.f32 1.0, %v5207_v7  ;;  %5222 = verf.f32 %v2396_v55  ;;  %v2720_v1 = vpack.c.bf16 %v2656_v30, %v6810_v41  ;;  %v4993_v41 = vld [vmem:[#allocation10 + $0x190] ss:$8 sps:$4 sm:$0xff]  }
 0x42d   : > { %3628 = vmatprep.subr.bf16.mxu1 %v4992_v43  ;;  %v5209_v63 = vpop.eup %5208  ;;  %v2719_v25 = vpack.c.bf16 %v6822_v9, %v6798_v6  ;;  %5224 = verf.f32 %v2400_v29  ;;  %v6872_v34 = vadd.f32 %v1970_v23, %v6505_v3  ;;  %v2403_v2 = vmul.f32 0.70710677, %v2118_v45 }
 0x42e   : > { %v5211_v47 = vpop.eup %5210  ;;  %v2576_v48 = vadd.f32 1.0, %v5209_v63  ;;  %v2727_v57 = vpack.c.bf16 %v6862_v8, %v6853_v18  ;;  %v2120_v32 = vadd.f32 %v6726_v5, %v6489_v22  ;;  %3581 = vmatprep.mubr.bf16.mxu1 %v2720_v1  ;;  %v6877_v30 = vadd.f32 %v1972_v21, %v6530_v51  ;;  %v4998_v22 = vld [vmem:[#allocation10 + $0x1a4] ss:$8 sps:$4 sm:$0xff]   ;;  %v5007_v18 = vld [vmem:[#allocation10 + $0x1d4] ss:$8 sps:$4 sm:$0xff]  }
 0x42f   : > { %v6880_v6 = vadd.f32 %v1974_v19, %v6505_v3  ;;  %v2664_v35 = vmul.f32 %v2568_v49, %v6790_v10  ;;  %v6885_v23 = vmul.f32 0.5, %v6831_v26  ;;  %v2313_v5 = vmul.f32 0.70710677, %v6872_v34  ;;  %v4996_v19 = vld [vmem:[#allocation10 + $0x1a0] ss:$8 sps:$4 sm:$0xff]  }
 0x430   : > { %v1980_v33 = vpop.f32.mrb[52].mxu0  ;;  %3629 = vmatpush1.bf16.msra.mxu1 %v4990_v60  ;;  %v2672_v52 = vmul.f32 %v2576_v48, %v6827_v50  ;;  %v5213_v24 = vpop.eup %5212  ;;  %v6889_v12 = vmul.f32 %v2572_v15, %v6802_v46  ;;  %v2579_v21 = vadd.f32 1.0, %v5211_v47  ;;  %v2303_v4 = vmul.f32 0.5, %v1932_v28  ;;  %v4999_v60 = vld [vmem:[#allocation10 + $0x1b0] ss:$8 sps:$4 sm:$0xff]  }
 0x431   : > { %v1982_v9 = vpop.f32.mrb[53].mxu0  ;;  %3630 = vmatprep.subr.bf16.mxu1 %v4995_v14  ;;  %v2314_v16 = vmul.f32 0.70710677, %v6877_v30  ;;  %v5215_v10 = vpop.eup %5214  ;;  %v6892_v43 = vmul.f32 0.5, %v2118_v45  ;;  %v2304_v50 = vmul.f32 0.5, %v1934_v42  ;;  %5226 = verf.f32 %v2313_v5 }
 0x432   : > { %v1984_v58 = vpop.f32.mrb[54].mxu0  ;;  %3582 = vmatmul.mubr.bf16.gmra.mrb[36].mxu1 %v2719_v25  ;;  %v2728_v26 = vpack.c.bf16 %v2672_v52, %v2664_v35  ;;  %v5217_v44 = vpop.eup %5216  ;;  %5228 = verf.f32 %v2403_v2  ;;  %v6894_v55 = vmul.f32 0.5, %v2120_v32  ;;  %v2404_v7 = vmul.f32 0.70710677, %v2120_v32  ;;  %v5001_v42 = vld [vmem:[#allocation10 + $0x1b4] ss:$8 sps:$4 sm:$0xff]  }
 0x433   : > { %v1986_v39 = vpop.f32.mrb[55].mxu0  ;;  %v2321_v46 = vmul.f32 0.70710677, %v6880_v6  ;;  %5230 = verf.f32 %v2314_v16  ;;  %v6899_v28 = vadd.f32 %v6850_v54, %v6530_v51  ;;  %v6902_v20 = vadd.f32 %v1980_v33, %v6505_v3  ;;  %v5004_v25 = vld [vmem:[#allocation10 + $0x1c4] ss:$8 sps:$4 sm:$0xff]  }
 0x434   : > { %3631 = vmatpush1.bf16.msra.mxu1 %v4993_v41  ;;  %3591 = vmatprep.mubr.bf16.mxu1 %v2728_v26  ;;  %v6905_v59 = vadd.f32 %v1982_v9, %v6530_v51  ;;  %v5219_v49 = vpop.eup %5218  ;;  %v6908_v45 = vmul.f32 %v2579_v21, %v6819_v61  ;;  %v2583_v29 = vadd.f32 1.0, %v5215_v10  ;;  %v6911_v14 = vadd.f32 %v1984_v58, %v6505_v3 }
 0x435   : > { %3632 = vmatprep.subr.bf16.mxu1 %v4998_v22  ;;  %5232 = verf.f32 %v2321_v46  ;;  %v5221_v63 = vpop.eup %5220  ;;  %v2580_v54 = vadd.f32 1.0, %v5213_v24  ;;  %v2584_v15 = vadd.f32 1.0, %v5217_v44  ;;  %v2322_v1 = vmul.f32 0.70710677, %v6899_v28 }
 0x436   : > { %v6915_v47 = vadd.f32 %v1986_v39, %v6530_v51  ;;  %v5223_v33 = vpop.eup %5222  ;;  %v2591_v2 = vadd.f32 1.0, %v5221_v63  ;;  %5234 = verf.f32 %v2404_v7  ;;  %v2329_v61 = vmul.f32 0.70710677, %v6902_v20 }
 0x437   : > { %v2330_v32 = vmul.f32 0.70710677, %v6905_v59  ;;  %v5225_v41 = vpop.eup %5224  ;;  %v2587_v9 = vadd.f32 1.0, %v5219_v49  ;;  %v6920_v35 = vmul.f32 0.5, %v6872_v34  ;;  %5236 = verf.f32 %v2322_v1 }
 0x438   : > { %v1990_v48 = vpop.f32.mrb[56].mxu0  ;;  %3633 = vmatpush1.bf16.msra.mxu1 %v4996_v19  ;;  %v2337_v52 = vmul.f32 0.70710677, %v6911_v14  ;;  %v2679_v22 = vmul.f32 %v2583_v29, %v6845_v62  ;;  %v2687_v58 = vmul.f32 %v2591_v2, %v2303_v4  ;;  %v2592_v24 = vadd.f32 1.0, %v5225_v41  ;;  %v5002_v62 = vld [vmem:[#allocation10 + $0x1c0] ss:$8 sps:$4 sm:$0xff]  }
 0x439   : > { %3634 = vmatprep.subr.bf16.mxu1 %v5001_v42  ;;  %v1992_v5 = vpop.f32.mrb[57].mxu0  ;;  %5238 = verf.f32 %v2329_v61  ;;  %v2680_v16 = vmul.f32 %v2584_v15, %v6864_v40  ;;  %v2588_v39 = vadd.f32 1.0, %v5223_v33  ;;  %v2338_v34 = vmul.f32 0.70710677, %v6915_v47  ;;  %v5010_v2 = vld [vmem:[#allocation10 + $0x1e4] ss:$8 sps:$4 sm:$0xff]  }
 0x43a   : > { %v1994_v21 = vpop.f32.mrb[58].mxu0  ;;  %3592 = vmatmul.mubr.bf16.gmra.mrb[40].mxu1 %v2727_v57  ;;  %5240 = verf.f32 %v2330_v32  ;;  %v2688_v26 = vmul.f32 %v2592_v24, %v2304_v50  ;;  %v2735_v19 = vpack.c.bf16 %v2687_v58, %v2679_v22  ;;  %v6930_v4 = vadd.f32 %v1990_v48, %v6505_v3 }
 0x43b   : > { %v1996_v10 = vpop.f32.mrb[59].mxu0  ;;  %5242 = verf.f32 %v2337_v52  ;;  %v5227_v44 = vpop.eup %5226  ;;  %v6933_v40 = vmul.f32 %v2580_v54, %v6834_v36  ;;  %v6936_v8 = vadd.f32 %v1992_v5, %v6530_v51  ;;  %v6939_v57 = vadd.f32 %v1994_v21, %v6505_v3 }
 0x43c   : > { %3635 = vmatpush1.bf16.msra.mxu1 %v4999_v60  ;;  %5244 = verf.f32 %v2338_v34  ;;  %v5229_v50 = vpop.eup %5228  ;;  %v2218_v7 = vmul.f32 0.5, %v6877_v30  ;;  %v2225_v46 = vmul.f32 0.5, %v6880_v6  ;;  %v2736_v42 = vpack.c.bf16 %v2688_v26, %v2680_v16  ;;  %v5005_v6 = vld [vmem:[#allocation10 + $0x1d0] ss:$8 sps:$4 sm:$0xff]  }
 0x43d   : > { %3636 = vmatprep.subr.bf16.mxu1 %v5004_v25  ;;  %v2345_v49 = vmul.f32 0.70710677, %v6930_v4  ;;  %v5231_v29 = vpop.eup %5230  ;;  %v6945_v36 = vmul.f32 %v2587_v9, %v6855_v17  ;;  %v6948_v60 = vmul.f32 %v2588_v39, %v6885_v23  ;;  %v2505_v63 = vadd.f32 1.0, %v5227_v44 }
 0x43e   : > { %v2346_v54 = vmul.f32 0.70710677, %v6936_v8  ;;  %3601 = vmatprep.mubr.bf16.mxu1 %v2736_v42  ;;  %v2226_v30 = vmul.f32 0.5, %v6899_v28  ;;  %v2353_v25 = vmul.f32 0.70710677, %v6939_v57  ;;  %v6954_v48 = vadd.f32 %v1996_v10, %v6530_v51 }
 0x43f   : > { %v5233_v1 = vpop.eup %5232  ;;  %5246 = verf.f32 %v2345_v49  ;;  %v6957_v23 = vmul.f32 0.5, %v6902_v20  ;;  %v2506_v41 = vadd.f32 1.0, %v5231_v29  ;;  %v6967_v20 = vmul.f32 %v2505_v63, %v6920_v35  ;;  %v5008_v10 = vld [vmem:[#allocation10 + $0x1e0] ss:$8 sps:$4 sm:$0xff]  }
 0x440   : > { %v2000_v15 = vpop.f32.mrb[60].mxu0  ;;  %3637 = vmatpush1.bf16.msra.mxu1 %v5002_v62  ;;  %v2513_v33 = vadd.f32 1.0, %v5233_v1  ;;  %5248 = verf.f32 %v2346_v54  ;;  %v5235_v32 = vpop.eup %5234  ;;  %v2354_v9 = vmul.f32 0.70710677, %v6954_v48  ;;  %v2234_v34 = vmul.f32 0.5, %v6905_v59 }
 0x441   : > { %v2002_v17 = vpop.f32.mrb[61].mxu0  ;;  %3638 = vmatprep.subr.bf16.mxu1 %v5007_v18  ;;  %v6960_v61 = vadd.f32 %v2000_v15, %v6505_v3  ;;  %5250 = verf.f32 %v2353_v25  ;;  %v5237_v22 = vpop.eup %5236  ;;  %v2595_v35 = vadd.f32 1.0, %v5229_v50  ;;  %v5013_v18 = vld [vmem:[#allocation10 + $0x1f4] ss:$8 sps:$4 sm:$0xff]   ;;  %v2602_v42 = vmul.f32 %v2506_v41, %v2218_v7  ;;  %v5011_v25 = vld [vmem:[#allocation10 + $0x1f0] ss:$8 sps:$4 sm:$0xff]  }
 0x442   : > { %v2004_v28 = vpop.f32.mrb[62].mxu0  ;;  %v6964_v52 = vadd.f32 %v2002_v17, %v6530_v51  ;;  %v6969_v58 = vmul.f32 %v2513_v33, %v2225_v46  ;;  %3602 = vmatmul.mubr.bf16.gmra.mrb[44].mxu1 %v2735_v19  ;;  %v2514_v39 = vadd.f32 1.0, %v5237_v22  ;;  %5252 = verf.f32 %v2354_v9 }
 0x443   : > { %v2006_v5 = vpop.f32.mrb[63].mxu0  ;;  %v2361_v24 = vmul.f32 0.70710677, %v6960_v61  ;;  %v6973_v21 = vadd.f32 %v2004_v28, %v6505_v3  ;;  %v5239_v16 = vpop.eup %5238  ;;  %v2241_v19 = vmul.f32 0.5, %v6911_v14  ;;  %v2242_v15 = vmul.f32 0.5, %v6915_v47 }
 0x444   : > { %3639 = vmatpush1.bf16.msra.mxu1 %v5005_v6  ;;  %v2362_v26 = vmul.f32 0.70710677, %v6964_v52  ;;  %v5241_v62 = vpop.eup %5240  ;;  %v2697_v44 = vpack.c.bf16 %v6969_v58, %v6967_v20  ;;  %v2610_v49 = vmul.f32 %v2514_v39, %v2226_v30  ;;  %v6983_v50 = vadd.f32 %v2006_v5, %v6530_v51 }
 0x445   : > { %3640 = vmatprep.subr.bf16.mxu1 %v5010_v2  ;;  %5254 = verf.f32 %v2361_v24  ;;  %v5243_v46 = vpop.eup %5242  ;;  %v2522_v29 = vadd.f32 1.0, %v5241_v62  ;;  %v2369_v59 = vmul.f32 0.70710677, %v6973_v21  ;;  %v2521_v6 = vadd.f32 1.0, %v5239_v16  ;;  %v5016_v2 = vld [vmem:[#allocation10 + $0x204] ss:$8 sps:$4 sm:$0xff]  }
 0x446   : > { %v5245_v63 = vpop.eup %5244  ;;  %v2529_v54 = vadd.f32 1.0, %v5243_v46  ;;  %5256 = verf.f32 %v2362_v26  ;;  %v2698_v17 = vpack.c.bf16 %v2610_v49, %v2602_v42  ;;  %v6986_v30 = vmul.f32 %v2595_v35, %v6892_v43  ;;  %v5014_v35 = vld [vmem:[#allocation10 + $0x200] ss:$8 sps:$4 sm:$0xff]  }
 0x447   : > { %v2530_v14 = vadd.f32 1.0, %v5245_v63  ;;  %5258 = verf.f32 %v2369_v59  ;;  %v2618_v33 = vmul.f32 %v2522_v29, %v2234_v34  ;;  %v2370_v47 = vmul.f32 0.70710677, %v6983_v50 }
 0x448   : > { %v2010_v1 = vpop.f32.mrb[64].mxu0  ;;  %3641 = vmatpush1.bf16.msra.mxu1 %v5008_v10  ;;  %v6992_v5 = vmul.f32 %v2529_v54, %v2241_v19  ;;  %3644 = vmatprep.mubr.bf16.mxu1 %v2698_v17  ;;  %v7000_v16 = vadd.f32 1.0, %v5235_v32  ;;  %v2249_v39 = vmul.f32 0.5, %v6930_v4  ;;  %v7005_v26 = vmul.f32 %v2521_v6, %v6957_v23  ;;  %v5022_v4 = vld [vmem:[#allocation10 + $0x214] ss:$8 sps:$4 sm:$0xff]  }
 0x449   : > { %v2012_v7 = vpop.f32.mrb[65].mxu0  ;;  %3642 = vmatprep.subr.bf16.mxu1 %v5013_v18  ;;  %v6990_v28 = vadd.f32 %v2010_v1, %v6505_v3  ;;  %v5247_v9 = vpop.eup %5246  ;;  %v2626_v22 = vmul.f32 %v2530_v14, %v2242_v15  ;;  %5260 = verf.f32 %v2370_v47  ;;  %v2250_v46 = vmul.f32 0.5, %v6936_v8  ;;  %v5020_v14 = vld [vmem:[#allocation10 + $0x210] ss:$8 sps:$4 sm:$0xff]   ;;  %v5028_v47 = vld [vmem:[#allocation10 + $0x224] ss:$8 sps:$4 sm:$0xff]  }
 0x44a   : > { %v2014_v41 = vpop.f32.mrb[66].mxu0  ;;  %v6995_v20 = vadd.f32 %v2012_v7, %v6530_v51  ;;  %v5249_v24 = vpop.eup %5248  ;;  %v2257_v32 = vmul.f32 0.5, %v6939_v57  ;;  %v2258_v29 = vmul.f32 0.5, %v6954_v48  ;;  %v2265_v23 = vmul.f32 0.5, %v6960_v61 }
 0x44b   : > { %v6998_v43 = vadd.f32 %v2014_v41, %v6505_v3  ;;  %v2016_v58 = vpop.f32.mrb[67].mxu0  ;;  %v2377_v34 = vmul.f32 0.70710677, %v6990_v28  ;;  %v5251_v10 = vpop.eup %5250  ;;  %v2538_v62 = vadd.f32 1.0, %v5249_v24  ;;  %v2706_v18 = vpack.c.bf16 %v2626_v22, %v2618_v33 }
 0x44c   : > { %3643 = vmatpush1.bf16.msra.mxu1 %v5011_v25  ;;  %v2378_v19 = vmul.f32 0.70710677, %v6995_v20  ;;  %v2545_v42 = vadd.f32 1.0, %v5251_v10  ;;  %v5253_v49 = vpop.eup %5252  ;;  %v2705_v63 = vpack.c.bf16 %v6992_v5, %v7005_v26  ;;  %v2537_v15 = vadd.f32 1.0, %v5247_v9  ;;  %v7810_v25 = vld [vmem:[#allocation48_spill] sm:$0xff] }
 0x44d   : > { %3705 = vmatprep.subr.bf16.mxu1 %v5016_v2  ;;  %5262 = verf.f32 %v2377_v34  ;;  %v2385_v59 = vmul.f32 0.70710677, %v6998_v43  ;;  %v2546_v1 = vadd.f32 1.0, %v5253_v49  ;;  %v7016_v8 = vadd.f32 %v2016_v58, %v6530_v51 }
 0x44e   : > { %5264 = verf.f32 %v2378_v19  ;;  %v2634_v6 = vmul.f32 %v2538_v62, %v2250_v46  ;;  %v2700_v17 = vpack.c.bf16 %v7810_v25, %v6597_v27  ;;  %v7023_v33 = vmul.f32 %v2545_v42, %v2257_v32 }
 0x44f   : > { %v5255_v54 = vpop.eup %5254  ;;  %3645 = vmatmul.mubr.bf16.vlgmr.msra.gmra.mrb[24].mxu1 %v2697_v44  ;;  %5266 = verf.f32 %v2385_v59  ;;  %v2642_v44 = vmul.f32 %v2546_v1, %v2258_v29  ;;  %v2386_v41 = vmul.f32 0.70710677, %v7016_v8  ;;  %v2266_v22 = vmul.f32 0.5, %v6964_v52 }
 0x450   : > { %v2020_v57 = vpop.f32.mrb[68].mxu0  ;;  %3706 = vmatpush1.bf16.msra.mxu1 %v5014_v35  ;;  %3654 = vmatprep.mubr.bf16.mxu1 %v2706_v18  ;;  %v5257_v7 = vpop.eup %5256  ;;  %v2553_v2 = vadd.f32 1.0, %v5255_v54  ;;  %v2273_v58 = vmul.f32 0.5, %v6973_v21  ;;  %v7032_v26 = vmul.f32 %v2537_v15, %v2249_v39  ;;  %v5026_v18 = vld [vmem:[#allocation10 + $0x220] ss:$8 sps:$4 sm:$0xff]   ;;  %v2274_v29 = vmul.f32 0.5, %v6983_v50 }
 0x451   : > { %v7019_v48 = vadd.f32 %v2020_v57, %v6505_v3  ;;  %v2022_v61 = vpop.f32.mrb[69].mxu0  ;;  %3707 = vmatprep.subr.bf16.mxu1 %v5022_v4  ;;  %v5259_v5 = vpop.eup %5258  ;;  %5268 = verf.f32 %v2386_v41  ;;  %v2714_v35 = vpack.c.bf16 %v2642_v44, %v2634_v6  ;;  %v2554_v19 = vadd.f32 1.0, %v5257_v7  ;;  %v5034_v39 = vld [vmem:[#allocation10 + $0x234] ss:$8 sps:$4 sm:$0xff]   ;;  %v7811_v57 = vld [vmem:[#allocation50_spill] sm:$0xff] }
 0x452   : > { %v2024_v9 = vpop.f32.mrb[70].mxu0  ;;  %v7030_v34 = vadd.f32 %v2022_v61, %v6530_v51  ;;  %v2561_v62 = vadd.f32 1.0, %v5259_v5  ;;  %v7038_v32 = vmul.f32 %v2553_v2, %v2265_v23  ;;  %v2713_v4 = vpack.c.bf16 %v7023_v33, %v7032_v26  ;;  %v5032_v61 = vld [vmem:[#allocation10 + $0x230] ss:$8 sps:$4 sm:$0xff]   ;;  %v7814_v33 = vld [vmem:[#allocation51_spill] sm:$0xff] }
 0x453   : > { %v2393_v24 = vmul.f32 0.70710677, %v7019_v48  ;;  %v2026_v10 = vpop.f32.mrb[71].mxu0  ;;  %v7036_v52 = vadd.f32 %v2024_v9, %v6505_v3  ;;  %v5261_v21 = vpop.eup %5260  ;;  %v7051_v23 = vmul.f32 %v7000_v16, %v6894_v55  ;;  %v7813_v7 = vld [vmem:[#allocation49_spill] sm:$0xff]  ;;  %v2716_v2 = vpack.c.bf16 %v6795_v38, %v6767_v53 }
 0x454   : > { %3708 = vmatpush1.bf16.msra.mxu1 %v5020_v14  ;;  %v2394_v46 = vmul.f32 0.70710677, %v7030_v34  ;;  %v7040_v42 = vmul.f32 %v2561_v62, %v2273_v58  ;;  %v7045_v49 = vadd.f32 %v2026_v10, %v6530_v51  ;;  %v2562_v59 = vadd.f32 1.0, %v5261_v21  ;;  %v7812_v51 = vld [vmem:[#allocation52_spill] sm:$0xff] }
 0x455   : > { %5270 = verf.f32 %v2393_v24  ;;  %3709 = vmatprep.subr.bf16.mxu1 %v5028_v47  ;;  %v2401_v3 = vmul.f32 0.70710677, %v7036_v52  ;;  %v2708_v6 = vpack.c.bf16 %v7812_v51, %v7811_v57  ;;  %v2650_v14 = vmul.f32 %v2554_v19, %v2266_v22  ;;  %v7815_v47 = vld [vmem:[#allocation53_spill] sm:$0xff] }
 0x456   : > { %5272 = verf.f32 %v2394_v46  ;;  %v2402_v15 = vmul.f32 0.70710677, %v7045_v49  ;;  %v2721_v1 = vpack.c.bf16 %v7040_v42, %v7038_v32  ;;  %v2658_v50 = vmul.f32 %v2562_v59, %v2274_v29  ;;  %v5046_v29 = vld [vmem:[#allocation10 + $0x254] ss:$8 sps:$4 sm:$0xff]  }
 0x457   : > { %v5263_v54 = vpop.eup %5262  ;;  %3655 = vmatmul.mubr.bf16.gmra.mrb[28].mxu1 %v2705_v63  ;;  %5274 = verf.f32 %v2401_v3  ;;  %v2707_v44 = vpack.c.bf16 %v7814_v33, %v7813_v7  ;;  %v5040_v63 = vld [vmem:[#allocation10 + $0x244] ss:$8 sps:$4 sm:$0xff]   ;;  %v2715_v41 = vpack.c.bf16 %v6775_v11, %v7815_v47  ;;  %v2281_v5 = vmul.f32 0.5, %v6990_v28 }
 0x458   : > { %3710 = vmatpush1.bf16.msra.mxu1 %v5026_v18  ;;  %3664 = vmatprep.mubr.bf16.mxu1 %v2714_v35  ;;  %v5265_v55 = vpop.eup %5264  ;;  %v2569_v16 = vadd.f32 1.0, %v5263_v54  ;;  %5276 = verf.f32 %v2402_v15  ;;  %v2722_v22 = vpack.c.bf16 %v2658_v50, %v2650_v14  ;;  %v2724_v58 = vpack.c.bf16 %v6837_v31, %v6813_v56  ;;  %v5038_v18 = vld [vmem:[#allocation10 + $0x240] ss:$8 sps:$4 sm:$0xff]  }
 0x459   : > { %3711 = vmatprep.subr.bf16.mxu1 %v5034_v39  ;;  %v5267_v9 = vpop.eup %5266  ;;  %v2723_v24 = vpack.c.bf16 %v6825_v13, %v6807_v37  ;;  %v2289_v10 = vmul.f32 0.5, %v6998_v43  ;;  %v2732_v62 = vpack.c.bf16 %v6933_v40, %v6889_v12  ;;  %v2731_v35 = vpack.c.bf16 %v6908_v45, %v6860_v0  ;;  %v5368_v37 = vld [vmem:[#allocation10 + $0x380] ss:$8 sps:$4 sm:$0xff]   ;;  %v5369_v13 = vld [vmem:[#allocation10 + $0x394] ss:$8 sps:$4 sm:$0xff]  }
 0x45a   : > { %v2577_v26 = vadd.f32 1.0, %v5267_v9  ;;  %v2570_v19 = vadd.f32 1.0, %v5265_v55  ;;  %v2740_v28 = vpack.c.bf16 %v7051_v23, %v6948_v60  ;;  %v7078_v39 = vmul.f32 %v2569_v16, %v2281_v5  ;;  %v5044_v16 = vld [vmem:[#allocation10 + $0x250] ss:$8 sps:$4 sm:$0xff]   ;;  %v7816_v9 = vld [vmem:[#allocation18_spill] sm:$0xff] }
 0x45b   : > { %v5269_v21 = vpop.eup %5268  ;;  %v2282_v3 = vmul.f32 0.5, %v6995_v20  ;;  %v2290_v54 = vmul.f32 0.5, %v7016_v8  ;;  %v1189_v5 = vsub.s32 6, %v7816_v9  ;;  %v1193_v20 = vsub.s32 7, %v7816_v9  ;;  %v5370_v12 = vld [vmem:[#allocation10 + $0x390] ss:$8 sps:$4 sm:$0xff]  }
 0x45c   : > { %3712 = vmatpush1.bf16.msra.mxu1 %v5032_v61  ;;  %v7080_v43 = vmul.f32 %v2577_v26, %v2289_v10  ;;  %v2578_v15 = vadd.f32 1.0, %v5269_v21  ;;  %v5052_v10 = vld [vmem:[#allocation10 + $0x264] ss:$8 sps:$4 sm:$0xff]   ;;  %v2297_v46 = vmul.f32 0.5, %v7019_v48  ;;  %v5058_v48 = vld [vmem:[#allocation10 + $0x274] ss:$8 sps:$4 sm:$0xff]  }
 0x45d   : > { %3713 = vmatprep.subr.bf16.mxu1 %v5040_v63  ;;  %v2666_v61 = vmul.f32 %v2570_v19, %v2282_v3  ;;  %v5371_v40 = vld [vmem:[#allocation10 + $0x3a4] ss:$8 sps:$4 sm:$0xff]   ;;  %v5373_v0 = vld [vmem:[#allocation10 + $0x3b4] ss:$8 sps:$4 sm:$0xff]   ;;  %v5374_v45 = vld [vmem:[#allocation10 + $0x3b0] ss:$8 sps:$4 sm:$0xff]  }
 0x45e   : > { %v2729_v14 = vpack.c.bf16 %v7080_v43, %v7078_v39  ;;  %v2674_v55 = vmul.f32 %v2578_v15, %v2290_v54  ;;  %v2305_v39 = vmul.f32 0.5, %v7036_v52  ;;  %v5375_v60 = vld [vmem:[#allocation10 + $0x3c4] ss:$8 sps:$4 sm:$0xff]   ;;  %v5376_v23 = vld [vmem:[#allocation10 + $0x3c0] ss:$8 sps:$4 sm:$0xff]  }
 0x45f   : > { %v5271_v59 = vpop.eup %5270  ;;  %3665 = vmatmul.mubr.bf16.gmra.mrb[32].mxu1 %v2713_v4 }
 0x460   : > { %v5273_v50 = vpop.eup %5272  ;;  %3714 = vmatpush1.bf16.msra.mxu1 %v5038_v18  ;;  %3674 = vmatprep.mubr.bf16.mxu1 %v2722_v22  ;;  %v2585_v63 = vadd.f32 1.0, %v5271_v59  ;;  %v2730_v21 = vpack.c.bf16 %v2674_v55, %v2666_v61  ;;  %v2298_v18 = vmul.f32 0.5, %v7030_v34  ;;  %v2306_v22 = vmul.f32 0.5, %v7045_v49  ;;  %v5050_v59 = vld [vmem:[#allocation10 + $0x260] ss:$8 sps:$4 sm:$0xff]  }
 0x461   : > { %3715 = vmatprep.subr.bf16.mxu1 %v5046_v29  ;;  %v5275_v26 = vpop.eup %5274  ;;  %v2586_v8 = vadd.f32 1.0, %v5273_v50  ;;  %v5350_v29 = vld [vmem:[%s7701_s5] sm:$0xff]  ;;  %v5056_v55 = vld [vmem:[#allocation10 + $0x270] ss:$8 sps:$4 sm:$0xff]  }
 0x462   : > { %v5277_v4 = vpop.eup %5276  ;;  %v2593_v19 = vadd.f32 1.0, %v5275_v26  ;;  %v7095_v3 = vrot.slane %v5350_v29, %v1189_v5  ;;  %v7097_v54 = vmul.f32 %v2585_v63, %v2297_v46  ;;  %v7099_v52 = vrot.slane %v5350_v29, %v1193_v20  ;;  %v5064_v5 = vld [vmem:[#allocation10 + $0x284] ss:$8 sps:$4 sm:$0xff]  }
 0x463   : > { %v2594_v43 = vadd.f32 1.0, %v5277_v4  ;;  %v2682_v50 = vmul.f32 %v2586_v8, %v2298_v18  ;;  %v5062_v8 = vld [vmem:[#allocation10 + $0x280] ss:$8 sps:$4 sm:$0xff]   ;;  %v5070_v4 = vld [vmem:[#allocation10 + $0x294] ss:$8 sps:$4 sm:$0xff]  }
 0x464   : > { %3716 = vmatpush1.bf16.msra.mxu1 %v5044_v16  ;;  %v2689_v15 = vmul.f32 %v2593_v19, %v2305_v39  ;;  %v5068_v18 = vld [vmem:[#allocation10 + $0x290] ss:$8 sps:$4 sm:$0xff]  }
 0x465   : > { %3717 = vmatprep.subr.bf16.mxu1 %v5052_v10  ;;  %v2690_v34 = vmul.f32 %v2594_v43, %v2306_v22 }
 0x466   : > { %v2737_v61 = vpack.c.bf16 %v2689_v15, %v7097_v54 }
 0x467   : > { %3675 = vmatmul.mubr.bf16.gmra.mrb[36].mxu1 %v2721_v1  ;;  %v2738_v9 = vpack.c.bf16 %v2690_v34, %v2682_v50 }
 0x468   : > { %v2156_v49 = vpop.f32.mrb[72].mxu0  ;;  %3718 = vmatpush1.bf16.msra.mxu1 %v5050_v59  ;;  %3684 = vmatprep.mubr.bf16.mxu1 %v2730_v21  ;;  %v5076_v59 = vld [vmem:[#allocation10 + $0x2a4] ss:$8 sps:$4 sm:$0xff]  }
 0x469   : > { %v2157_v46 = vadd.f32 %v2156_v49, %v7095_v3  ;;  %v2158_v16 = vpop.f32.mrb[73].mxu0  ;;  %3719 = vmatprep.subr.bf16.mxu1 %v5058_v48  ;;  %v5074_v49 = vld [vmem:[#allocation10 + $0x2a0] ss:$8 sps:$4 sm:$0xff]  }
 0x46a   : > { %v2159_v63 = vadd.f32 %v2158_v16, %v7099_v52  ;;  %v2160_v10 = vpop.f32.mrb[74].mxu0  ;;  %v5082_v16 = vld [vmem:[#allocation10 + $0x2b4] ss:$8 sps:$4 sm:$0xff]  }
 0x46b   : > { %v2317_v20 = vmul.f32 0.70710677, %v2157_v46  ;;  %v2161_v26 = vadd.f32 %v2160_v10, %v7095_v3  ;;  %v2162_v32 = vpop.f32.mrb[75].mxu0 }
 0x46c   : > { %v2318_v42 = vmul.f32 0.70710677, %v2159_v63  ;;  %v2163_v1 = vadd.f32 %v2162_v32, %v7099_v52  ;;  %3720 = vmatpush1.bf16.msra.mxu1 %v5056_v55 }
 0x46d   : > { %5278 = verf.f32 %v2317_v20  ;;  %v2325_v21 = vmul.f32 0.70710677, %v2161_v26  ;;  %3721 = vmatprep.subr.bf16.mxu1 %v5064_v5 }
 0x46e   : > { %5280 = verf.f32 %v2318_v42  ;;  %v2326_v39 = vmul.f32 0.70710677, %v2163_v1 }
 0x46f   : > { %5282 = verf.f32 %v2325_v21  ;;  %3685 = vmatmul.mubr.bf16.gmra.mrb[40].mxu1 %v2729_v14  ;;  %v5080_v21 = vld [vmem:[#allocation10 + $0x2b0] ss:$8 sps:$4 sm:$0xff]  }
 0x470   : > { %5284 = verf.f32 %v2326_v39  ;;  %v2166_v19 = vpop.f32.mrb[76].mxu0  ;;  %3722 = vmatpush1.bf16.msra.mxu1 %v5062_v8  ;;  %3694 = vmatprep.mubr.bf16.mxu1 %v2738_v9 }
 0x471   : > { %v7110_v22 = vadd.f32 %v2166_v19, %v7095_v3  ;;  %v2168_v43 = vpop.f32.mrb[77].mxu0  ;;  %3723 = vmatprep.subr.bf16.mxu1 %v5070_v4 }
 0x472   : > { %v7113_v29 = vadd.f32 %v2168_v43, %v7099_v52  ;;  %v2170_v54 = vpop.f32.mrb[78].mxu0  ;;  %v2229_v43 = vmul.f32 0.5, %v2161_v26 }
 0x473   : > { %v2333_v15 = vmul.f32 0.70710677, %v7110_v22  ;;  %v7117_v48 = vadd.f32 %v2170_v54, %v7095_v3  ;;  %v2172_v14 = vpop.f32.mrb[79].mxu0 }
 0x474   : > { %v2334_v50 = vmul.f32 0.70710677, %v7113_v29  ;;  %v7121_v34 = vadd.f32 %v2172_v14, %v7099_v52  ;;  %3724 = vmatpush1.bf16.msra.mxu1 %v5068_v18  ;;  %v2221_v18 = vmul.f32 0.5, %v2157_v46  ;;  %v2222_v14 = vmul.f32 0.5, %v2159_v63 }
 0x475   : > { %5286 = verf.f32 %v2333_v15  ;;  %v2341_v55 = vmul.f32 0.70710677, %v7117_v48  ;;  %3725 = vmatprep.subr.bf16.mxu1 %v5076_v59 }
 0x476   : > { %5288 = verf.f32 %v2334_v50  ;;  %v2342_v9 = vmul.f32 0.70710677, %v7121_v34  ;;  %v2230_v50 = vmul.f32 0.5, %v2163_v1  ;;  %v5094_v1 = vld [vmem:[#allocation10 + $0x2d4] ss:$8 sps:$4 sm:$0xff]  }
 0x477   : > { %v5279_v5 = vpop.eup %5278  ;;  %5290 = verf.f32 %v2341_v55  ;;  %3695 = vmatmul.mubr.bf16.gmra.mrb[44].mxu1 %v2737_v61  ;;  %v5088_v61 = vld [vmem:[#allocation10 + $0x2c4] ss:$8 sps:$4 sm:$0xff]  }
 0x478   : > { %v5281_v10 = vpop.eup %5280  ;;  %v2509_v20 = vadd.f32 1.0, %v5279_v5  ;;  %5292 = verf.f32 %v2342_v9  ;;  %v2176_v32 = vpop.f32.mrb[80].mxu0  ;;  %3726 = vmatpush1.bf16.msra.mxu1 %v5074_v49  ;;  %3737 = vmatprep.mubr.bf16.mxu1 %v2700_v17  ;;  %v5086_v5 = vld [vmem:[#allocation10 + $0x2c0] ss:$8 sps:$4 sm:$0xff]  }
 0x479   : > { %v5283_v42 = vpop.eup %5282  ;;  %v2510_v8 = vadd.f32 1.0, %v5281_v10  ;;  %v7129_v4 = vadd.f32 %v2176_v32, %v7095_v3  ;;  %v2178_v39 = vpop.f32.mrb[81].mxu0  ;;  %3727 = vmatprep.subr.bf16.mxu1 %v5082_v16 }
 0x47a   : > { %v5285_v19 = vpop.eup %5284  ;;  %v2517_v59 = vadd.f32 1.0, %v5283_v42  ;;  %v7132_v54 = vadd.f32 %v2178_v39, %v7099_v52  ;;  %v2180_v15 = vpop.f32.mrb[82].mxu0  ;;  %v2605_v17 = vmul.f32 %v2509_v20, %v2221_v18 }
 0x47b   : > { %v2518_v49 = vadd.f32 1.0, %v5285_v19  ;;  %v2349_v27 = vmul.f32 0.70710677, %v7129_v4  ;;  %v2182_v25 = vpop.f32.mrb[83].mxu0  ;;  %v7137_v46 = vadd.f32 %v2180_v15, %v7095_v3  ;;  %v2606_v26 = vmul.f32 %v2510_v8, %v2222_v14 }
 0x47c   : > { %v2613_v55 = vmul.f32 %v2517_v59, %v2229_v43  ;;  %v2350_v9 = vmul.f32 0.70710677, %v7132_v54  ;;  %3728 = vmatpush1.bf16.msra.mxu1 %v5080_v21  ;;  %v7140_v10 = vadd.f32 %v2182_v25, %v7099_v52  ;;  %v5092_v59 = vld [vmem:[#allocation10 + $0x2d0] ss:$8 sps:$4 sm:$0xff]   ;;  %v5100_v25 = vld [vmem:[#allocation10 + $0x2e4] ss:$8 sps:$4 sm:$0xff]  }
 0x47d   : > { %v2614_v16 = vmul.f32 %v2518_v49, %v2230_v50  ;;  %5294 = verf.f32 %v2349_v27  ;;  %3729 = vmatprep.subr.bf16.mxu1 %v5088_v61  ;;  %v2357_v20 = vmul.f32 0.70710677, %v7137_v46  ;;  %v2237_v50 = vmul.f32 0.5, %v7110_v22 }
 0x47e   : > { %v2701_v63 = vpack.c.bf16 %v2613_v55, %v2605_v17  ;;  %5296 = verf.f32 %v2350_v9  ;;  %v2358_v42 = vmul.f32 0.70710677, %v7140_v10  ;;  %v2245_v49 = vmul.f32 0.5, %v7117_v48 }
 0x47f   : > { %v5287_v32 = vpop.eup %5286  ;;  %v2702_v39 = vpack.c.bf16 %v2614_v16, %v2606_v26  ;;  %5298 = verf.f32 %v2357_v20  ;;  %v2238_v9 = vmul.f32 0.5, %v7113_v29  ;;  %v2246_v26 = vmul.f32 0.5, %v7121_v34  ;;  %v5106_v34 = vld [vmem:[#allocation10 + $0x2f4] ss:$8 sps:$4 sm:$0xff]  }
 0x480   : > { %v5289_v19 = vpop.eup %5288  ;;  %v2525_v18 = vadd.f32 1.0, %v5287_v32  ;;  %v2186_v8 = vpop.f32.mrb[84].mxu0  ;;  %3730 = vmatpush1.bf16.msra.mxu1 %v5086_v5  ;;  %5300 = verf.f32 %v2358_v42 }
 0x481   : > { %v5291_v21 = vpop.eup %5290  ;;  %v2526_v43 = vadd.f32 1.0, %v5289_v19  ;;  %v7145_v15 = vadd.f32 %v2186_v8, %v7095_v3  ;;  %v2188_v61 = vpop.f32.mrb[85].mxu0  ;;  %3830 = vmatprep.mubr.bf16.mxu0 %v2702_v39  ;;  %3731 = vmatprep.subr.bf16.mxu1 %v5094_v1  ;;  %v5098_v19 = vld [vmem:[#allocation10 + $0x2e0] ss:$8 sps:$4 sm:$0xff]  }
 0x482   : > { %v5293_v14 = vpop.eup %5292  ;;  %v2533_v27 = vadd.f32 1.0, %v5291_v21  ;;  %v7150_v17 = vadd.f32 %v2188_v61, %v7099_v52  ;;  %v2190_v55 = vpop.f32.mrb[86].mxu0  ;;  %3831 = vmatmul.mubr.bf16.vlgmr.msra.gmra.mrb[96].mxu0 %v2701_v63  ;;  %v2621_v32 = vmul.f32 %v2525_v18, %v2237_v50 }
 0x483   : > { %v2534_v16 = vadd.f32 1.0, %v5293_v14  ;;  %v2365_v5 = vmul.f32 0.70710677, %v7145_v15  ;;  %v2192_v20 = vpop.f32.mrb[87].mxu0  ;;  %v7157_v1 = vadd.f32 %v2190_v55, %v7095_v3  ;;  %v2622_v42 = vmul.f32 %v2526_v43, %v2238_v9 }
 0x484   : > { %v2629_v22 = vmul.f32 %v2533_v27, %v2245_v49  ;;  %v2366_v48 = vmul.f32 0.70710677, %v7150_v17  ;;  %3732 = vmatpush1.bf16.msra.mxu1 %v5092_v59  ;;  %v7160_v29 = vadd.f32 %v2192_v20, %v7099_v52  ;;  %v5104_v59 = vld [vmem:[#allocation10 + $0x2f0] ss:$8 sps:$4 sm:$0xff]   ;;  %v2253_v55 = vmul.f32 0.5, %v7129_v4 }
 0x485   : > { %v2630_v39 = vmul.f32 %v2534_v16, %v2246_v26  ;;  %5302 = verf.f32 %v2365_v5  ;;  %3733 = vmatprep.subr.bf16.mxu1 %v5100_v25  ;;  %v2373_v63 = vmul.f32 0.70710677, %v7157_v1  ;;  %v2254_v20 = vmul.f32 0.5, %v7132_v54 }
 0x486   : > { %5304 = verf.f32 %v2366_v48  ;;  %v2709_v18 = vpack.c.bf16 %v2629_v22, %v2621_v32  ;;  %v2374_v21 = vmul.f32 0.70710677, %v7160_v29  ;;  %v2261_v32 = vmul.f32 0.5, %v7137_v46 }
 0x487   : > { %v5295_v8 = vpop.eup %5294  ;;  %v2710_v61 = vpack.c.bf16 %v2630_v39, %v2622_v42  ;;  %5306 = verf.f32 %v2373_v63  ;;  %v2262_v39 = vmul.f32 0.5, %v7140_v10  ;;  %v2270_v51 = vmul.f32 0.5, %v7150_v17 }
 0x488   : > { %v5297_v14 = vpop.eup %5296  ;;  %v2196_v43 = vpop.f32.mrb[88].mxu0  ;;  %v2541_v50 = vadd.f32 1.0, %v5295_v8  ;;  %3734 = vmatpush1.bf16.msra.mxu1 %v5098_v19  ;;  %5308 = verf.f32 %v2374_v21  ;;  %v5351_v21 = vld [vmem:[#allocation10 + $0x304] ss:$8 sps:$4 sm:$0xff]  }
 0x489   : > { %v7165_v49 = vadd.f32 %v2196_v43, %v7095_v3  ;;  %v2198_v27 = vpop.f32.mrb[89].mxu0  ;;  %3840 = vmatprep.mubr.bf16.mxu0 %v2710_v61  ;;  %v5299_v25 = vpop.eup %5298  ;;  %v2542_v9 = vadd.f32 1.0, %v5297_v14  ;;  %3735 = vmatprep.subr.bf16.mxu1 %v5106_v34 }
 0x48a   : > { %v7169_v26 = vadd.f32 %v2198_v27, %v7099_v52  ;;  %v2200_v16 = vpop.f32.mrb[90].mxu0  ;;  %3841 = vmatmul.mubr.bf16.gmra.mrb[100].mxu0 %v2709_v18  ;;  %v5301_v5 = vpop.eup %5300  ;;  %v2549_v22 = vadd.f32 1.0, %v5299_v25  ;;  %v2637_v63 = vmul.f32 %v2541_v50, %v2253_v55  ;;  %v7817_v25 = vld [vmem:[#allocation47_spill] sm:$0xff]  ;;  %v7818_v50 = vld [vmem:[#allocation46_spill] sm:$0xff] }
 0x48b   : > { %v2381_v48 = vmul.f32 0.70710677, %v7165_v49  ;;  %v2202_v42 = vpop.f32.mrb[91].mxu0  ;;  %v2550_v19 = vadd.f32 1.0, %v5301_v5  ;;  %v7177_v34 = vadd.f32 %v2200_v16, %v7095_v3  ;;  %v2638_v46 = vmul.f32 %v2542_v9, %v2254_v20  ;;  %v5352_v9 = vld [vmem:[#allocation10 + $0x300] ss:$8 sps:$4 sm:$0xff]  }
 0x48c   : > { %v2382_v4 = vmul.f32 0.70710677, %v7169_v26  ;;  %v2645_v8 = vmul.f32 %v2549_v22, %v2261_v32  ;;  %3736 = vmatpush1.bf16.msra.mxu1 %v5104_v59  ;;  %v7180_v54 = vadd.f32 %v2202_v42, %v7099_v52  ;;  %v7819_v55 = vpack.c.bf16 %v7817_v25, %v7818_v50  ;;  %v5355_v25 = vld [vmem:[#allocation10 + $0x324] ss:$8 sps:$4 sm:$0xff]  }
 0x48d   : > { %5310 = verf.f32 %v2381_v48  ;;  %v2646_v18 = vmul.f32 %v2550_v19, %v2262_v39  ;;  %4649 = vmatprep.subr.bf16.mxu1 %v5351_v21  ;;  %v2389_v10 = vmul.f32 0.70710677, %v7177_v34  ;;  %v2269_v48 = vmul.f32 0.5, %v7145_v15  ;;  %v5353_v39 = vld [vmem:[#allocation10 + $0x314] ss:$8 sps:$4 sm:$0xff]  }
 0x48e   : > { %5312 = verf.f32 %v2382_v4  ;;  %v2390_v14 = vmul.f32 0.70710677, %v7180_v54  ;;  %v2717_v43 = vpack.c.bf16 %v2645_v8, %v2637_v63  ;;  %v2278_v15 = vmul.f32 0.5, %v7160_v29 }
 0x48f   : > { %v5303_v61 = vpop.eup %5302  ;;  %3738 = vmatmul.mubr.bf16.vlgmr.msra.gmra.mrb[24].mxu1 %v7819_v55  ;;  %5314 = verf.f32 %v2389_v10  ;;  %v2718_v16 = vpack.c.bf16 %v2646_v18, %v2638_v46  ;;  %v2285_v7 = vmul.f32 0.5, %v7165_v49  ;;  %v2293_v33 = vmul.f32 0.5, %v7177_v34 }
 0x490   : > { %v5305_v27 = vpop.eup %5304  ;;  %v2206_v59 = vpop.f32.mrb[92].mxu0  ;;  %v2557_v5 = vadd.f32 1.0, %v5303_v61  ;;  %3747 = vmatprep.mubr.bf16.mxu1 %v2708_v6  ;;  %4665 = vmatpush1.bf16.msra.mxu1 %v5352_v9  ;;  %5316 = verf.f32 %v2390_v14  ;;  %v2277_v6 = vmul.f32 0.5, %v7157_v1 }
 0x491   : > { %v7191_v20 = vadd.f32 %v2206_v59, %v7095_v3  ;;  %v2208_v32 = vpop.f32.mrb[93].mxu0  ;;  %v5307_v22 = vpop.eup %5306  ;;  %v2558_v42 = vadd.f32 1.0, %v5305_v27  ;;  %4650 = vmatprep.subr.bf16.mxu1 %v5353_v39  ;;  %3850 = vmatprep.mubr.bf16.mxu0 %v2718_v16  ;;  %v5354_v27 = vld [vmem:[#allocation10 + $0x310] ss:$8 sps:$4 sm:$0xff]   ;;  %v2294_v39 = vmul.f32 0.5, %v7180_v54 }
 0x492   : > { %v7195_v19 = vadd.f32 %v2208_v32, %v7099_v52  ;;  %v2210_v4 = vpop.f32.mrb[94].mxu0  ;;  %v5309_v57 = vpop.eup %5308  ;;  %v2565_v63 = vadd.f32 1.0, %v5307_v22  ;;  %3851 = vmatmul.mubr.bf16.gmra.mrb[104].mxu0 %v2717_v43  ;;  %v7203_v61 = vmul.f32 %v2557_v5, %v2269_v48  ;;  %v5356_v5 = vld [vmem:[#allocation10 + $0x320] ss:$8 sps:$4 sm:$0xff]   ;;  %v5357_v22 = vld [vmem:[#allocation10 + $0x334] ss:$8 sps:$4 sm:$0xff]  }
 0x493   : > { %v2397_v8 = vmul.f32 0.70710677, %v7191_v20  ;;  %v2212_v46 = vpop.f32.mrb[95].mxu0  ;;  %v2566_v18 = vadd.f32 1.0, %v5309_v57  ;;  %v2211_v10 = vadd.f32 %v2210_v4, %v7095_v3  ;;  %v7208_v1 = vmul.f32 %v2558_v42, %v2270_v51 }
 0x494   : > { %v2398_v21 = vmul.f32 0.70710677, %v7195_v19  ;;  %v7205_v14 = vmul.f32 %v2565_v63, %v2277_v6  ;;  %4666 = vmatpush1.bf16.msra.mxu1 %v5354_v27  ;;  %v2213_v17 = vadd.f32 %v2212_v46, %v7099_v52  ;;  %v2286_v42 = vmul.f32 0.5, %v7169_v26  ;;  %v5359_v6 = vld [vmem:[#allocation10 + $0x344] ss:$8 sps:$4 sm:$0xff]  }
 0x495   : > { %5318 = verf.f32 %v2397_v8  ;;  %v7210_v43 = vmul.f32 %v2566_v18, %v2278_v15  ;;  %4651 = vmatprep.subr.bf16.mxu1 %v5355_v25  ;;  %v2405_v29 = vmul.f32 0.70710677, %v2211_v10  ;;  %v5360_v8 = vld [vmem:[#allocation10 + $0x340] ss:$8 sps:$4 sm:$0xff]   ;;  %v5361_v18 = vld [vmem:[#allocation10 + $0x354] ss:$8 sps:$4 sm:$0xff]  }
 0x496   : > { %5320 = verf.f32 %v2398_v21  ;;  %v2725_v3 = vpack.c.bf16 %v7205_v14, %v7203_v61  ;;  %v2406_v55 = vmul.f32 0.70710677, %v2213_v17  ;;  %v2301_v27 = vmul.f32 0.5, %v7191_v20  ;;  %v7276_v61 = vld [vmem:[%s7702_s6] sm:$0x3f]  ;;  %v7821_v14 = vld [vmem:[#allocation45_spill] sm:$0xff] }
 0x497   : > { %v5311_v50 = vpop.eup %5310  ;;  %3748 = vmatmul.mubr.bf16.gmra.mrb[28].mxu1 %v2707_v44  ;;  %5322 = verf.f32 %v2405_v29  ;;  %v2726_v52 = vpack.c.bf16 %v7210_v43, %v7208_v1  ;;  %v2309_v25 = vmul.f32 0.5, %v2211_v10  ;;  %v2302_v47 = vmul.f32 0.5, %v7195_v19  ;;  %v5364_v19 = vld [vmem:[#allocation10 + $0x360] ss:$8 sps:$4 sm:$0xff]   ;;  %v5365_v10 = vld [vmem:[#allocation10 + $0x374] ss:$8 sps:$4 sm:$0xff]  }
 0x498   : > { %v5313_v59 = vpop.eup %5312  ;;  %v2573_v16 = vadd.f32 1.0, %v5311_v50  ;;  %3757 = vmatprep.mubr.bf16.mxu1 %v2716_v2  ;;  %4667 = vmatpush1.bf16.msra.mxu1 %v5356_v5  ;;  %5324 = verf.f32 %v2406_v55  ;;  %v5358_v2 = vld [vmem:[#allocation10 + $0x330] ss:$8 sps:$4 sm:$0xff]   ;;  %v5367_v5 = vld [vmem:[#allocation10 + $0x384] ss:$8 sps:$4 sm:$0xff]  }
 0x499   : > { %v5315_v9 = vpop.eup %5314  ;;  %v2574_v32 = vadd.f32 1.0, %v5313_v59  ;;  %4652 = vmatprep.subr.bf16.mxu1 %v5357_v22  ;;  %v5362_v59 = vld [vmem:[#allocation10 + $0x350] ss:$8 sps:$4 sm:$0xff]  }
 0x49a   : > { %v5317_v48 = vpop.eup %5316  ;;  %v2581_v44 = vadd.f32 1.0, %v5315_v9  ;;  %v7226_v53 = vmul.f32 %v2573_v16, %v2285_v7  ;;  %v5381_v9 = vld [vmem:[#allocation10 + $0x3f4] ss:$8 sps:$4 sm:$0xff]   ;;  %v5382_v1 = vld [vmem:[#allocation10 + $0x3f0] ss:$8 sps:$4 sm:$0xff]  }
 0x49b   : > { %v2582_v4 = vadd.f32 1.0, %v5317_v48  ;;  %v7230_v57 = vmul.f32 %v2574_v32, %v2286_v42  ;;  %v7285_v42 = vld [vmem:[%s7702_s6 + $0x8] sm:$0x3f] }
 0x49c   : > { %v7228_v38 = vmul.f32 %v2581_v44, %v2293_v33  ;;  %4668 = vmatpush1.bf16.msra.mxu1 %v5358_v2 }
 0x49d   : > { %v7232_v51 = vmul.f32 %v2582_v4, %v2294_v39  ;;  %4653 = vmatprep.subr.bf16.mxu1 %v5359_v6  ;;  %v7289_v39 = vrot.slane %v7285_v42, %v7821_v14 }
 0x49e   : > { %v2733_v34 = vpack.c.bf16 %v7228_v38, %v7226_v53 }
 0x49f   : > { %v5319_v49 = vpop.eup %5318  ;;  %3758 = vmatmul.mubr.bf16.gmra.mrb[32].mxu1 %v2715_v41  ;;  %v2734_v54 = vpack.c.bf16 %v7232_v51, %v7230_v57  ;;  %v2310_v41 = vmul.f32 0.5, %v2213_v17  ;;  %v5366_v17 = vld [vmem:[#allocation10 + $0x370] ss:$8 sps:$4 sm:$0xff]  }
 0x4a0   : > { %v5321_v26 = vpop.eup %5320  ;;  %v2589_v63 = vadd.f32 1.0, %v5319_v49  ;;  %3767 = vmatprep.mubr.bf16.mxu1 %v2724_v58  ;;  %4669 = vmatpush1.bf16.msra.mxu1 %v5360_v8  ;;  %v5363_v58 = vld [vmem:[#allocation10 + $0x364] ss:$8 sps:$4 sm:$0xff]   ;;  %v7822_v8 = vld [vmem:[#allocation20_spill] sm:$0xff] }
 0x4a1   : > { %v5323_v46 = vpop.eup %5322  ;;  %v2590_v15 = vadd.f32 1.0, %v5321_v26  ;;  %4654 = vmatprep.subr.bf16.mxu1 %v5361_v18 }
 0x4a2   : > { %v5325_v21 = vpop.eup %5324  ;;  %v2597_v11 = vadd.f32 1.0, %v5323_v46  ;;  %v2685_v50 = vmul.f32 %v2589_v63, %v2301_v27 }
 0x4a3   : > { %v2598_v29 = vadd.f32 1.0, %v5325_v21  ;;  %v2686_v56 = vmul.f32 %v2590_v15, %v2302_v47  ;;  %v7823_v21 = vld [vmem:[#allocation19_spill] sm:$0xff]  ;;  %v7824_v47 = vld [vmem:[#allocation22_spill] sm:$0xff] }
 0x4a4   : > { %v2693_v55 = vmul.f32 %v2597_v11, %v2309_v25  ;;  %4670 = vmatpush1.bf16.msra.mxu1 %v5362_v59 }
 0x4a5   : > { %v2694_v31 = vmul.f32 %v2598_v29, %v2310_v41  ;;  %4655 = vmatprep.subr.bf16.mxu1 %v5363_v58  ;;  %v7825_v29 = vld [vmem:[#allocation21_spill] sm:$0xff] }
 0x4a6   : > { %v2741_v16 = vpack.c.bf16 %v2693_v55, %v2685_v50 }
 0x4a7   : > { %3768 = vmatmul.mubr.bf16.gmra.mrb[36].mxu1 %v2723_v24  ;;  %v2742_v20 = vpack.c.bf16 %v2694_v31, %v2686_v56  ;;  %v7820_v24 = vpack.c.bf16 %v6986_v30, %v6945_v36  ;;  %v5379_v36 = vld [vmem:[#allocation10 + $0x3e4] ss:$8 sps:$4 sm:$0xff]   ;;  %v5380_v30 = vld [vmem:[#allocation10 + $0x3e0] ss:$8 sps:$4 sm:$0xff]  }
 0x4a8   : > { %3777 = vmatprep.mubr.bf16.mxu1 %v2732_v62  ;;  %4671 = vmatpush1.bf16.msra.mxu1 %v5364_v19  ;;  %v5372_v62 = vld [vmem:[#allocation10 + $0x3a0] ss:$8 sps:$4 sm:$0xff]  }
 0x4a9   : > { %4656 = vmatprep.subr.bf16.mxu1 %v5365_v10 }
 0x4ac   : > { %4672 = vmatpush1.bf16.msra.mxu1 %v5366_v17 }
 0x4ad   : > { %4657 = vmatprep.subr.bf16.mxu1 %v5367_v5 }
 0x4af   : > { %3778 = vmatmul.mubr.bf16.gmra.mrb[40].mxu1 %v2731_v35  ;;  %v5377_v35 = vld [vmem:[#allocation10 + $0x3d4] ss:$8 sps:$4 sm:$0xff]  }
 0x4b0   : > { %3787 = vmatprep.mubr.bf16.mxu1 %v2740_v28  ;;  %4673 = vmatpush1.bf16.msra.mxu1 %v5368_v37  ;;  %v5378_v28 = vld [vmem:[#allocation10 + $0x3d0] ss:$8 sps:$4 sm:$0xff]  }
 0x4b1   : > { %4658 = vmatprep.subr.bf16.mxu1 %v5369_v13  ;;  %v7826_v13 = vld [vmem:[#allocation25_spill] sm:$0xff] }
 0x4b4   : > { %4674 = vmatpush1.bf16.msra.mxu1 %v5370_v12 }
 0x4b5   : > { %4659 = vmatprep.subr.bf16.mxu1 %v5371_v40 }
 0x4b7   : > { %3788 = vmatmul.mubr.bf16.gmra.mrb[44].mxu1 %v7820_v24  ;;  %v7827_v24 = vld [vmem:[#allocation23_spill] sm:$0xff] }
 0x4b8   : > { %4675 = vmatpush1.bf16.msra.mxu1 %v5372_v62  ;;  %3860 = vmatprep.mubr.bf16.mxu1 %v2726_v52 }
 0x4b9   : > { %4660 = vmatprep.subr.bf16.mxu1 %v5373_v0 }
 0x4bc   : > { %4676 = vmatpush1.bf16.msra.mxu1 %v5374_v45  ;;  %v7828_v45 = vld [vmem:[#allocation26_spill] sm:$0xff] }
 0x4bd   : > { %4661 = vmatprep.subr.bf16.mxu1 %v5375_v60 }
 0x4c0   : > { %4677 = vmatpush1.bf16.msra.mxu1 %v5376_v23  ;;  %v7829_v23 = vld [vmem:[#allocation24_spill] sm:$0xff] }
 0x4c1   : > { %4662 = vmatprep.subr.bf16.mxu1 %v5377_v35 }
 0x4c4   : > { %4678 = vmatpush1.bf16.msra.mxu1 %v5378_v28 }
 0x4c5   : > { %4663 = vmatprep.subr.bf16.mxu1 %v5379_v36 }
 0x4c8   : > { %4679 = vmatpush1.bf16.msra.mxu1 %v5380_v30 }
 0x4c9   : > { %4664 = vmatprep.subr.bf16.mxu1 %v5381_v9 }
 0x4cc   : > { %4680 = vmatpush1.bf16.msra.mxu1 %v5382_v1 }
 0x4cf   : > { %3861 = vmatmul.mubr.bf16.vlgmr.msra.gmra.mrb[36].mxu1 %v2725_v3  ;;  %v7280_v3 = vrot.slane %v7276_v61, %v7821_v14  ;;  %v7830_v14 = vld [vmem:[#allocation30_spill] sm:$0xff] }
 0x4d0   : > { %3870 = vmatprep.mubr.bf16.mxu1 %v2734_v54 }
 0x4d7   : > { %3871 = vmatmul.mubr.bf16.gmra.mrb[40].mxu1 %v2733_v34 }
 0x4d8   : > { %3880 = vmatprep.mubr.bf16.mxu1 %v2742_v20 }
 0x4df   : > { %3881 = vmatmul.mubr.bf16.gmra.mrb[44].mxu1 %v2741_v16 }
 0x555   : > { %v3832_v43 = vpop.f32.mrb[96].mxu0 }
 0x556   : > { %v3834_v52 = vpop.f32.mrb[97].mxu0 }
 0x557   : > { %v3836_v32 = vpop.f32.mrb[98].mxu0 }
 0x558   : > { %v3838_v22 = vpop.f32.mrb[99].mxu0 }
 0x55d   : > { %v3842_v48 = vpop.f32.mrb[100].mxu0 }
 0x55e   : > { %v3844_v7 = vpop.f32.mrb[101].mxu0 }
 0x55f   : > { %v3846_v33 = vpop.f32.mrb[102].mxu0 }
 0x560   : > { %v3848_v44 = vpop.f32.mrb[103].mxu0 }
 0x562   : > { %v3739_v4 = vpop.f32.mrb[24].mxu1 }
 0x563   : > { %v4681_v53 = vadd.f32 %v3739_v4, %v7280_v3  ;;  %v3741_v38 = vpop.f32.mrb[25].mxu1 }
 0x564   : > { %v4683_v2 = vadd.f32 %v3741_v38, %v7289_v39  ;;  %v3743_v57 = vpop.f32.mrb[26].mxu1 }
 0x565   : > { %v4682_v51 = vadd.f32 %v4681_v53, %v3832_v43  ;;  %v4685_v6 = vadd.f32 %v3743_v57, %v7280_v3  ;;  %v3745_v49 = vpop.f32.mrb[27].mxu1  ;;  %v3852_v34 = vpop.f32.mrb[104].mxu0  ;;  %v7831_v53 = vld [vmem:[#allocation27_spill] sm:$0xff]  ;;  %v7832_v57 = vld [vmem:[#allocation29_spill] sm:$0xff] }
 0x566   : > { %v4684_v26 = vadd.f32 %v4683_v2, %v3834_v52  ;;  %v4687_v54 = vadd.f32 %v3745_v49, %v7289_v39  ;;  %v3854_v63 = vpop.f32.mrb[105].mxu0 }
 0x567   : > { %v7296_v46 = vadd.f32 %v4682_v51, %v7822_v8  ;;  %v4686_v15 = vadd.f32 %v4685_v6, %v3836_v32  ;;  %v3856_v18 = vpop.f32.mrb[106].mxu0  ;;  %v7833_v6 = vld [vmem:[#allocation28_spill] sm:$0xff] }
 0x568   : > { %v7299_v27 = vadd.f32 %v4684_v26, %v7823_v21  ;;  %v4688_v25 = vadd.f32 %v4687_v54, %v3838_v22  ;;  %v3858_v11 = vpop.f32.mrb[107].mxu0  ;;  %v7834_v21 = vld [vmem:[#allocation34_spill] sm:$0xff] }
 0x569   : > { %v7302_v41 = vadd.f32 %v4686_v15, %v7824_v47 }
 0x56a   : > { %v7305_v50 = vadd.f32 %v4688_v25, %v7825_v29  ;;  %v3749_v55 = vpop.f32.mrb[28].mxu1  ;;  %v3915_v59 = vadd.f32 %v7299_v27, %v7296_v46  ;;  %v7835_v29 = vld [vmem:[#allocation31_spill] sm:$0xff] }
 0x56b   : > { %v4689_v56 = vadd.f32 %v3749_v55, %v7280_v3  ;;  %v3751_v31 = vpop.f32.mrb[29].mxu1 }
 0x56c   : > { %v4691_v58 = vadd.f32 %v3751_v31, %v7289_v39  ;;  %3916 = vadd.xlane.f32.xlu0 %v3915_v59  ;;  %v3753_v16 = vpop.f32.mrb[30].mxu1  ;;  %v3918_v20 = vadd.f32 %v7305_v50, %v7302_v41 }
 0x56d   : > { %v4690_v19 = vadd.f32 %v4689_v56, %v3842_v48  ;;  %v4693_v10 = vadd.f32 %v3753_v16, %v7280_v3  ;;  %v3755_v17 = vpop.f32.mrb[31].mxu1  ;;  %v7836_v56 = vld [vmem:[#allocation33_spill] sm:$0xff] }
 0x56e   : > { %v4692_v5 = vadd.f32 %v4691_v58, %v3844_v7  ;;  %v4695_v37 = vadd.f32 %v3755_v17, %v7289_v39  ;;  %3919 = vadd.xlane.f32.xlu1 %v3918_v20  ;;  %v7837_v58 = vld [vmem:[#allocation32_spill] sm:$0xff] }
 0x56f   : > { %v7316_v12 = vadd.f32 %v4690_v19, %v7826_v13  ;;  %v4694_v40 = vadd.f32 %v4693_v10, %v3846_v33 }
 0x570   : > { %v7319_v62 = vadd.f32 %v4692_v5, %v7827_v24  ;;  %v4696_v0 = vadd.f32 %v4695_v37, %v3848_v44 }
 0x571   : > { %v7322_v60 = vadd.f32 %v4694_v40, %v7828_v45  ;;  %v7838_v40 = vld [vmem:[#allocation38_spill] sm:$0xff] }
 0x572   : > { %v7325_v35 = vadd.f32 %v4696_v0, %v7829_v23  ;;  %v3759_v28 = vpop.f32.mrb[32].mxu1  ;;  %v3921_v36 = vadd.f32 %v7319_v62, %v7316_v12  ;;  %v7839_v23 = vld [vmem:[#allocation35_spill] sm:$0xff] }
 0x573   : > { %v4697_v30 = vadd.f32 %v3759_v28, %v7280_v3  ;;  %v3761_v9 = vpop.f32.mrb[33].mxu1 }
 0x574   : > { %v4699_v1 = vadd.f32 %v3761_v9, %v7289_v39  ;;  %3922 = vadd.xlane.f32.xlu0 %v3921_v36  ;;  %v3763_v43 = vpop.f32.mrb[34].mxu1  ;;  %v3924_v52 = vadd.f32 %v7325_v35, %v7322_v60 }
 0x575   : > { %v4698_v32 = vadd.f32 %v4697_v30, %v3852_v34  ;;  %v4701_v22 = vadd.f32 %v3763_v43, %v7280_v3  ;;  %v3765_v48 = vpop.f32.mrb[35].mxu1  ;;  %v7840_v30 = vld [vmem:[#allocation37_spill] sm:$0xff] }
 0x576   : > { %v4700_v7 = vadd.f32 %v4699_v1, %v3854_v63  ;;  %v4703_v33 = vadd.f32 %v3765_v48, %v7289_v39  ;;  %3925 = vadd.xlane.f32.xlu1 %v3924_v52  ;;  %v7841_v1 = vld [vmem:[#allocation36_spill] sm:$0xff] }
 0x577   : > { %v7336_v44 = vadd.f32 %v4698_v32, %v7830_v14  ;;  %v4702_v4 = vadd.f32 %v4701_v22, %v3856_v18 }
 0x578   : > { %v7339_v38 = vadd.f32 %v4700_v7, %v7831_v53  ;;  %v4704_v2 = vadd.f32 %v4703_v33, %v3858_v11 }
 0x579   : > { %v7342_v51 = vadd.f32 %v4702_v4, %v7832_v57  ;;  %v7842_v4 = vld [vmem:[#allocation42_spill] sm:$0xff] }
 0x57a   : > { %v7345_v49 = vadd.f32 %v4704_v2, %v7833_v6  ;;  %v3927_v34 = vadd.f32 %v7339_v38, %v7336_v44  ;;  %v7843_v6 = vld [vmem:[#allocation39_spill] sm:$0xff] }
 0x57c   : > { %3928 = vadd.xlane.f32.xlu0 %v3927_v34  ;;  %v3930_v26 = vadd.f32 %v7345_v49, %v7342_v51 }
 0x57e   : > { %3931 = vadd.xlane.f32.xlu1 %v3930_v26 }
 0x5a2   : > { %v3862_v54 = vpop.f32.mrb[36].mxu1 }
 0x5a3   : > { %v4705_v63 = vadd.f32 %v3862_v54, %v7280_v3  ;;  %v3864_v8 = vpop.f32.mrb[37].mxu1  ;;  %v7844_v54 = vld [vmem:[#allocation41_spill] sm:$0xff] }
 0x5a4   : > { %v4706_v15 = vadd.f32 %v3864_v8, %v7289_v39  ;;  %v3866_v18 = vpop.f32.mrb[38].mxu1  ;;  %v7845_v8 = vld [vmem:[#allocation40_spill] sm:$0xff] }
 0x5a5   : > { %v7354_v25 = vadd.f32 %v4705_v63, %v7834_v21  ;;  %v4707_v11 = vadd.f32 %v3866_v18, %v7280_v3  ;;  %v3868_v47 = vpop.f32.mrb[39].mxu1 }
 0x5a6   : > { %v7358_v55 = vadd.f32 %v4706_v15, %v7835_v29  ;;  %v4708_v59 = vadd.f32 %v3868_v47, %v7289_v39 }
 0x5a7   : > { %v7362_v31 = vadd.f32 %v4707_v11, %v7836_v56 }
 0x5a8   : > { %v7365_v16 = vadd.f32 %v4708_v59, %v7837_v58  ;;  %v3933_v20 = vadd.f32 %v7358_v55, %v7354_v25 }
 0x5aa   : > { %v3872_v19 = vpop.f32.mrb[40].mxu1  ;;  %3934 = vadd.xlane.f32.xlu0 %v3933_v20  ;;  %v3936_v10 = vadd.f32 %v7365_v16, %v7362_v31 }
 0x5ab   : > { %v4709_v17 = vadd.f32 %v3872_v19, %v7280_v3  ;;  %v3874_v5 = vpop.f32.mrb[41].mxu1 }
 0x5ac   : > { %v4710_v37 = vadd.f32 %v3874_v5, %v7289_v39  ;;  %v3876_v13 = vpop.f32.mrb[42].mxu1  ;;  %3937 = vadd.xlane.f32.xlu1 %v3936_v10 }
 0x5ad   : > { %v7374_v24 = vadd.f32 %v4709_v17, %v7838_v40  ;;  %v4711_v0 = vadd.f32 %v3876_v13, %v7280_v3  ;;  %v3878_v45 = vpop.f32.mrb[43].mxu1 }
 0x5ae   : > { %v7378_v28 = vadd.f32 %v4710_v37, %v7839_v23  ;;  %v4712_v36 = vadd.f32 %v3878_v45, %v7289_v39 }
 0x5af   : > { %v7382_v9 = vadd.f32 %v4711_v0, %v7840_v30 }
 0x5b0   : > { %v7385_v43 = vadd.f32 %v4712_v36, %v7841_v1  ;;  %v3939_v52 = vadd.f32 %v7378_v28, %v7374_v24 }
 0x5b2   : > { %v3882_v32 = vpop.f32.mrb[44].mxu1  ;;  %3940 = vadd.xlane.f32.xlu0 %v3939_v52  ;;  %v3942_v22 = vadd.f32 %v7385_v43, %v7382_v9 }
 0x5b3   : > { %v4713_v48 = vadd.f32 %v3882_v32, %v7280_v3  ;;  %v3884_v7 = vpop.f32.mrb[45].mxu1 }
 0x5b4   : > { %v4714_v33 = vadd.f32 %v3884_v7, %v7289_v39  ;;  %v3886_v14 = vpop.f32.mrb[46].mxu1  ;;  %3943 = vadd.xlane.f32.xlu1 %v3942_v22 }
 0x5b5   : > { %v7394_v53 = vadd.f32 %v4713_v48, %v7842_v4  ;;  %v4715_v2 = vadd.f32 %v3886_v14, %v7280_v3  ;;  %v3888_v57 = vpop.f32.mrb[47].mxu1 }
 0x5b6   : > { %v7398_v34 = vadd.f32 %v4714_v33, %v7843_v6  ;;  %v4716_v26 = vadd.f32 %v3888_v57, %v7289_v39 }
 0x5b7   : > { %v7402_v63 = vadd.f32 %v4715_v2, %v7844_v54 }
 0x5b8   : > { %v7405_v15 = vadd.f32 %v4716_v26, %v7845_v8  ;;  %v3945_v18 = vadd.f32 %v7398_v34, %v7394_v53 }
 0x5ba   : > { %3946 = vadd.xlane.f32.xlu0 %v3945_v18  ;;  %v3948_v21 = vadd.f32 %v7405_v15, %v7402_v63 }
 0x5bc   : > { %3949 = vadd.xlane.f32.xlu1 %v3948_v21 }
 0x5f9   : > { %v3917_v3 = vpop.xlane.xlu0 %3916 }
 0x5fa   : > { %v3951_v11 = vmul.f32 0.00390625, %v3917_v3 }
 0x5fb   : > { %v3920_v47 = vpop.xlane.xlu1 %3919 }
 0x5fc   : > { %v7412_v29 = vsub.f32 %v7296_v46, %v3951_v11  ;;  %v7415_v39 = vsub.f32 %v7299_v27, %v3951_v11  ;;  %v3952_v59 = vmul.f32 0.00390625, %v3920_v47 }
 0x5fe   : > { %v7418_v56 = vsub.f32 %v7302_v41, %v3952_v59  ;;  %v7421_v58 = vsub.f32 %v7305_v50, %v3952_v59  ;;  %v3987_v20 = vmul.f32 %v7412_v29, %v7412_v29  ;;  %v3988_v19 = vmul.f32 %v7415_v39, %v7415_v39 }
 0x600   : > { %v4011_v10 = vadd.f32 %v3988_v19, %v3987_v20  ;;  %v3989_v46 = vmul.f32 %v7418_v56, %v7418_v56  ;;  %v3990_v27 = vmul.f32 %v7421_v58, %v7421_v58 }
 0x601   : > { %v3923_v17 = vpop.xlane.xlu0 %3922 }
 0x602   : > { %v3953_v5 = vmul.f32 0.00390625, %v3923_v17  ;;  %4012 = vadd.xlane.f32.xlu0 %v4011_v10  ;;  %v4014_v41 = vadd.f32 %v3990_v27, %v3989_v46 }
 0x603   : > { %v3926_v37 = vpop.xlane.xlu1 %3925 }
 0x604   : > { %v7432_v50 = vsub.f32 %v7316_v12, %v3953_v5  ;;  %v7435_v13 = vsub.f32 %v7319_v62, %v3953_v5  ;;  %v3954_v40 = vmul.f32 0.00390625, %v3926_v37  ;;  %4015 = vadd.xlane.f32.xlu1 %v4014_v41 }
 0x606   : > { %v7438_v0 = vsub.f32 %v7322_v60, %v3954_v40  ;;  %v7441_v45 = vsub.f32 %v7325_v35, %v3954_v40  ;;  %v3991_v23 = vmul.f32 %v7432_v50, %v7432_v50  ;;  %v3992_v36 = vmul.f32 %v7435_v13, %v7435_v13 }
 0x608   : > { %v4017_v30 = vadd.f32 %v3992_v36, %v3991_v23  ;;  %v3993_v12 = vmul.f32 %v7438_v0, %v7438_v0  ;;  %v3994_v62 = vmul.f32 %v7441_v45, %v7441_v45 }
 0x609   : > { %v3929_v1 = vpop.xlane.xlu0 %3928 }
 0x60a   : > { %v3955_v52 = vmul.f32 0.00390625, %v3929_v1  ;;  %4018 = vadd.xlane.f32.xlu0 %v4017_v30  ;;  %v4020_v60 = vadd.f32 %v3994_v62, %v3993_v12 }
 0x60b   : > { %v3932_v32 = vpop.xlane.xlu1 %3931 }
 0x60c   : > { %v7452_v35 = vsub.f32 %v7336_v44, %v3955_v52  ;;  %v7455_v22 = vsub.f32 %v7339_v38, %v3955_v52  ;;  %v3956_v48 = vmul.f32 0.00390625, %v3932_v32  ;;  %4021 = vadd.xlane.f32.xlu1 %v4020_v60 }
 0x60e   : > { %v7458_v7 = vsub.f32 %v7342_v51, %v3956_v48  ;;  %v7461_v33 = vsub.f32 %v7345_v49, %v3956_v48  ;;  %v3995_v14 = vmul.f32 %v7452_v35, %v7452_v35  ;;  %v3996_v4 = vmul.f32 %v7455_v22, %v7455_v22 }
 0x610   : > { %v4023_v2 = vadd.f32 %v3996_v4, %v3995_v14  ;;  %v3997_v44 = vmul.f32 %v7458_v7, %v7458_v7  ;;  %v3998_v38 = vmul.f32 %v7461_v33, %v7461_v33 }
 0x612   : > { %4024 = vadd.xlane.f32.xlu0 %v4023_v2  ;;  %v4026_v57 = vadd.f32 %v3998_v38, %v3997_v44 }
 0x614   : > { %4027 = vadd.xlane.f32.xlu1 %v4026_v57 }
 0x637   : > { %v3935_v51 = vpop.xlane.xlu0 %3934 }
 0x638   : > { %v3957_v6 = vmul.f32 0.00390625, %v3935_v51 }
 0x639   : > { %v3938_v49 = vpop.xlane.xlu1 %3937 }
 0x63a   : > { %v7472_v26 = vsub.f32 %v7354_v25, %v3957_v6  ;;  %v7475_v54 = vsub.f32 %v7358_v55, %v3957_v6  ;;  %v3958_v8 = vmul.f32 0.00390625, %v3938_v49 }
 0x63c   : > { %v7478_v18 = vsub.f32 %v7362_v31, %v3958_v8  ;;  %v7481_v21 = vsub.f32 %v7365_v16, %v3958_v8  ;;  %v3999_v3 = vmul.f32 %v7472_v26, %v7472_v26  ;;  %v4000_v11 = vmul.f32 %v7475_v54, %v7475_v54 }
 0x63e   : > { %v4029_v47 = vadd.f32 %v4000_v11, %v3999_v3  ;;  %v4001_v25 = vmul.f32 %v7478_v18, %v7478_v18  ;;  %v4002_v55 = vmul.f32 %v7481_v21, %v7481_v21  ;;  %v7846_v3 = vld [vmem:[#allocation43_spill] sm:$0xff] }
 0x63f   : > { %v3941_v59 = vpop.xlane.xlu0 %3940  ;;  %v7533_v11 = vrot.slane %v7276_v61, %v7846_v3 }
 0x640   : > { %v3959_v20 = vmul.f32 0.00390625, %v3941_v59  ;;  %4030 = vadd.xlane.f32.xlu0 %v4029_v47  ;;  %v4032_v31 = vadd.f32 %v4002_v55, %v4001_v25  ;;  %v7537_v47 = vrot.slane %v7285_v42, %v7846_v3  ;;  %v7847_v55 = vld [vmem:[#allocation44_spill] sm:$0xff] }
 0x641   : > { %v3944_v19 = vpop.xlane.xlu1 %3943  ;;  %v7541_v59 = vrot.slane %v7276_v61, %v7847_v55 }
 0x642   : > { %v7492_v16 = vsub.f32 %v7374_v24, %v3959_v20  ;;  %v7495_v10 = vsub.f32 %v7378_v28, %v3959_v20  ;;  %v3960_v46 = vmul.f32 0.00390625, %v3944_v19  ;;  %4033 = vadd.xlane.f32.xlu1 %v4032_v31  ;;  %v7545_v20 = vrot.slane %v7285_v42, %v7847_v55 }
 0x644   : > { %v7498_v27 = vsub.f32 %v7382_v9, %v3960_v46  ;;  %v7501_v17 = vsub.f32 %v7385_v43, %v3960_v46  ;;  %v4003_v5 = vmul.f32 %v7492_v16, %v7492_v16  ;;  %v4004_v41 = vmul.f32 %v7495_v10, %v7495_v10 }
 0x646   : > { %v4035_v37 = vadd.f32 %v4004_v41, %v4003_v5  ;;  %v4005_v24 = vmul.f32 %v7498_v27, %v7498_v27  ;;  %v4006_v28 = vmul.f32 %v7501_v17, %v7501_v17 }
 0x647   : > { %v3947_v40 = vpop.xlane.xlu0 %3946 }
 0x648   : > { %v3961_v23 = vmul.f32 0.00390625, %v3947_v40  ;;  %4036 = vadd.xlane.f32.xlu0 %v4035_v37  ;;  %v4038_v9 = vadd.f32 %v4006_v28, %v4005_v24 }
 0x649   : > { %v3950_v36 = vpop.xlane.xlu1 %3949 }
 0x64a   : > { %v7512_v43 = vsub.f32 %v7394_v53, %v3961_v23  ;;  %v7515_v30 = vsub.f32 %v7398_v34, %v3961_v23  ;;  %v3962_v12 = vmul.f32 0.00390625, %v3950_v36  ;;  %4039 = vadd.xlane.f32.xlu1 %v4038_v9 }
 0x64c   : > { %v7518_v62 = vsub.f32 %v7402_v63, %v3962_v12  ;;  %v7521_v1 = vsub.f32 %v7405_v15, %v3962_v12  ;;  %v4007_v52 = vmul.f32 %v7512_v43, %v7512_v43  ;;  %v4008_v60 = vmul.f32 %v7515_v30, %v7515_v30 }
 0x64e   : > { %v4041_v32 = vadd.f32 %v4008_v60, %v4007_v52  ;;  %v4009_v53 = vmul.f32 %v7518_v62, %v7518_v62  ;;  %v4010_v34 = vmul.f32 %v7521_v1, %v7521_v1 }
 0x650   : > { %4042 = vadd.xlane.f32.xlu0 %v4041_v32  ;;  %v4044_v48 = vadd.f32 %v4010_v34, %v4009_v53 }
 0x652   : > { %4045 = vadd.xlane.f32.xlu1 %v4044_v48 }
 0x68f   : > { %v4013_v63 = vpop.xlane.xlu0 %4012 }
 0x690   : > { %v4047_v14 = vmul.f32 0.00390625, %v4013_v63 }
 0x691   : > { %v4016_v15 = vpop.xlane.xlu1 %4015 }
 0x692   : > { %v4059_v4 = vadd.f32 1e-12, %v4047_v14  ;;  %v4048_v2 = vmul.f32 0.00390625, %v4016_v15 }
 0x694   : > { %5326 = vrsqrt.f32 %v4059_v4  ;;  %v4060_v44 = vadd.f32 1e-12, %v4048_v2 }
 0x696   : > { %5328 = vrsqrt.f32 %v4060_v44 }
 0x697   : > { %v4019_v38 = vpop.xlane.xlu0 %4018 }
 0x698   : > { %v4049_v57 = vmul.f32 0.00390625, %v4019_v38 }
 0x699   : > { %v4022_v51 = vpop.xlane.xlu1 %4021 }
 0x69a   : > { %v4061_v6 = vadd.f32 1e-12, %v4049_v57  ;;  %v4050_v49 = vmul.f32 0.00390625, %v4022_v51 }
 0x69c   : > { %5330 = vrsqrt.f32 %v4061_v6  ;;  %v4062_v8 = vadd.f32 1e-12, %v4050_v49 }
 0x69e   : > { %v5327_v25 = vpop.eup %5326  ;;  %5332 = vrsqrt.f32 %v4062_v8 }
 0x69f   : > { %v4083_v31 = vmul.f32 %v5327_v25, %v7412_v29  ;;  %v4084_v19 = vmul.f32 %v5327_v25, %v7415_v39  ;;  %v4025_v46 = vpop.xlane.xlu0 %4024 }
 0x6a0   : > { %v5329_v5 = vpop.eup %5328  ;;  %v4051_v41 = vmul.f32 0.00390625, %v4025_v46 }
 0x6a1   : > { %v4115_v37 = vmul.f32 %v7533_v11, %v4083_v31  ;;  %v4116_v24 = vmul.f32 %v7537_v47, %v4084_v19  ;;  %v4085_v28 = vmul.f32 %v5329_v5, %v7418_v56  ;;  %v4086_v61 = vmul.f32 %v5329_v5, %v7421_v58  ;;  %v4028_v40 = vpop.xlane.xlu1 %4027 }
 0x6a2   : > { %v4063_v23 = vadd.f32 1e-12, %v4051_v41  ;;  %v4052_v42 = vmul.f32 0.00390625, %v4028_v40 }
 0x6a3   : > { %v4147_v9 = vadd.f32 %v7541_v59, %v4115_v37  ;;  %v4148_v29 = vadd.f32 %v7545_v20, %v4116_v24  ;;  %v4117_v39 = vmul.f32 %v7533_v11, %v4085_v28  ;;  %v4118_v36 = vmul.f32 %v7537_v47, %v4086_v61 }
 0x6a4   : > { %5334 = vrsqrt.f32 %v4063_v23  ;;  %v4064_v12 = vadd.f32 1e-12, %v4052_v42 }
 0x6a5   : > { %4171 = vst [vmem:[%s7558_s29] sm:$0xff] %v4147_v9  ;;  %4172 = vst [vmem:[%s7558_s29 + $0x8] sm:$0xff] %v4148_v29  ;;  %v4149_v56 = vadd.f32 %v7541_v59, %v4117_v39  ;;  %v4150_v58 = vadd.f32 %v7545_v20, %v4118_v36 }
 0x6a6   : > { %v5331_v52 = vpop.eup %5330  ;;  %5336 = vrsqrt.f32 %v4064_v12 }
 0x6a7   : > { %4173 = vst [vmem:[%s7558_s29 + $0x10] sm:$0xff] %v4149_v56  ;;  %4174 = vst [vmem:[%s7558_s29 + $0x18] sm:$0xff] %v4150_v58  ;;  %v4087_v60 = vmul.f32 %v5331_v52, %v7432_v50  ;;  %v4088_v32 = vmul.f32 %v5331_v52, %v7435_v13 }
 0x6a8   : > { %v5333_v53 = vpop.eup %5332 }
 0x6a9   : > { %v4119_v34 = vmul.f32 %v7533_v11, %v4087_v60  ;;  %v4120_v48 = vmul.f32 %v7537_v47, %v4088_v32  ;;  %v4089_v63 = vmul.f32 %v5333_v53, %v7438_v0  ;;  %v4090_v14 = vmul.f32 %v5333_v53, %v7441_v45 }
 0x6ab   : > { %v4151_v15 = vadd.f32 %v7541_v59, %v4119_v34  ;;  %v4152_v4 = vadd.f32 %v7545_v20, %v4120_v48  ;;  %v4121_v2 = vmul.f32 %v7533_v11, %v4089_v63  ;;  %v4122_v50 = vmul.f32 %v7537_v47, %v4090_v14 }
 0x6ad   : > { %4175 = vst [vmem:[%s7558_s29 + $0x20] sm:$0xff] %v4151_v15  ;;  %4176 = vst [vmem:[%s7558_s29 + $0x28] sm:$0xff] %v4152_v4  ;;  %v4153_v13 = vadd.f32 %v7541_v59, %v4121_v2  ;;  %v4154_v44 = vadd.f32 %v7545_v20, %v4122_v50 }
 0x6ae   : > { %v5335_v38 = vpop.eup %5334 }
 0x6af   : > { %4177 = vst [vmem:[%s7558_s29 + $0x30] sm:$0xff] %v4153_v13  ;;  %4178 = vst [vmem:[%s7558_s29 + $0x38] sm:$0xff] %v4154_v44  ;;  %v4091_v0 = vmul.f32 %v5335_v38, %v7452_v35  ;;  %v4092_v45 = vmul.f32 %v5335_v38, %v7455_v22 }
 0x6b0   : > { %v5337_v57 = vpop.eup %5336 }
 0x6b1   : > { %v4123_v51 = vmul.f32 %v7533_v11, %v4091_v0  ;;  %v4124_v6 = vmul.f32 %v7537_v47, %v4092_v45  ;;  %v4093_v49 = vmul.f32 %v5337_v57, %v7458_v7  ;;  %v4094_v8 = vmul.f32 %v5337_v57, %v7461_v33 }
 0x6b3   : > { %v4155_v3 = vadd.f32 %v7541_v59, %v4123_v51  ;;  %v4156_v25 = vadd.f32 %v7545_v20, %v4124_v6  ;;  %v4125_v55 = vmul.f32 %v7533_v11, %v4093_v49  ;;  %v4126_v35 = vmul.f32 %v7537_v47, %v4094_v8 }
 0x6b5   : > { %4179 = vst [vmem:[%s7558_s29 + $0x40] sm:$0xff] %v4155_v3  ;;  %4180 = vst [vmem:[%s7558_s29 + $0x48] sm:$0xff] %v4156_v25  ;;  %v4157_v22 = vadd.f32 %v7541_v59, %v4125_v55  ;;  %v4158_v31 = vadd.f32 %v7545_v20, %v4126_v35 }
 0x6b7   : > { %4181 = vst [vmem:[%s7558_s29 + $0x50] sm:$0xff] %v4157_v22  ;;  %4182 = vst [vmem:[%s7558_s29 + $0x58] sm:$0xff] %v4158_v31 }
 0x6cd   : > { %v4031_v19 = vpop.xlane.xlu0 %4030 }
 0x6ce   : > { %v4053_v7 = vmul.f32 0.00390625, %v4031_v19 }
 0x6cf   : > { %v4034_v46 = vpop.xlane.xlu1 %4033 }
 0x6d0   : > { %v4065_v33 = vadd.f32 1e-12, %v4053_v7  ;;  %v4054_v5 = vmul.f32 0.00390625, %v4034_v46 }
 0x6d2   : > { %5338 = vrsqrt.f32 %v4065_v33  ;;  %v4066_v41 = vadd.f32 1e-12, %v4054_v5 }
 0x6d4   : > { %5340 = vrsqrt.f32 %v4066_v41 }
 0x6d5   : > { %v4037_v37 = vpop.xlane.xlu0 %4036 }
 0x6d6   : > { %v4055_v24 = vmul.f32 0.00390625, %v4037_v37 }
 0x6d7   : > { %v4040_v28 = vpop.xlane.xlu1 %4039 }
 0x6d8   : > { %v4067_v61 = vadd.f32 1e-12, %v4055_v24  ;;  %v4056_v40 = vmul.f32 0.00390625, %v4040_v28 }
 0x6da   : > { %5342 = vrsqrt.f32 %v4067_v61  ;;  %v4068_v23 = vadd.f32 1e-12, %v4056_v40 }
 0x6dc   : > { %v5339_v42 = vpop.eup %5338  ;;  %5344 = vrsqrt.f32 %v4068_v23 }
 0x6dd   : > { %v4095_v9 = vmul.f32 %v5339_v42, %v7472_v26  ;;  %v4096_v29 = vmul.f32 %v5339_v42, %v7475_v54  ;;  %v4043_v39 = vpop.xlane.xlu0 %4042 }
 0x6de   : > { %v5341_v36 = vpop.eup %5340  ;;  %v4057_v12 = vmul.f32 0.00390625, %v4043_v39 }
 0x6df   : > { %v4127_v56 = vmul.f32 %v7533_v11, %v4095_v9  ;;  %v4128_v58 = vmul.f32 %v7537_v47, %v4096_v29  ;;  %v4097_v52 = vmul.f32 %v5341_v36, %v7478_v18  ;;  %v4098_v60 = vmul.f32 %v5341_v36, %v7481_v21  ;;  %v4046_v32 = vpop.xlane.xlu1 %4045 }
 0x6e0   : > { %v4069_v53 = vadd.f32 1e-12, %v4057_v12  ;;  %v4058_v26 = vmul.f32 0.00390625, %v4046_v32 }
 0x6e1   : > { %v4159_v54 = vadd.f32 %v7541_v59, %v4127_v56  ;;  %v4160_v34 = vadd.f32 %v7545_v20, %v4128_v58  ;;  %v4129_v48 = vmul.f32 %v7533_v11, %v4097_v52  ;;  %v4130_v63 = vmul.f32 %v7537_v47, %v4098_v60 }
 0x6e2   : > { %5346 = vrsqrt.f32 %v4069_v53  ;;  %v4070_v14 = vadd.f32 1e-12, %v4058_v26 }
 0x6e3   : > { %4183 = vst [vmem:[%s7558_s29 + $0x60] sm:$0xff] %v4159_v54  ;;  %4184 = vst [vmem:[%s7558_s29 + $0x68] sm:$0xff] %v4160_v34  ;;  %v4161_v18 = vadd.f32 %v7541_v59, %v4129_v48  ;;  %v4162_v21 = vadd.f32 %v7545_v20, %v4130_v63 }
 0x6e4   : > { %v5343_v15 = vpop.eup %5342  ;;  %5348 = vrsqrt.f32 %v4070_v14 }
 0x6e5   : > { %4185 = vst [vmem:[%s7558_s29 + $0x70] sm:$0xff] %v4161_v18  ;;  %4186 = vst [vmem:[%s7558_s29 + $0x78] sm:$0xff] %v4162_v21  ;;  %v4099_v4 = vmul.f32 %v5343_v15, %v7492_v16  ;;  %v4100_v2 = vmul.f32 %v5343_v15, %v7495_v10 }
 0x6e6   : > { %v5345_v50 = vpop.eup %5344 }
 0x6e7   : > { %v4131_v13 = vmul.f32 %v7533_v11, %v4099_v4  ;;  %v4132_v44 = vmul.f32 %v7537_v47, %v4100_v2  ;;  %v4101_v38 = vmul.f32 %v5345_v50, %v7498_v27  ;;  %v4102_v0 = vmul.f32 %v5345_v50, %v7501_v17 }
 0x6e9   : > { %v4163_v45 = vadd.f32 %v7541_v59, %v4131_v13  ;;  %v4164_v57 = vadd.f32 %v7545_v20, %v4132_v44  ;;  %v4133_v16 = vmul.f32 %v7533_v11, %v4101_v38  ;;  %v4134_v51 = vmul.f32 %v7537_v47, %v4102_v0 }
 0x6eb   : > { %4187 = vst [vmem:[%s7558_s29 + $0x80] sm:$0xff] %v4163_v45  ;;  %4188 = vst [vmem:[%s7558_s29 + $0x88] sm:$0xff] %v4164_v57  ;;  %v4165_v10 = vadd.f32 %v7541_v59, %v4133_v16  ;;  %v4166_v6 = vadd.f32 %v7545_v20, %v4134_v51 }
 0x6ec   : > { %v5347_v49 = vpop.eup %5346 }
 0x6ed   : > { %4189 = vst [vmem:[%s7558_s29 + $0x90] sm:$0xff] %v4165_v10  ;;  %4190 = vst [vmem:[%s7558_s29 + $0x98] sm:$0xff] %v4166_v6  ;;  %v4103_v27 = vmul.f32 %v5347_v49, %v7512_v43  ;;  %v4104_v17 = vmul.f32 %v5347_v49, %v7515_v30 }
 0x6ee   : > { %v5349_v8 = vpop.eup %5348 }
 0x6ef   : > { %v4135_v3 = vmul.f32 %v7533_v11, %v4103_v27  ;;  %v4136_v25 = vmul.f32 %v7537_v47, %v4104_v17  ;;  %v4105_v55 = vmul.f32 %v5349_v8, %v7518_v62  ;;  %v4106_v35 = vmul.f32 %v5349_v8, %v7521_v1 }
 0x6f1   : > { %v4167_v22 = vadd.f32 %v7541_v59, %v4135_v3  ;;  %v4168_v43 = vadd.f32 %v7545_v20, %v4136_v25  ;;  %v4137_v30 = vmul.f32 %v7533_v11, %v4105_v55  ;;  %v4138_v31 = vmul.f32 %v7537_v47, %v4106_v35 }
 0x6f3   : > { %4191 = vst [vmem:[%s7558_s29 + $0xa0] sm:$0xff] %v4167_v22  ;;  %4192 = vst [vmem:[%s7558_s29 + $0xa8] sm:$0xff] %v4168_v43  ;;  %v4169_v62 = vadd.f32 %v7541_v59, %v4137_v30  ;;  %v4170_v1 = vadd.f32 %v7545_v20, %v4138_v31 }
 0x6f5   : > { %4193 = vst [vmem:[%s7558_s29 + $0xb0] sm:$0xff] %v4169_v62  ;;  %4194 = vst [vmem:[%s7558_s29 + $0xb8] sm:$0xff] %v4170_v1 }
 0x6f6   : > { %5542 = shalt.err (!%p5539_p8)
}
 0x6f7   : > { %s5543_s10 = scalar_lea.hbm %s7645_s2, 3072  ;;  %s5547_s19 = scalar_lea.hbm %s7703_s7, 12288 }
 0x6f8   : > { %p5544_p0 = scmp.ne.s32.totalorder %s7645_s2, %s5543_s10  ;;  %p5548_p13 = scmp.lt.u32.totalorder %s7645_s2, %s7703_s7 }
 0x6f9   : > { %p5549_p3 = scmp.lt.u32.totalorder %s5547_s19, %s5543_s10  ;;  %p5551_p9 = scmp.lt.u32.totalorder %s5543_s10, %s7645_s2 }
 0x6fa   : > { %p5545_p2 = pnand %p5544_p0, %p5803_p11 }
 0x6fb   : > { %p5550_p7 = por %p5549_p3, %p5548_p13 }
 0x6fc   : > { %p5546_p10 = pneg %p5545_p2 }
 0x6fd   : > { %p5552_p12 = por %p5551_p9, %p5550_p7 }
 0x6ff   : > { %p5553_p5 = pnand %p5552_p12, %p5546_p10 }
 0x701   : > { %5556 = shalt.err (!%p5553_p5)
}
 0x702   : > { %s5621_s11 = smov 256   ;;  %s5622_s29 = smov 16  }
 0x703   : > { %4796 = dma.vmem_to_hbm [thread:$0]  (%p5803_p11), %s7651_s0, 3072, %s7645_s2, %s4196_s30, %s5621_s11, %s5621_s11, %s5622_s29  }
 0x704 PF: > { %s7848_s23 = sld [smem:[#allocation17_spill]]  ;;  %p4826_p1 = scmp.ge.s32.totalorder %s5607_s27, 2 }
 0x705   : > { %s4225_s28 = sand.u32 1, %s5595_s24  }
 0x706   : > { %s4226_s9 = scalar_lea.sflag [#allocation4], %s4225_s28 }
 0x70a   : > { %p7849_p4 = scmp.ne.s32.totalorder %s7848_s23, 0 }
 0x70c   : > { %p4816_p6 = pnand %p4826_p1, %p7849_p4 }
 0x70e   : > { %5590 = dma.done.wait (!%p4816_p6), %s4226_s9, 3072  }
 0x70f   : > { %5592 = vsyncadd (!%p4816_p6), %s4226_s9, 4294964224  ;;  %p24_p8 = scmp.ge.s32.totalorder %s5768_s21, 6   ;;  %s7850_s24 = smov %s5599_s25 }
 0x710   : > { %s7851_s25 = smov %s5603_s26  ;;  %s7852_s26 = smov %s5799_s13 }
 0x711   : > { %s7853_s27 = smov %s5768_s21  ;;  %26 = sbr.rel (!%p24_p8) target bundleno = 12 (0xc), region = 118 }
 0x718   :  { %4231 = vsyncpa [#allocation3], 1 }
 0x719   :  { %4233 = vsyncpa [#allocation3 + $0x1], 1 }
 0x71a   :  { %4234 = vsyncpa [#allocation6], 1 }
 0x71b   :  { %4236 = vsyncpa [#allocation6 + $0x1], 1 }
 0x71c   :  { %4237 = vsyncpa [#allocation9], 1 }
 0x71d   :  { %4238 = vsyncpa [#allocation4], 1 }
 0x71e   :  { %4240 = vsyncpa [#allocation4 + $0x1], 1 }

</bundles_post_ra>
